<compile_context>
chip_gen: v7x
topology: tpu7x:2x2x1
jax: 0.10.0
libtpu: 0.0.40
codegen_flags: <defaults>
</compile_context>

<pallas_src>
import functools

import jax
import jax.numpy as jnp
from jax.experimental import pallas as pl
from jax.experimental.pallas import tpu as pltpu


# ----------------------------------------------------------------------------
# Fused Pallas kernel: conv1 + bias + ReLU + conv2 + bias + residual
# ----------------------------------------------------------------------------

def _drb_kernel(x_ref, w1_ref, b1_ref, w2_ref, b2_ref, o_ref, pad_scr,
                *, H, W, d):
    """One fused DilatedResidualBlock step for a single batch element.

    x_ref   : (1, C, H*W)  input, channels-first, lane-dense over H*W
    w1_ref  : (9, C, C)    conv1 taps, tap t = kh*3 + kw, (ci, co) layout
    b1_ref  : (1, C)
    w2_ref  : (9, C, C)    conv2 taps
    b2_ref  : (1, C)
    o_ref   : (1, C, H*W)  output, channels-first, lane-dense over H*W
    pad_scr : (Hp, Wp, C)  zero-padded channels-last staging scratch, reused for
                           the conv1 input and then the ReLU(conv1) intermediate.
    """
    HW = H * W
    C = o_ref.shape[1]

    # ---- stage x (channels-last) into the zero-padded scratch ----------------
    # Unconditional zeroing keeps the borders correct even if the batch axis is
    # sharded across TensorCores (each core owns its own scratch instance).
    pad_scr[...] = jnp.zeros_like(pad_scr)
    x_cl = jnp.transpose(x_ref[0])                                # (HW, C)  XLU
    pad_scr[d:d + H, d:d + W, :] = x_cl.reshape(H, W, C)

    def conv3x3(w_ref):
        # Dilated 3x3 conv as 9 shifted GEMMs, accumulated in registers.
        acc = jnp.zeros((HW, C), jnp.float32)
        for kh in range(3):
            for kw in range(3):
                t = kh * 3 + kw
                s = pad_scr[kh * d:kh * d + H, kw * d:kw * d + W, :]  # (H, W, C)
                acc = acc + jnp.dot(s.reshape(HW, C), w_ref[t],
                                    preferred_element_type=jnp.float32)
        return acc

    # ---- conv1 + bias + ReLU --------------------------------------------------
    h = jnp.maximum(conv3x3(w1_ref) + b1_ref[...], 0.0)          # (HW, C)

    # Restage the ReLU output in the SAME scratch (interior only; borders stay 0,
    # which is exactly conv2's "same" padding).  All tap reads for conv1 are
    # traced before this store, so ref ordering keeps it correct.
    pad_scr[d:d + H, d:d + W, :] = h.reshape(H, W, C)

    # ---- conv2 + bias + residual ----------------------------------------------
    y = conv3x3(w2_ref) + b2_ref[...]                            # (HW, C)

    # Transpose to channels-first inside the kernel (XLU) so the HBM store is
    # lane-dense over H*W instead of a masked C-wide store.
    y_cf = jnp.transpose(y)                                      # (C, HW)
    o_ref[0] = (y_cf + x_ref[0].astype(jnp.float32)).astype(o_ref.dtype)


# ----------------------------------------------------------------------------
# Wrapper
# ----------------------------------------------------------------------------

def dilated_residual_block(x, params, *, dilation):
    """x: (B, Cin, H, W) float32 (same layout as the PyTorch module)."""
    B, Cin, H, W = x.shape
    w1, b1, w2, b2 = params['w1'], params['b1'], params['w2'], params['b2']
    Cout = w1.shape[0]
    assert w1.shape == (Cout, Cin, 3, 3) and w2.shape == (Cout, Cout, 3, 3)
    assert Cin == Cout, "residual add requires in_planes == out_planes"
    d = int(dilation)
    Hp, Wp = H + 2 * d, W + 2 * d
    HW = H * W

    # Channels-first flattened view only (no wrapper-side transpose / pad).
    x_cf = x.reshape(B, Cin, HW)

    # PyTorch conv weight (Cout, Cin, 3, 3) -> per-tap GEMM rhs (9, Cin, Cout):
    # w_r[t][ci, co] == w[co, ci, kh, kw] with t = kh*3 + kw.
    w1r = jnp.transpose(w1, (2, 3, 1, 0)).reshape(9, Cin, Cout)
    w2r = jnp.transpose(w2, (2, 3, 1, 0)).reshape(9, Cout, Cout)
    b1r = b1.reshape(1, Cout)
    b2r = b2.reshape(1, Cout)

    kern = functools.partial(_drb_kernel, H=H, W=W, d=d)
    out = pl.pallas_call(
        kern,
        out_shape=jax.ShapeDtypeStruct((B, Cout, HW), x.dtype),
        grid_spec=pltpu.PrefetchScalarGridSpec(
            num_scalar_prefetch=0,
            grid=(B,),
            in_specs=[
                pl.BlockSpec((1, Cin, HW), lambda b: (b, 0, 0)),
                pl.BlockSpec((9, Cin, Cout), lambda b: (0, 0, 0)),
                pl.BlockSpec((1, Cout), lambda b: (0, 0)),
                pl.BlockSpec((9, Cout, Cout), lambda b: (0, 0, 0)),
                pl.BlockSpec((1, Cout), lambda b: (0, 0)),
            ],
            out_specs=pl.BlockSpec((1, Cout, HW), lambda b: (b, 0, 0)),
            scratch_shapes=[pltpu.VMEM((Hp, Wp, Cout), jnp.float32)],
        ),
        compiler_params=pltpu.CompilerParams(
            dimension_semantics=("parallel",)),
    )(x_cf, w1r, b1r, w2r, b2r)
    return out.reshape(B, Cout, H, W)


# ----------------------------------------------------------------------------
# Pure-JAX reference (mirrors the PyTorch forward exactly)
# ----------------------------------------------------------------------------

def _ref_forward(x, params, dilation):
    d = int(dilation)
    dn = ('NCHW', 'OIHW', 'NCHW')
    y = jax.lax.conv_general_dilated(
        x, params['w1'], window_strides=(1, 1),
        padding=((d, d), (d, d)), rhs_dilation=(d, d),
        dimension_numbers=dn) + params['b1'][None, :, None, None]
    y = jnp.maximum(y, 0.0)
    y = jax.lax.conv_general_dilated(
        y, params['w2'], window_strides=(1, 1),
        padding=((d, d), (d, d)), rhs_dilation=(d, d),
        dimension_numbers=dn) + params['b2'][None, :, None, None]
    return y + x


def init_params(key, in_planes, out_planes):
    k1, k2, k3, k4 = jax.random.split(key, 4)
    return {
        'w1': 0.1 * jax.random.normal(k1, (out_planes, in_planes, 3, 3), jnp.float32),
        'b1': 0.1 * jax.random.normal(k2, (out_planes,), jnp.float32),
        'w2': 0.1 * jax.random.normal(k3, (out_planes, out_planes, 3, 3), jnp.float32),
        'b2': 0.1 * jax.random.normal(k4, (out_planes,), jnp.float32),
    }


# ----------------------------------------------------------------------------

if __name__ == "__main__":
    B, C, H, W = 2, 4, 16, 16       # small shapes consistent with the module
    dilation = 2                    # in_planes == out_planes == C

    key = jax.random.PRNGKey(0)
    pkey, xkey = jax.random.split(key)
    params = init_params(pkey, C, C)
    x = jax.random.normal(xkey, (B, C, H, W), jnp.float32)

    out = dilated_residual_block(x, params, dilation=dilation)
    out = jax.block_until_ready(out)
    assert out.shape == (B, C, H, W), out.shape
    assert bool(jnp.all(jnp.isfinite(out)))

    ref = _ref_forward(x, params, dilation)
    err = float(jnp.max(jnp.abs(out - ref)))
    assert err < 1e-3, f"max abs err vs reference conv: {err}"

    print("KERNEL_OK")
</pallas_src>

<mosaic_0001>
module attributes {stable_mosaic.version = 11 : i64} {
  func.func @_drb_kernel(%arg0: i32, %arg1: memref<1x4x256xf32, #tpu.memory_space<vmem>>, %arg2: memref<9x4x4xf32, #tpu.memory_space<vmem>>, %arg3: memref<1x4xf32, #tpu.memory_space<vmem>>, %arg4: memref<9x4x4xf32, #tpu.memory_space<vmem>>, %arg5: memref<1x4xf32, #tpu.memory_space<vmem>>, %arg6: memref<1x4x256xf32, #tpu.memory_space<vmem>>, %arg7: memref<20x20x4xf32, #tpu.memory_space<vmem>>) attributes {dimension_semantics = [#tpu.dimension_semantics<parallel>], iteration_bounds = array<i64: 2>, scalar_prefetch = 0 : i64, scratch_operands = 1 : i64, tpu.core_type = #tpu.core_type<tc>, window_params = [{transform_indices = @transform_0, window_bounds = array<i64: 1, 4, 256>}, {pipeline_mode = #tpu.pipeline_mode<synchronous>, transform_indices = @transform_1, window_bounds = array<i64: 9, 4, 4>}, {pipeline_mode = #tpu.pipeline_mode<synchronous>, transform_indices = @transform_2, window_bounds = array<i64: 1, 4>}, {pipeline_mode = #tpu.pipeline_mode<synchronous>, transform_indices = @transform_3, window_bounds = array<i64: 9, 4, 4>}, {pipeline_mode = #tpu.pipeline_mode<synchronous>, transform_indices = @transform_4, window_bounds = array<i64: 1, 4>}, {transform_indices = @transform_5, window_bounds = array<i64: 1, 4, 256>}]} {
    %cst = arith.constant 0.000000e+00 : f32
    %0 = vector.broadcast %cst : f32 to vector<20x20x4xf32>
    %c0 = arith.constant 0 : index
    %c0_0 = arith.constant 0 : index
    %c0_1 = arith.constant 0 : index
    %1 = vector.load %arg7[%c0, %c0_0, %c0_1] : memref<20x20x4xf32, #tpu.memory_space<vmem>>, vector<20x20x4xf32>
    tpu.vector_store %arg7[%c0, %c0_0, %c0_1], %0 {strides = array<i32>} : memref<20x20x4xf32, #tpu.memory_space<vmem>>, vector<20x20x4xf32>,
    %c0_2 = arith.constant 0 : index
    %c0_3 = arith.constant 0 : index
    %c0_4 = arith.constant 0 : index
    %2 = vector.load %arg1[%c0_2, %c0_3, %c0_4] : memref<1x4x256xf32, #tpu.memory_space<vmem>>, vector<1x4x256xf32>
    %3 = vector.shape_cast %2 : vector<1x4x256xf32> to vector<4x256xf32>
    %4 = tpu.transpose %3, [1, 0] : vector<4x256xf32> -> vector<256x4xf32>
    %5 = vector.shape_cast %4 : vector<256x4xf32> to vector<16x16x4xf32>
    %c2 = arith.constant 2 : index
    %c2_5 = arith.constant 2 : index
    %c0_6 = arith.constant 0 : index
    %6 = vector.load %arg7[%c2, %c2_5, %c0_6] : memref<20x20x4xf32, #tpu.memory_space<vmem>>, vector<16x16x4xf32>
    tpu.vector_store %arg7[%c2, %c2_5, %c0_6], %5 {strides = array<i32>} : memref<20x20x4xf32, #tpu.memory_space<vmem>>, vector<16x16x4xf32>,
    %cst_7 = arith.constant 0.000000e+00 : f32
    %7 = vector.broadcast %cst_7 : f32 to vector<256x4xf32>
    %c0_8 = arith.constant 0 : index
    %c0_9 = arith.constant 0 : index
    %c0_10 = arith.constant 0 : index
    %8 = vector.load %arg7[%c0_8, %c0_9, %c0_10] : memref<20x20x4xf32, #tpu.memory_space<vmem>>, vector<16x16x4xf32>
    %9 = vector.shape_cast %8 : vector<16x16x4xf32> to vector<256x4xf32>
    %c0_11 = arith.constant 0 : index
    %c0_12 = arith.constant 0 : index
    %c0_13 = arith.constant 0 : index
    %10 = vector.load %arg2[%c0_11, %c0_12, %c0_13] : memref<9x4x4xf32, #tpu.memory_space<vmem>>, vector<1x4x4xf32>
    %11 = vector.shape_cast %10 : vector<1x4x4xf32> to vector<4x4xf32>
    %cst_14 = arith.constant dense<0.000000e+00> : vector<256x4xf32>
    %12 = tpu.matmul %9, %11, %cst_14 {dimension_numbers = #tpu.dot_dimension_numbers<[1], [0], [0], [1], [0, 0, 1, 1], [], []>} : vector<256x4xf32>, vector<4x4xf32>, vector<256x4xf32> -> vector<256x4xf32>
    %13 = arith.addf %7, %12 : vector<256x4xf32>
    %c0_15 = arith.constant 0 : index
    %c2_16 = arith.constant 2 : index
    %c0_17 = arith.constant 0 : index
    %14 = vector.load %arg7[%c0_15, %c2_16, %c0_17] : memref<20x20x4xf32, #tpu.memory_space<vmem>>, vector<16x16x4xf32>
    %15 = vector.shape_cast %14 : vector<16x16x4xf32> to vector<256x4xf32>
    %c1 = arith.constant 1 : index
    %c0_18 = arith.constant 0 : index
    %c0_19 = arith.constant 0 : index
    %16 = vector.load %arg2[%c1, %c0_18, %c0_19] : memref<9x4x4xf32, #tpu.memory_space<vmem>>, vector<1x4x4xf32>
    %17 = vector.shape_cast %16 : vector<1x4x4xf32> to vector<4x4xf32>
    %cst_20 = arith.constant dense<0.000000e+00> : vector<256x4xf32>
    %18 = tpu.matmul %15, %17, %cst_20 {dimension_numbers = #tpu.dot_dimension_numbers<[1], [0], [0], [1], [0, 0, 1, 1], [], []>} : vector<256x4xf32>, vector<4x4xf32>, vector<256x4xf32> -> vector<256x4xf32>
    %19 = arith.addf %13, %18 : vector<256x4xf32>
    %c0_21 = arith.constant 0 : index
    %c4 = arith.constant 4 : index
    %c0_22 = arith.constant 0 : index
    %20 = vector.load %arg7[%c0_21, %c4, %c0_22] : memref<20x20x4xf32, #tpu.memory_space<vmem>>, vector<16x16x4xf32>
    %21 = vector.shape_cast %20 : vector<16x16x4xf32> to vector<256x4xf32>
    %c2_23 = arith.constant 2 : index
    %c0_24 = arith.constant 0 : index
    %c0_25 = arith.constant 0 : index
    %22 = vector.load %arg2[%c2_23, %c0_24, %c0_25] : memref<9x4x4xf32, #tpu.memory_space<vmem>>, vector<1x4x4xf32>
    %23 = vector.shape_cast %22 : vector<1x4x4xf32> to vector<4x4xf32>
    %cst_26 = arith.constant dense<0.000000e+00> : vector<256x4xf32>
    %24 = tpu.matmul %21, %23, %cst_26 {dimension_numbers = #tpu.dot_dimension_numbers<[1], [0], [0], [1], [0, 0, 1, 1], [], []>} : vector<256x4xf32>, vector<4x4xf32>, vector<256x4xf32> -> vector<256x4xf32>
    %25 = arith.addf %19, %24 : vector<256x4xf32>
    %c2_27 = arith.constant 2 : index
    %c0_28 = arith.constant 0 : index
    %c0_29 = arith.constant 0 : index
    %26 = vector.load %arg7[%c2_27, %c0_28, %c0_29] : memref<20x20x4xf32, #tpu.memory_space<vmem>>, vector<16x16x4xf32>
    %27 = vector.shape_cast %26 : vector<16x16x4xf32> to vector<256x4xf32>
    %c3 = arith.constant 3 : index
    %c0_30 = arith.constant 0 : index
    %c0_31 = arith.constant 0 : index
    %28 = vector.load %arg2[%c3, %c0_30, %c0_31] : memref<9x4x4xf32, #tpu.memory_space<vmem>>, vector<1x4x4xf32>
    %29 = vector.shape_cast %28 : vector<1x4x4xf32> to vector<4x4xf32>
    %cst_32 = arith.constant dense<0.000000e+00> : vector<256x4xf32>
    %30 = tpu.matmul %27, %29, %cst_32 {dimension_numbers = #tpu.dot_dimension_numbers<[1], [0], [0], [1], [0, 0, 1, 1], [], []>} : vector<256x4xf32>, vector<4x4xf32>, vector<256x4xf32> -> vector<256x4xf32>
    %31 = arith.addf %25, %30 : vector<256x4xf32>
    %c2_33 = arith.constant 2 : index
    %c2_34 = arith.constant 2 : index
    %c0_35 = arith.constant 0 : index
    %32 = vector.load %arg7[%c2_33, %c2_34, %c0_35] : memref<20x20x4xf32, #tpu.memory_space<vmem>>, vector<16x16x4xf32>
    %33 = vector.shape_cast %32 : vector<16x16x4xf32> to vector<256x4xf32>
    %c4_36 = arith.constant 4 : index
    %c0_37 = arith.constant 0 : index
    %c0_38 = arith.constant 0 : index
    %34 = vector.load %arg2[%c4_36, %c0_37, %c0_38] : memref<9x4x4xf32, #tpu.memory_space<vmem>>, vector<1x4x4xf32>
    %35 = vector.shape_cast %34 : vector<1x4x4xf32> to vector<4x4xf32>
    %cst_39 = arith.constant dense<0.000000e+00> : vector<256x4xf32>
    %36 = tpu.matmul %33, %35, %cst_39 {dimension_numbers = #tpu.dot_dimension_numbers<[1], [0], [0], [1], [0, 0, 1, 1], [], []>} : vector<256x4xf32>, vector<4x4xf32>, vector<256x4xf32> -> vector<256x4xf32>
    %37 = arith.addf %31, %36 : vector<256x4xf32>
    %c2_40 = arith.constant 2 : index
    %c4_41 = arith.constant 4 : index
    %c0_42 = arith.constant 0 : index
    %38 = vector.load %arg7[%c2_40, %c4_41, %c0_42] : memref<20x20x4xf32, #tpu.memory_space<vmem>>, vector<16x16x4xf32>
    %39 = vector.shape_cast %38 : vector<16x16x4xf32> to vector<256x4xf32>
    %c5 = arith.constant 5 : index
    %c0_43 = arith.constant 0 : index
    %c0_44 = arith.constant 0 : index
    %40 = vector.load %arg2[%c5, %c0_43, %c0_44] : memref<9x4x4xf32, #tpu.memory_space<vmem>>, vector<1x4x4xf32>
    %41 = vector.shape_cast %40 : vector<1x4x4xf32> to vector<4x4xf32>
    %cst_45 = arith.constant dense<0.000000e+00> : vector<256x4xf32>
    %42 = tpu.matmul %39, %41, %cst_45 {dimension_numbers = #tpu.dot_dimension_numbers<[1], [0], [0], [1], [0, 0, 1, 1], [], []>} : vector<256x4xf32>, vector<4x4xf32>, vector<256x4xf32> -> vector<256x4xf32>
    %43 = arith.addf %37, %42 : vector<256x4xf32>
    %c4_46 = arith.constant 4 : index
    %c0_47 = arith.constant 0 : index
    %c0_48 = arith.constant 0 : index
    %44 = vector.load %arg7[%c4_46, %c0_47, %c0_48] : memref<20x20x4xf32, #tpu.memory_space<vmem>>, vector<16x16x4xf32>
    %45 = vector.shape_cast %44 : vector<16x16x4xf32> to vector<256x4xf32>
    %c6 = arith.constant 6 : index
    %c0_49 = arith.constant 0 : index
    %c0_50 = arith.constant 0 : index
    %46 = vector.load %arg2[%c6, %c0_49, %c0_50] : memref<9x4x4xf32, #tpu.memory_space<vmem>>, vector<1x4x4xf32>
    %47 = vector.shape_cast %46 : vector<1x4x4xf32> to vector<4x4xf32>
    %cst_51 = arith.constant dense<0.000000e+00> : vector<256x4xf32>
    %48 = tpu.matmul %45, %47, %cst_51 {dimension_numbers = #tpu.dot_dimension_numbers<[1], [0], [0], [1], [0, 0, 1, 1], [], []>} : vector<256x4xf32>, vector<4x4xf32>, vector<256x4xf32> -> vector<256x4xf32>
    %49 = arith.addf %43, %48 : vector<256x4xf32>
    %c4_52 = arith.constant 4 : index
    %c2_53 = arith.constant 2 : index
    %c0_54 = arith.constant 0 : index
    %50 = vector.load %arg7[%c4_52, %c2_53, %c0_54] : memref<20x20x4xf32, #tpu.memory_space<vmem>>, vector<16x16x4xf32>
    %51 = vector.shape_cast %50 : vector<16x16x4xf32> to vector<256x4xf32>
    %c7 = arith.constant 7 : index
    %c0_55 = arith.constant 0 : index
    %c0_56 = arith.constant 0 : index
    %52 = vector.load %arg2[%c7, %c0_55, %c0_56] : memref<9x4x4xf32, #tpu.memory_space<vmem>>, vector<1x4x4xf32>
    %53 = vector.shape_cast %52 : vector<1x4x4xf32> to vector<4x4xf32>
    %cst_57 = arith.constant dense<0.000000e+00> : vector<256x4xf32>
    %54 = tpu.matmul %51, %53, %cst_57 {dimension_numbers = #tpu.dot_dimension_numbers<[1], [0], [0], [1], [0, 0, 1, 1], [], []>} : vector<256x4xf32>, vector<4x4xf32>, vector<256x4xf32> -> vector<256x4xf32>
    %55 = arith.addf %49, %54 : vector<256x4xf32>
    %c4_58 = arith.constant 4 : index
    %c4_59 = arith.constant 4 : index
    %c0_60 = arith.constant 0 : index
    %56 = vector.load %arg7[%c4_58, %c4_59, %c0_60] : memref<20x20x4xf32, #tpu.memory_space<vmem>>, vector<16x16x4xf32>
    %57 = vector.shape_cast %56 : vector<16x16x4xf32> to vector<256x4xf32>
    %c8 = arith.constant 8 : index
    %c0_61 = arith.constant 0 : index
    %c0_62 = arith.constant 0 : index
    %58 = vector.load %arg2[%c8, %c0_61, %c0_62] : memref<9x4x4xf32, #tpu.memory_space<vmem>>, vector<1x4x4xf32>
    %59 = vector.shape_cast %58 : vector<1x4x4xf32> to vector<4x4xf32>
    %cst_63 = arith.constant dense<0.000000e+00> : vector<256x4xf32>
    %60 = tpu.matmul %57, %59, %cst_63 {dimension_numbers = #tpu.dot_dimension_numbers<[1], [0], [0], [1], [0, 0, 1, 1], [], []>} : vector<256x4xf32>, vector<4x4xf32>, vector<256x4xf32> -> vector<256x4xf32>
    %61 = arith.addf %55, %60 : vector<256x4xf32>
    %c0_64 = arith.constant 0 : index
    %c0_65 = arith.constant 0 : index
    %62 = vector.load %arg3[%c0_64, %c0_65] : memref<1x4xf32, #tpu.memory_space<vmem>>, vector<1x4xf32>
    %63 = vector.broadcast %62 : vector<1x4xf32> to vector<256x4xf32>
    %64 = arith.addf %61, %63 : vector<256x4xf32>
    %cst_66 = arith.constant 0.000000e+00 : f32
    %65 = vector.broadcast %cst_66 : f32 to vector<256x4xf32>
    %66 = arith.maximumf %64, %65 : vector<256x4xf32>
    %67 = vector.shape_cast %66 : vector<256x4xf32> to vector<16x16x4xf32>
    %c2_67 = arith.constant 2 : index
    %c2_68 = arith.constant 2 : index
    %c0_69 = arith.constant 0 : index
    %68 = vector.load %arg7[%c2_67, %c2_68, %c0_69] : memref<20x20x4xf32, #tpu.memory_space<vmem>>, vector<16x16x4xf32>
    tpu.vector_store %arg7[%c2_67, %c2_68, %c0_69], %67 {strides = array<i32>} : memref<20x20x4xf32, #tpu.memory_space<vmem>>, vector<16x16x4xf32>,
    %cst_70 = arith.constant 0.000000e+00 : f32
    %69 = vector.broadcast %cst_70 : f32 to vector<256x4xf32>
    %c0_71 = arith.constant 0 : index
    %c0_72 = arith.constant 0 : index
    %c0_73 = arith.constant 0 : index
    %70 = vector.load %arg7[%c0_71, %c0_72, %c0_73] : memref<20x20x4xf32, #tpu.memory_space<vmem>>, vector<16x16x4xf32>
    %71 = vector.shape_cast %70 : vector<16x16x4xf32> to vector<256x4xf32>
    %c0_74 = arith.constant 0 : index
    %c0_75 = arith.constant 0 : index
    %c0_76 = arith.constant 0 : index
    %72 = vector.load %arg4[%c0_74, %c0_75, %c0_76] : memref<9x4x4xf32, #tpu.memory_space<vmem>>, vector<1x4x4xf32>
    %73 = vector.shape_cast %72 : vector<1x4x4xf32> to vector<4x4xf32>
    %cst_77 = arith.constant dense<0.000000e+00> : vector<256x4xf32>
    %74 = tpu.matmul %71, %73, %cst_77 {dimension_numbers = #tpu.dot_dimension_numbers<[1], [0], [0], [1], [0, 0, 1, 1], [], []>} : vector<256x4xf32>, vector<4x4xf32>, vector<256x4xf32> -> vector<256x4xf32>
    %75 = arith.addf %69, %74 : vector<256x4xf32>
    %c0_78 = arith.constant 0 : index
    %c2_79 = arith.constant 2 : index
    %c0_80 = arith.constant 0 : index
    %76 = vector.load %arg7[%c0_78, %c2_79, %c0_80] : memref<20x20x4xf32, #tpu.memory_space<vmem>>, vector<16x16x4xf32>
    %77 = vector.shape_cast %76 : vector<16x16x4xf32> to vector<256x4xf32>
    %c1_81 = arith.constant 1 : index
    %c0_82 = arith.constant 0 : index
    %c0_83 = arith.constant 0 : index
    %78 = vector.load %arg4[%c1_81, %c0_82, %c0_83] : memref<9x4x4xf32, #tpu.memory_space<vmem>>, vector<1x4x4xf32>
    %79 = vector.shape_cast %78 : vector<1x4x4xf32> to vector<4x4xf32>
    %cst_84 = arith.constant dense<0.000000e+00> : vector<256x4xf32>
    %80 = tpu.matmul %77, %79, %cst_84 {dimension_numbers = #tpu.dot_dimension_numbers<[1], [0], [0], [1], [0, 0, 1, 1], [], []>} : vector<256x4xf32>, vector<4x4xf32>, vector<256x4xf32> -> vector<256x4xf32>
    %81 = arith.addf %75, %80 : vector<256x4xf32>
    %c0_85 = arith.constant 0 : index
    %c4_86 = arith.constant 4 : index
    %c0_87 = arith.constant 0 : index
    %82 = vector.load %arg7[%c0_85, %c4_86, %c0_87] : memref<20x20x4xf32, #tpu.memory_space<vmem>>, vector<16x16x4xf32>
    %83 = vector.shape_cast %82 : vector<16x16x4xf32> to vector<256x4xf32>
    %c2_88 = arith.constant 2 : index
    %c0_89 = arith.constant 0 : index
    %c0_90 = arith.constant 0 : index
    %84 = vector.load %arg4[%c2_88, %c0_89, %c0_90] : memref<9x4x4xf32, #tpu.memory_space<vmem>>, vector<1x4x4xf32>
    %85 = vector.shape_cast %84 : vector<1x4x4xf32> to vector<4x4xf32>
    %cst_91 = arith.constant dense<0.000000e+00> : vector<256x4xf32>
    %86 = tpu.matmul %83, %85, %cst_91 {dimension_numbers = #tpu.dot_dimension_numbers<[1], [0], [0], [1], [0, 0, 1, 1], [], []>} : vector<256x4xf32>, vector<4x4xf32>, vector<256x4xf32> -> vector<256x4xf32>
    %87 = arith.addf %81, %86 : vector<256x4xf32>
    %c2_92 = arith.constant 2 : index
    %c0_93 = arith.constant 0 : index
    %c0_94 = arith.constant 0 : index
    %88 = vector.load %arg7[%c2_92, %c0_93, %c0_94] : memref<20x20x4xf32, #tpu.memory_space<vmem>>, vector<16x16x4xf32>
    %89 = vector.shape_cast %88 : vector<16x16x4xf32> to vector<256x4xf32>
    %c3_95 = arith.constant 3 : index
    %c0_96 = arith.constant 0 : index
    %c0_97 = arith.constant 0 : index
    %90 = vector.load %arg4[%c3_95, %c0_96, %c0_97] : memref<9x4x4xf32, #tpu.memory_space<vmem>>, vector<1x4x4xf32>
    %91 = vector.shape_cast %90 : vector<1x4x4xf32> to vector<4x4xf32>
    %cst_98 = arith.constant dense<0.000000e+00> : vector<256x4xf32>
    %92 = tpu.matmul %89, %91, %cst_98 {dimension_numbers = #tpu.dot_dimension_numbers<[1], [0], [0], [1], [0, 0, 1, 1], [], []>} : vector<256x4xf32>, vector<4x4xf32>, vector<256x4xf32> -> vector<256x4xf32>
    %93 = arith.addf %87, %92 : vector<256x4xf32>
    %c2_99 = arith.constant 2 : index
    %c2_100 = arith.constant 2 : index
    %c0_101 = arith.constant 0 : index
    %94 = vector.load %arg7[%c2_99, %c2_100, %c0_101] : memref<20x20x4xf32, #tpu.memory_space<vmem>>, vector<16x16x4xf32>
    %95 = vector.shape_cast %94 : vector<16x16x4xf32> to vector<256x4xf32>
    %c4_102 = arith.constant 4 : index
    %c0_103 = arith.constant 0 : index
    %c0_104 = arith.constant 0 : index
    %96 = vector.load %arg4[%c4_102, %c0_103, %c0_104] : memref<9x4x4xf32, #tpu.memory_space<vmem>>, vector<1x4x4xf32>
    %97 = vector.shape_cast %96 : vector<1x4x4xf32> to vector<4x4xf32>
    %cst_105 = arith.constant dense<0.000000e+00> : vector<256x4xf32>
    %98 = tpu.matmul %95, %97, %cst_105 {dimension_numbers = #tpu.dot_dimension_numbers<[1], [0], [0], [1], [0, 0, 1, 1], [], []>} : vector<256x4xf32>, vector<4x4xf32>, vector<256x4xf32> -> vector<256x4xf32>
    %99 = arith.addf %93, %98 : vector<256x4xf32>
    %c2_106 = arith.constant 2 : index
    %c4_107 = arith.constant 4 : index
    %c0_108 = arith.constant 0 : index
    %100 = vector.load %arg7[%c2_106, %c4_107, %c0_108] : memref<20x20x4xf32, #tpu.memory_space<vmem>>, vector<16x16x4xf32>
    %101 = vector.shape_cast %100 : vector<16x16x4xf32> to vector<256x4xf32>
    %c5_109 = arith.constant 5 : index
    %c0_110 = arith.constant 0 : index
    %c0_111 = arith.constant 0 : index
    %102 = vector.load %arg4[%c5_109, %c0_110, %c0_111] : memref<9x4x4xf32, #tpu.memory_space<vmem>>, vector<1x4x4xf32>
    %103 = vector.shape_cast %102 : vector<1x4x4xf32> to vector<4x4xf32>
    %cst_112 = arith.constant dense<0.000000e+00> : vector<256x4xf32>
    %104 = tpu.matmul %101, %103, %cst_112 {dimension_numbers = #tpu.dot_dimension_numbers<[1], [0], [0], [1], [0, 0, 1, 1], [], []>} : vector<256x4xf32>, vector<4x4xf32>, vector<256x4xf32> -> vector<256x4xf32>
    %105 = arith.addf %99, %104 : vector<256x4xf32>
    %c4_113 = arith.constant 4 : index
    %c0_114 = arith.constant 0 : index
    %c0_115 = arith.constant 0 : index
    %106 = vector.load %arg7[%c4_113, %c0_114, %c0_115] : memref<20x20x4xf32, #tpu.memory_space<vmem>>, vector<16x16x4xf32>
    %107 = vector.shape_cast %106 : vector<16x16x4xf32> to vector<256x4xf32>
    %c6_116 = arith.constant 6 : index
    %c0_117 = arith.constant 0 : index
    %c0_118 = arith.constant 0 : index
    %108 = vector.load %arg4[%c6_116, %c0_117, %c0_118] : memref<9x4x4xf32, #tpu.memory_space<vmem>>, vector<1x4x4xf32>
    %109 = vector.shape_cast %108 : vector<1x4x4xf32> to vector<4x4xf32>
    %cst_119 = arith.constant dense<0.000000e+00> : vector<256x4xf32>
    %110 = tpu.matmul %107, %109, %cst_119 {dimension_numbers = #tpu.dot_dimension_numbers<[1], [0], [0], [1], [0, 0, 1, 1], [], []>} : vector<256x4xf32>, vector<4x4xf32>, vector<256x4xf32> -> vector<256x4xf32>
    %111 = arith.addf %105, %110 : vector<256x4xf32>
    %c4_120 = arith.constant 4 : index
    %c2_121 = arith.constant 2 : index
    %c0_122 = arith.constant 0 : index
    %112 = vector.load %arg7[%c4_120, %c2_121, %c0_122] : memref<20x20x4xf32, #tpu.memory_space<vmem>>, vector<16x16x4xf32>
    %113 = vector.shape_cast %112 : vector<16x16x4xf32> to vector<256x4xf32>
    %c7_123 = arith.constant 7 : index
    %c0_124 = arith.constant 0 : index
    %c0_125 = arith.constant 0 : index
    %114 = vector.load %arg4[%c7_123, %c0_124, %c0_125] : memref<9x4x4xf32, #tpu.memory_space<vmem>>, vector<1x4x4xf32>
    %115 = vector.shape_cast %114 : vector<1x4x4xf32> to vector<4x4xf32>
    %cst_126 = arith.constant dense<0.000000e+00> : vector<256x4xf32>
    %116 = tpu.matmul %113, %115, %cst_126 {dimension_numbers = #tpu.dot_dimension_numbers<[1], [0], [0], [1], [0, 0, 1, 1], [], []>} : vector<256x4xf32>, vector<4x4xf32>, vector<256x4xf32> -> vector<256x4xf32>
    %117 = arith.addf %111, %116 : vector<256x4xf32>
    %c4_127 = arith.constant 4 : index
    %c4_128 = arith.constant 4 : index
    %c0_129 = arith.constant 0 : index
    %118 = vector.load %arg7[%c4_127, %c4_128, %c0_129] : memref<20x20x4xf32, #tpu.memory_space<vmem>>, vector<16x16x4xf32>
    %119 = vector.shape_cast %118 : vector<16x16x4xf32> to vector<256x4xf32>
    %c8_130 = arith.constant 8 : index
    %c0_131 = arith.constant 0 : index
    %c0_132 = arith.constant 0 : index
    %120 = vector.load %arg4[%c8_130, %c0_131, %c0_132] : memref<9x4x4xf32, #tpu.memory_space<vmem>>, vector<1x4x4xf32>
    %121 = vector.shape_cast %120 : vector<1x4x4xf32> to vector<4x4xf32>
    %cst_133 = arith.constant dense<0.000000e+00> : vector<256x4xf32>
    %122 = tpu.matmul %119, %121, %cst_133 {dimension_numbers = #tpu.dot_dimension_numbers<[1], [0], [0], [1], [0, 0, 1, 1], [], []>} : vector<256x4xf32>, vector<4x4xf32>, vector<256x4xf32> -> vector<256x4xf32>
    %123 = arith.addf %117, %122 : vector<256x4xf32>
    %c0_134 = arith.constant 0 : index
    %c0_135 = arith.constant 0 : index
    %124 = vector.load %arg5[%c0_134, %c0_135] : memref<1x4xf32, #tpu.memory_space<vmem>>, vector<1x4xf32>
    %125 = vector.broadcast %124 : vector<1x4xf32> to vector<256x4xf32>
    %126 = arith.addf %123, %125 : vector<256x4xf32>
    %127 = tpu.transpose %126, [1, 0] : vector<256x4xf32> -> vector<4x256xf32>
    %c0_136 = arith.constant 0 : index
    %c0_137 = arith.constant 0 : index
    %c0_138 = arith.constant 0 : index
    %128 = vector.load %arg1[%c0_136, %c0_137, %c0_138] : memref<1x4x256xf32, #tpu.memory_space<vmem>>, vector<1x4x256xf32>
    %129 = vector.shape_cast %128 : vector<1x4x256xf32> to vector<4x256xf32>
    %130 = arith.addf %127, %129 : vector<4x256xf32>
    %c0_139 = arith.constant 0 : index
    %c0_140 = arith.constant 0 : index
    %c0_141 = arith.constant 0 : index
    %131 = vector.load %arg6[%c0_139, %c0_140, %c0_141] : memref<1x4x256xf32, #tpu.memory_space<vmem>>, vector<1x4x256xf32>
    %132 = vector.shape_cast %131 : vector<1x4x256xf32> to vector<4x256xf32>
    %133 = vector.shape_cast %130 : vector<4x256xf32> to vector<1x4x256xf32>
    tpu.vector_store %arg6[%c0_139, %c0_140, %c0_141], %133 {strides = array<i32>} : memref<1x4x256xf32, #tpu.memory_space<vmem>>, vector<1x4x256xf32>,
    return
  }
  func.func @transform_0(%arg0: i32) -> (i32, i32, i32) {
    %c0_i32 = arith.constant 0 : i32
    %c0_i32_0 = arith.constant 0 : i32
    %c0_i32_1 = arith.constant 0 : i32
    return %arg0, %c0_i32, %c0_i32_0 : i32, i32, i32
  }
  func.func @transform_1(%arg0: i32) -> (i32, i32, i32) {
    %c0_i32 = arith.constant 0 : i32
    %c0_i32_0 = arith.constant 0 : i32
    %c0_i32_1 = arith.constant 0 : i32
    %c0_i32_2 = arith.constant 0 : i32
    return %c0_i32, %c0_i32_0, %c0_i32_1 : i32, i32, i32
  }
  func.func @transform_2(%arg0: i32) -> (i32, i32) {
    %c0_i32 = arith.constant 0 : i32
    %c0_i32_0 = arith.constant 0 : i32
    %c0_i32_1 = arith.constant 0 : i32
    return %c0_i32, %c0_i32_0 : i32, i32
  }
  func.func @transform_3(%arg0: i32) -> (i32, i32, i32) {
    %c0_i32 = arith.constant 0 : i32
    %c0_i32_0 = arith.constant 0 : i32
    %c0_i32_1 = arith.constant 0 : i32
    %c0_i32_2 = arith.constant 0 : i32
    return %c0_i32, %c0_i32_0, %c0_i32_1 : i32, i32, i32
  }
  func.func @transform_4(%arg0: i32) -> (i32, i32) {
    %c0_i32 = arith.constant 0 : i32
    %c0_i32_0 = arith.constant 0 : i32
    %c0_i32_1 = arith.constant 0 : i32
    return %c0_i32, %c0_i32_0 : i32, i32
  }
  func.func @transform_5(%arg0: i32) -> (i32, i32, i32) {
    %c0_i32 = arith.constant 0 : i32
    %c0_i32_0 = arith.constant 0 : i32
    %c0_i32_1 = arith.constant 0 : i32
    return %arg0, %c0_i32, %c0_i32_0 : i32, i32, i32
  }
}

</mosaic_0001>

<bundles_post_ra>
// kernel: tpu_custom_call.1
= control target key start
LH: loop header
LB: loop body
LE: loop exit
PB: predicated region body
PF: predicated region fallthrough
CT: control target
= control target key end

     0   :  { %10 = vsyncpa [#allocation4], 0  ;;  %s12239_s0 = inlined_call_operand.vmem [shape: f32[2,4,256], index: 0, kind: input, shape index: {}]   ;;  %s12240_s1 = inlined_call_operand.vmem [shape: f32[9,4,4], index: 1, kind: input, shape index: {}]   ;;  %s12241_s2 = inlined_call_operand.vmem [shape: f32[1,4], index: 2, kind: input, shape index: {}]   ;;  %s12242_s3 = inlined_call_operand.vmem [shape: f32[9,4,4], index: 3, kind: input, shape index: {}]   ;;  %s12243_s4 = inlined_call_operand.vmem [shape: f32[1,4], index: 4, kind: input, shape index: {}]   ;;  %s12244_s5 = inlined_call_operand.hbm [shape: f32[2,4,256], index: 5, kind: output, shape index: {}]  }
   0x1   :  { %12 = vsyncpa [#allocation4 + $0x1], 0  ;;  %s10339_s18 = smov 0   ;;  %s10341_s19 = smov 0  }
   0x2   :  { %s10343_s20 = smov 0   ;;  %s10345_s21 = smov 0  }
   0x3 LB: > { %s10360_s22 = sadd.s32 4294967295, %s10305_s21   ;;  %s7569_s23 = sadd.s32 4294967294, %s10305_s21   ;;  %s10305_s21 = sphi %s10345_s21, %s12478_s21   ;;  %s10301_s20 = sphi %s10343_s20, %s12477_s20   ;;  %s10297_s19 = sphi %s10341_s19, %s12476_s19   ;;  %s10293_s18 = sphi %s10339_s18, %s12475_s18  }
   0x4   : > { %s10364_s24 = sadd.s32 1, %s10305_s21   ;;  %s135_s25 = sadd.s32 1, %s10301_s20 }
   0x5   : > { %s132_s26 = ssub.s32 %s10305_s21, %s10364_s24  ;;  %p145_p0 = scmp.ne.s32.totalorder %s10301_s20, %s10297_s19 }
   0x6   : > { %p133_p1 = scmp.eq.s32.totalorder %s132_s26, 0  ;;  %p146_p2 = scmp.eq.s32.totalorder %s10360_s22, 1 }
   0x7   : > { %p151_p3 = scmp.ne.s32.totalorder %s10297_s19, %s10293_s18  ;;  %p152_p4 = scmp.eq.s32.totalorder %s7569_s23, 1 }
   0x8   : > { %s10375_s27 = scalar_select %p133_p1, %s10301_s20, %s135_s25  }
   0x9   : > { %p10377_p5 = por %p146_p2, %p145_p0  ;;  %p10381_p6 = por %p152_p4, %p151_p3 }
   0xa   : > { %p7572_p7 = scmp.ge.s32.totalorder %s10305_s21, 1  ;;  %p190_p8 = scmp.lt.s32.totalorder %s10305_s21, 3 }
   0xc   : > { %p191_p9 = pnand %p7572_p7, %p190_p8 }
   0xe   : > { %194 = sbr.rel (%p191_p9) target bundleno = 1881 (0x759), region = 40 }
  0x15   : > { %p218_p10 = scmp.lt.s32.totalorder %s10360_s22, 1  ;;  %vm223_vm0 = vcmask 31744   ;;  %v10307_v0 = vmov 0.0   ;;  %vm226_vm1 = vcmask 27648   ;;  %v7576_v2 = vld [vmem:[%s12240_s1 + $0x4] sm:$0xf] }
  0x16   : > { %231 = vst.msk [vmem:[#allocation2 + $0x30] sm:$0xff] %vm223_vm0, %v10307_v0  ;;  %232 = vst.msk [vmem:[#allocation2 + $0x38] sm:$0xff] %vm223_vm0, %v10307_v0  ;;  %vm549_vm2 = vcmask 1043456   ;;  %v418_v7 = vld [vmem:[%s12240_s1] sm:$0xf]  ;;  %s215_s26 = sand.u32 1, %s10297_s19  }
  0x17   : > { %224 = vst.msk [vmem:[#allocation2] sm:$0xff] %vm223_vm0, %v10307_v0  ;;  %225 = vst.msk [vmem:[#allocation2 + $0x8] sm:$0xff] %vm223_vm0, %v10307_v0  ;;  %s219_s30 = scalar_select %p218_p10, %s10360_s22, 1  ;;  %8789 = vmatprep.subr.msk.mxu0 %vm549_vm2, %v7576_v2  ;;  %v10474_v9 = vld [vmem:[%s12240_s1 + $0x8] sm:$0xf] }
  0x18   : > { %228 = vst.msk [vmem:[#allocation2 + $0x18] sm:$0xff] %vm223_vm0, %v10307_v0  ;;  %229 = vst.msk [vmem:[#allocation2 + $0x20] sm:$0xff] %vm223_vm0, %v10307_v0  ;;  %8790 = vmatpush3.msk.msra.mxu0 %vm549_vm2, %v7576_v2 }
  0x19   : > { %234 = vst.msk [vmem:[#allocation2 + $0x48] sm:$0xff] %vm223_vm0, %v10307_v0  ;;  %235 = vst.msk [vmem:[#allocation2 + $0x50] sm:$0xff] %vm223_vm0, %v10307_v0  ;;  %s8193_s6 = sshll.u32 %s219_s30, 3  ;;  %8839 = vmatprep.subr.msk.mxu0 %vm549_vm2, %v418_v7  ;;  %s7573_s30 = sshll.u32 %s215_s26, 3 }
  0x1a   : > { %237 = vst.msk [vmem:[#allocation2 + $0x60] sm:$0xff] %vm223_vm0, %v10307_v0  ;;  %238 = vst.msk [vmem:[#allocation2 + $0x68] sm:$0xff] %vm223_vm0, %v10307_v0  ;;  %s10454_s9 = scalar_lea.vmem %s12239_s0, %s8193_s6  ;;  %s8194_s6 = sshll.u32 %s10360_s22, 7 }
  0x1b   : > { %240 = vst.msk [vmem:[#allocation2 + $0x78] sm:$0xff] %vm223_vm0, %v10307_v0  ;;  %241 = vst.msk [vmem:[#allocation2 + $0x80] sm:$0xff] %vm223_vm0, %v10307_v0  ;;  %v285_v1 = vld [vmem:[%s10454_s9] sm:$0xff]  ;;  %s217_s7 = scalar_lea.vmem [#allocation3], %s7573_s30  ;;  %s12197_s12 = scalar_lea.hbm %s12244_s5, %s8194_s6 }
  0x1c   : > { %243 = vst.msk [vmem:[#allocation2 + $0x90] sm:$0xff] %vm223_vm0, %v10307_v0  ;;  %244 = vst.msk [vmem:[#allocation2 + $0x98] sm:$0xff] %vm223_vm0, %v10307_v0  ;;  %289 = vxpose.xlu0.b32.start.end [1/1] (short) %v285_v1, 128  ;;  %v287_v8 = vcombine.high %v285_v1, %v285_v1  ;;  %s7510_s8 = sshll.u32 %s217_s7, 4  ;;  %s10308_s22 = smov [#allocation3]   ;;  %s12199_s8 = int_to_ptr.vmem [resolvable:$true] %s7510_s8 }
  0x1d   : > { %246 = vst.msk [vmem:[#allocation2 + $0xa8] sm:$0xff] %vm223_vm0, %v10307_v0  ;;  %247 = vst.msk [vmem:[#allocation2 + $0xb0] sm:$0xff] %vm223_vm0, %v10307_v0  ;;  %s10243_s13 = scalar_lea.vmem %s12199_s8, 128  ;;  %s10247_s14 = sshll.u32 %s10308_s22, 4  ;;  %s10248_s14 = int_to_ptr.vmem [resolvable:$false] %s10247_s14 }
  0x1e   : > { %249 = vst.msk [vmem:[#allocation2 + $0xc0] sm:$0xff] %vm223_vm0, %v10307_v0  ;;  %250 = vst.msk [vmem:[#allocation2 + $0xc8] sm:$0xff] %vm223_vm0, %v10307_v0  ;;  %v419_v3 = vld [vmem:[#allocation2 + $0x2] sm:$0xff]  ;;  %p10244_p11 = scmp.ne.s32.totalorder %s12199_s8, %s10243_s13  ;;  %s10249_s15 = scalar_lea.vmem %s10248_s14, 256 }
  0x1f   : > { %252 = vst.msk [vmem:[#allocation2 + $0xd8] sm:$0xff] %vm223_vm0, %v10307_v0  ;;  %253 = vst.msk [vmem:[#allocation2 + $0xe0] sm:$0xff] %vm223_vm0, %v10307_v0  ;;  %8791 = vmatprep.mubr.msk.f32.mxu0 %vm223_vm0, %v419_v3  ;;  %v421_v5 = vld [vmem:[#allocation2 + $0x1a] sm:$0xff]  ;;  %v387_v3 = vld [vmem:[#allocation2 + $0x8] sm:$0xff]  ;;  %p10250_p0 = scmp.lt.s32.totalorder %s12199_s8, %s10248_s14  ;;  %p10251_p1 = scmp.lt.s32.totalorder %s10249_s15, %s10243_s13 }
  0x20   : > { %255 = vst.msk [vmem:[#allocation2 + $0xf0] sm:$0xff] %vm223_vm0, %v10307_v0  ;;  %256 = vst.msk [vmem:[#allocation2 + $0xf8] sm:$0xff] %vm223_vm0, %v10307_v0  ;;  %v386_v1 = vld [vmem:[#allocation2] sm:$0xff]  ;;  %p10245_p12 = pnand %p10244_p11, %p10377_p5 }
  0x21   : > { %258 = vst.msk [vmem:[#allocation2 + $0x108] sm:$0xff] %vm223_vm0, %v10307_v0  ;;  %259 = vst.msk [vmem:[#allocation2 + $0x110] sm:$0xff] %vm223_vm0, %v10307_v0  ;;  %p10252_p2 = por %p10251_p1, %p10250_p0 }
  0x22   : > { %261 = vst.msk [vmem:[#allocation2 + $0x120] sm:$0xff] %vm223_vm0, %v10307_v0  ;;  %262 = vst.msk [vmem:[#allocation2 + $0x128] sm:$0xff] %vm223_vm0, %v10307_v0  ;;  %p10246_p13 = pneg %p10245_p12 }
  0x23   : > { %264 = vst.msk [vmem:[#allocation2 + $0x138] sm:$0xff] %vm223_vm0, %v10307_v0  ;;  %265 = vst.msk [vmem:[#allocation2 + $0x140] sm:$0xff] %vm223_vm0, %v10307_v0 }
  0x24   : > { %267 = vst.msk [vmem:[#allocation2 + $0x150] sm:$0xff] %vm223_vm0, %v10307_v0  ;;  %268 = vst.msk [vmem:[#allocation2 + $0x158] sm:$0xff] %vm223_vm0, %v10307_v0  ;;  %p10253_p3 = pnand %p10252_p2, %p10246_p13 }
  0x25   : > { %270 = vst.msk [vmem:[#allocation2 + $0x168] sm:$0xff] %vm223_vm0, %v10307_v0  ;;  %271 = vst.msk [vmem:[#allocation2 + $0x170] sm:$0xff] %vm223_vm0, %v10307_v0 }
  0x26   : > { %273 = vst.msk [vmem:[#allocation2 + $0x180] sm:$0xff] %vm223_vm0, %v10307_v0  ;;  %274 = vst.msk [vmem:[#allocation2 + $0x188] sm:$0xff] %vm223_vm0, %v10307_v0 }
  0x27   : > { %276 = vst.msk [vmem:[#allocation2 + $0x198] sm:$0xff] %vm223_vm0, %v10307_v0  ;;  %277 = vst.msk [vmem:[#allocation2 + $0x1a0] sm:$0xff] %vm223_vm0, %v10307_v0 }
  0x28   : > { %279 = vst.msk [vmem:[#allocation2 + $0x1b0] sm:$0xff] %vm223_vm0, %v10307_v0  ;;  %280 = vst.msk [vmem:[#allocation2 + $0x1b8] sm:$0xff] %vm223_vm0, %v10307_v0 }
  0x29   : > { %282 = vst.msk [vmem:[#allocation2 + $0x1c8] sm:$0xff] %vm223_vm0, %v10307_v0  ;;  %283 = vst.msk [vmem:[#allocation2 + $0x1d0] sm:$0xff] %vm223_vm0, %v10307_v0 }
  0x2a   : > { %227 = vst.msk [vmem:[#allocation2 + $0x10] sm:$0xf] %vm226_vm1, %v10307_v0  ;;  %230 = vst.msk [vmem:[#allocation2 + $0x28] sm:$0xf] %vm226_vm1, %v10307_v0 }
  0x2b   : > { %233 = vst.msk [vmem:[#allocation2 + $0x40] sm:$0xf] %vm226_vm1, %v10307_v0  ;;  %236 = vst.msk [vmem:[#allocation2 + $0x58] sm:$0xf] %vm226_vm1, %v10307_v0 }
  0x2c   : > { %239 = vst.msk [vmem:[#allocation2 + $0x70] sm:$0xf] %vm226_vm1, %v10307_v0  ;;  %242 = vst.msk [vmem:[#allocation2 + $0x88] sm:$0xf] %vm226_vm1, %v10307_v0 }
  0x2d   : > { %245 = vst.msk [vmem:[#allocation2 + $0xa0] sm:$0xf] %vm226_vm1, %v10307_v0  ;;  %248 = vst.msk [vmem:[#allocation2 + $0xb8] sm:$0xf] %vm226_vm1, %v10307_v0 }
  0x2e   : > { %251 = vst.msk [vmem:[#allocation2 + $0xd0] sm:$0xf] %vm226_vm1, %v10307_v0  ;;  %254 = vst.msk [vmem:[#allocation2 + $0xe8] sm:$0xf] %vm226_vm1, %v10307_v0 }
  0x2f   : > { %257 = vst.msk [vmem:[#allocation2 + $0x100] sm:$0xf] %vm226_vm1, %v10307_v0  ;;  %260 = vst.msk [vmem:[#allocation2 + $0x118] sm:$0xf] %vm226_vm1, %v10307_v0 }
  0x30   : > { %263 = vst.msk [vmem:[#allocation2 + $0x130] sm:$0xf] %vm226_vm1, %v10307_v0  ;;  %266 = vst.msk [vmem:[#allocation2 + $0x148] sm:$0xf] %vm226_vm1, %v10307_v0 }
  0x31   : > { %269 = vst.msk [vmem:[#allocation2 + $0x160] sm:$0xf] %vm226_vm1, %v10307_v0  ;;  %272 = vst.msk [vmem:[#allocation2 + $0x178] sm:$0xf] %vm226_vm1, %v10307_v0  ;;  %v420_v4 = vld [vmem:[#allocation2 + $0xa] sm:$0xff]  ;;  %v422_v6 = vld [vmem:[#allocation2 + $0x22] sm:$0xff] }
  0x32   : > { %275 = vst.msk [vmem:[#allocation2 + $0x190] sm:$0xf] %vm226_vm1, %v10307_v0  ;;  %278 = vst.msk [vmem:[#allocation2 + $0x1a8] sm:$0xf] %vm226_vm1, %v10307_v0  ;;  %8792 = vmatmul.mubr.msk.f32.vlgmr.msra.gmra.mrb[0].mxu0 %vm223_vm0, %v420_v4  ;;  %v388_v4 = vld [vmem:[#allocation2 + $0x18] sm:$0xff] }
  0x33   : > { %281 = vst.msk [vmem:[#allocation2 + $0x1c0] sm:$0xf] %vm226_vm1, %v10307_v0  ;;  %284 = vst.msk [vmem:[#allocation2 + $0x1d8] sm:$0xf] %vm226_vm1, %v10307_v0  ;;  %8794 = vmatprep.mubr.msk.f32.mxu0 %vm223_vm0, %v421_v5  ;;  %8840 = vmatpush3.msk.msra.mxu0 %vm549_vm2, %v418_v7  ;;  %v10622_v5 = vld [vmem:[%s12240_s1 + $0xc] sm:$0xf] }
  0x34   : > { %8889 = vmatprep.subr.msk.mxu0 %vm549_vm2, %v10474_v9 }
  0x36   : > { %8795 = vmatmul.mubr.msk.f32.gmra.mrb[2].mxu0 %vm223_vm0, %v422_v6  ;;  %v389_v6 = vld [vmem:[#allocation2 + $0x20] sm:$0xff] }
  0x59   : > { %321 = vxpose.xlu0.b32.start.end [1/1] (short) %v287_v8, 128 }
  0x9c   : > { %v305_v10 = vpop.trf.xlu0 }
  0x9d   : > { %354 = vst.msk [vmem:[#allocation2 + $0x32] sm:$0xff] %vm223_vm0, %v305_v10 }
  0xa0   : > { %v306_v11 = vpop.trf.xlu0 }
  0xa1   : > { %355 = vst.msk [vmem:[#allocation2 + $0x3a] sm:$0xff] %vm223_vm0, %v306_v11 }
  0xa4   : > { %v307_v12 = vpop.trf.xlu0  ;;  %v10480_v13 = vld [vmem:[#allocation2 + $0x32] sm:$0xff] }
  0xa5   : > { %356 = vst.msk [vmem:[#allocation2 + $0x4a] sm:$0xff] %vm223_vm0, %v307_v12  ;;  %8797 = vmatprep.mubr.msk.f32.mxu0 %vm223_vm0, %v10480_v13  ;;  %v10631_v7 = vld [vmem:[#allocation2 + $0x30] sm:$0xff] }
  0xa8   : > { %v308_v14 = vpop.trf.xlu0  ;;  %v10485_v15 = vld [vmem:[#allocation2 + $0x3a] sm:$0xff] }
  0xa9   : > { %357 = vst.msk [vmem:[#allocation2 + $0x52] sm:$0xff] %vm223_vm0, %v308_v14  ;;  %8798 = vmatmul.mubr.msk.f32.gmra.mrb[4].mxu0 %vm223_vm0, %v10485_v15  ;;  %v10635_v8 = vld [vmem:[#allocation2 + $0x38] sm:$0xff] }
  0xac   : > { %v309_v16 = vpop.trf.xlu0  ;;  %v10490_v17 = vld [vmem:[#allocation2 + $0x4a] sm:$0xff] }
  0xad   : > { %358 = vst.msk [vmem:[#allocation2 + $0x62] sm:$0xff] %vm223_vm0, %v309_v16  ;;  %8800 = vmatprep.mubr.msk.f32.mxu0 %vm223_vm0, %v10490_v17  ;;  %v10639_v10 = vld [vmem:[#allocation2 + $0x48] sm:$0xff] }
  0xb0   : > { %v310_v18 = vpop.trf.xlu0  ;;  %v10495_v19 = vld [vmem:[#allocation2 + $0x52] sm:$0xff] }
  0xb1   : > { %359 = vst.msk [vmem:[#allocation2 + $0x6a] sm:$0xff] %vm223_vm0, %v310_v18  ;;  %8801 = vmatmul.mubr.msk.f32.gmra.mrb[6].mxu0 %vm223_vm0, %v10495_v19 }
  0xb4   : > { %v311_v20 = vpop.trf.xlu0  ;;  %v10500_v21 = vld [vmem:[#allocation2 + $0x62] sm:$0xff] }
  0xb5   : > { %360 = vst.msk [vmem:[#allocation2 + $0x7a] sm:$0xff] %vm223_vm0, %v311_v20  ;;  %8803 = vmatprep.mubr.msk.f32.mxu0 %vm223_vm0, %v10500_v21  ;;  %v10647_v11 = vld [vmem:[#allocation2 + $0x60] sm:$0xff] }
  0xb8   : > { %v312_v22 = vpop.trf.xlu0  ;;  %v10505_v23 = vld [vmem:[#allocation2 + $0x6a] sm:$0xff] }
  0xb9   : > { %361 = vst.msk [vmem:[#allocation2 + $0x82] sm:$0xff] %vm223_vm0, %v312_v22  ;;  %8804 = vmatmul.mubr.msk.f32.gmra.mrb[8].mxu0 %vm223_vm0, %v10505_v23  ;;  %v10651_v12 = vld [vmem:[#allocation2 + $0x68] sm:$0xff] }
  0xbc   : > { %v313_v24 = vpop.trf.xlu0  ;;  %v10510_v25 = vld [vmem:[#allocation2 + $0x7a] sm:$0xff] }
  0xbd   : > { %362 = vst.msk [vmem:[#allocation2 + $0x92] sm:$0xff] %vm223_vm0, %v313_v24  ;;  %8806 = vmatprep.mubr.msk.f32.mxu0 %vm223_vm0, %v10510_v25  ;;  %v10655_v14 = vld [vmem:[#allocation2 + $0x78] sm:$0xff] }
  0xc0   : > { %v314_v26 = vpop.trf.xlu0  ;;  %v10515_v27 = vld [vmem:[#allocation2 + $0x82] sm:$0xff] }
  0xc1   : > { %363 = vst.msk [vmem:[#allocation2 + $0x9a] sm:$0xff] %vm223_vm0, %v314_v26  ;;  %8807 = vmatmul.mubr.msk.f32.gmra.mrb[10].mxu0 %vm223_vm0, %v10515_v27  ;;  %v10659_v16 = vld [vmem:[#allocation2 + $0x80] sm:$0xff] }
  0xc4   : > { %v315_v28 = vpop.trf.xlu0  ;;  %v10520_v29 = vld [vmem:[#allocation2 + $0x92] sm:$0xff] }
  0xc5   : > { %364 = vst.msk [vmem:[#allocation2 + $0xaa] sm:$0xff] %vm223_vm0, %v315_v28  ;;  %8809 = vmatprep.mubr.msk.f32.mxu0 %vm223_vm0, %v10520_v29  ;;  %v10663_v18 = vld [vmem:[#allocation2 + $0x90] sm:$0xff] }
  0xc8   : > { %v316_v30 = vpop.trf.xlu0  ;;  %v10525_v31 = vld [vmem:[#allocation2 + $0x9a] sm:$0xff] }
  0xc9   : > { %365 = vst.msk [vmem:[#allocation2 + $0xb2] sm:$0xff] %vm223_vm0, %v316_v30  ;;  %8810 = vmatmul.mubr.msk.f32.gmra.mrb[12].mxu0 %vm223_vm0, %v10525_v31  ;;  %v10667_v20 = vld [vmem:[#allocation2 + $0x98] sm:$0xff] }
  0xcc   : > { %v317_v32 = vpop.trf.xlu0  ;;  %v10530_v33 = vld [vmem:[#allocation2 + $0xaa] sm:$0xff] }
  0xcd   : > { %366 = vst.msk [vmem:[#allocation2 + $0xc2] sm:$0xff] %vm223_vm0, %v317_v32  ;;  %8812 = vmatprep.mubr.msk.f32.mxu0 %vm223_vm0, %v10530_v33  ;;  %v10671_v22 = vld [vmem:[#allocation2 + $0xa8] sm:$0xff] }
  0xd0   : > { %v318_v34 = vpop.trf.xlu0  ;;  %v10535_v35 = vld [vmem:[#allocation2 + $0xb2] sm:$0xff] }
  0xd1   : > { %367 = vst.msk [vmem:[#allocation2 + $0xca] sm:$0xff] %vm223_vm0, %v318_v34  ;;  %8813 = vmatmul.mubr.msk.f32.gmra.mrb[14].mxu0 %vm223_vm0, %v10535_v35  ;;  %v10675_v24 = vld [vmem:[#allocation2 + $0xb0] sm:$0xff] }
  0xd4   : > { %v319_v36 = vpop.trf.xlu0  ;;  %v10540_v37 = vld [vmem:[#allocation2 + $0xc2] sm:$0xff] }
  0xd5   : > { %368 = vst.msk [vmem:[#allocation2 + $0xda] sm:$0xff] %vm223_vm0, %v319_v36  ;;  %8815 = vmatprep.mubr.msk.f32.mxu0 %vm223_vm0, %v10540_v37  ;;  %v10679_v26 = vld [vmem:[#allocation2 + $0xc0] sm:$0xff] }
  0xd8   : > { %v320_v38 = vpop.trf.xlu0  ;;  %v10545_v39 = vld [vmem:[#allocation2 + $0xca] sm:$0xff] }
  0xd9   : > { %369 = vst.msk [vmem:[#allocation2 + $0xe2] sm:$0xff] %vm223_vm0, %v320_v38  ;;  %8816 = vmatmul.mubr.msk.f32.gmra.mrb[16].mxu0 %vm223_vm0, %v10545_v39  ;;  %v10683_v28 = vld [vmem:[#allocation2 + $0xc8] sm:$0xff] }
  0xdc   : > { %v337_v40 = vpop.trf.xlu0  ;;  %v10550_v41 = vld [vmem:[#allocation2 + $0xda] sm:$0xff] }
  0xdd   : > { %370 = vst.msk [vmem:[#allocation2 + $0xf2] sm:$0xff] %vm223_vm0, %v337_v40  ;;  %8818 = vmatprep.mubr.msk.f32.mxu0 %vm223_vm0, %v10550_v41  ;;  %v10687_v30 = vld [vmem:[#allocation2 + $0xd8] sm:$0xff] }
  0xe0   : > { %v338_v42 = vpop.trf.xlu0  ;;  %v10555_v43 = vld [vmem:[#allocation2 + $0xe2] sm:$0xff] }
  0xe1   : > { %371 = vst.msk [vmem:[#allocation2 + $0xfa] sm:$0xff] %vm223_vm0, %v338_v42  ;;  %8819 = vmatmul.mubr.msk.f32.gmra.mrb[18].mxu0 %vm223_vm0, %v10555_v43  ;;  %v10692_v34 = vld [vmem:[#allocation2 + $0xe0] sm:$0xff] }
  0xe4   : > { %v339_v44 = vpop.trf.xlu0  ;;  %v10560_v45 = vld [vmem:[#allocation2 + $0xf2] sm:$0xff] }
  0xe5   : > { %372 = vst.msk [vmem:[#allocation2 + $0x10a] sm:$0xff] %vm223_vm0, %v339_v44  ;;  %8821 = vmatprep.mubr.msk.f32.mxu0 %vm223_vm0, %v10560_v45  ;;  %v10696_v36 = vld [vmem:[#allocation2 + $0xf0] sm:$0xff] }
  0xe8   : > { %v340_v46 = vpop.trf.xlu0  ;;  %v10565_v47 = vld [vmem:[#allocation2 + $0xfa] sm:$0xff] }
  0xe9   : > { %373 = vst.msk [vmem:[#allocation2 + $0x112] sm:$0xff] %vm223_vm0, %v340_v46  ;;  %8822 = vmatmul.mubr.msk.f32.gmra.mrb[20].mxu0 %vm223_vm0, %v10565_v47  ;;  %v10701_v40 = vld [vmem:[#allocation2 + $0xf8] sm:$0xff] }
  0xec   : > { %v341_v48 = vpop.trf.xlu0  ;;  %v10570_v49 = vld [vmem:[#allocation2 + $0x10a] sm:$0xff] }
  0xed   : > { %374 = vst.msk [vmem:[#allocation2 + $0x122] sm:$0xff] %vm223_vm0, %v341_v48  ;;  %8824 = vmatprep.mubr.msk.f32.mxu0 %vm223_vm0, %v10570_v49  ;;  %v10705_v42 = vld [vmem:[#allocation2 + $0x108] sm:$0xff] }
  0xf0   : > { %v342_v50 = vpop.trf.xlu0  ;;  %v10575_v51 = vld [vmem:[#allocation2 + $0x112] sm:$0xff] }
  0xf1   : > { %375 = vst.msk [vmem:[#allocation2 + $0x12a] sm:$0xff] %vm223_vm0, %v342_v50  ;;  %8825 = vmatmul.mubr.msk.f32.gmra.mrb[22].mxu0 %vm223_vm0, %v10575_v51  ;;  %v10710_v46 = vld [vmem:[#allocation2 + $0x110] sm:$0xff] }
  0xf4   : > { %v343_v52 = vpop.trf.xlu0  ;;  %v10580_v53 = vld [vmem:[#allocation2 + $0x122] sm:$0xff] }
  0xf5   : > { %376 = vst.msk [vmem:[#allocation2 + $0x13a] sm:$0xff] %vm223_vm0, %v343_v52  ;;  %8827 = vmatprep.mubr.msk.f32.mxu0 %vm223_vm0, %v10580_v53  ;;  %v10714_v48 = vld [vmem:[#allocation2 + $0x120] sm:$0xff] }
  0xf8   : > { %v344_v54 = vpop.trf.xlu0  ;;  %v10585_v55 = vld [vmem:[#allocation2 + $0x12a] sm:$0xff] }
  0xf9   : > { %377 = vst.msk [vmem:[#allocation2 + $0x142] sm:$0xff] %vm223_vm0, %v344_v54  ;;  %8828 = vmatmul.mubr.msk.f32.gmra.mrb[24].mxu0 %vm223_vm0, %v10585_v55  ;;  %v10719_v52 = vld [vmem:[#allocation2 + $0x128] sm:$0xff] }
  0xfc   : > { %v345_v56 = vpop.trf.xlu0  ;;  %v10590_v57 = vld [vmem:[#allocation2 + $0x13a] sm:$0xff] }
  0xfd   : > { %378 = vst.msk [vmem:[#allocation2 + $0x152] sm:$0xff] %vm223_vm0, %v345_v56  ;;  %8830 = vmatprep.mubr.msk.f32.mxu0 %vm223_vm0, %v10590_v57  ;;  %v10723_v54 = vld [vmem:[#allocation2 + $0x138] sm:$0xff] }
 0x100   : > { %v346_v58 = vpop.trf.xlu0  ;;  %v10595_v59 = vld [vmem:[#allocation2 + $0x142] sm:$0xff] }
 0x101   : > { %379 = vst.msk [vmem:[#allocation2 + $0x15a] sm:$0xff] %vm223_vm0, %v346_v58  ;;  %8831 = vmatmul.mubr.msk.f32.gmra.mrb[26].mxu0 %vm223_vm0, %v10595_v59  ;;  %v10727_v56 = vld [vmem:[#allocation2 + $0x140] sm:$0xff] }
 0x104   : > { %v347_v60 = vpop.trf.xlu0  ;;  %v10600_v61 = vld [vmem:[#allocation2 + $0x152] sm:$0xff] }
 0x105   : > { %380 = vst.msk [vmem:[#allocation2 + $0x16a] sm:$0xff] %vm223_vm0, %v347_v60  ;;  %8833 = vmatprep.mubr.msk.f32.mxu0 %vm223_vm0, %v10600_v61  ;;  %v10731_v58 = vld [vmem:[#allocation2 + $0x150] sm:$0xff] }
 0x108   : > { %v348_v62 = vpop.trf.xlu0  ;;  %v10605_v63 = vld [vmem:[#allocation2 + $0x15a] sm:$0xff] }
 0x109   : > { %381 = vst.msk [vmem:[#allocation2 + $0x172] sm:$0xff] %vm223_vm0, %v348_v62  ;;  %8834 = vmatmul.mubr.msk.f32.gmra.mrb[28].mxu0 %vm223_vm0, %v10605_v63  ;;  %v10735_v60 = vld [vmem:[#allocation2 + $0x158] sm:$0xff] }
 0x10c   : > { %v10610_v0 = vld [vmem:[#allocation2 + $0x16a] sm:$0xff]  ;;  %v349_v32 = vpop.trf.xlu0 }
 0x10d   : > { %8836 = vmatprep.mubr.msk.f32.mxu0 %vm223_vm0, %v10610_v0  ;;  %382 = vst.msk [vmem:[#allocation2 + $0x182] sm:$0xff] %vm223_vm0, %v349_v32  ;;  %v10739_v62 = vld [vmem:[#allocation2 + $0x168] sm:$0xff]  ;;  %v10751_v32 = vld [vmem:[%s12240_s1 + $0x10] sm:$0xf] }
 0x110   : > { %v10614_v2 = vld [vmem:[#allocation2 + $0x172] sm:$0xff]  ;;  %v350_v38 = vpop.trf.xlu0 }
 0x111   : > { %12340 = vst [vmem:[#allocation6_spill] sm:$0xff] %v10614_v2  ;;  %8837 = vmatmul.mubr.msk.f32.gmra.mrb[30].mxu0 %vm223_vm0, %v10614_v2  ;;  %383 = vst.msk [vmem:[#allocation2 + $0x18a] sm:$0xff] %vm223_vm0, %v350_v38  ;;  %v1105_v38 = vld [vmem:[#allocation2 + $0x24] sm:$0xff] }
 0x112   : > { %8841 = vmatprep.mubr.msk.f32.mxu0 %vm223_vm0, %v386_v1  ;;  %v1102_v1 = vld [vmem:[#allocation2 + $0x4] sm:$0xff] }
 0x114   : > { %v351_v44 = vpop.trf.xlu0 }
 0x115   : > { %8842 = vmatmul.mubr.msk.f32.vlgmr.msra.gmra.mrb[0].mxu0 %vm223_vm0, %v387_v3  ;;  %384 = vst.msk [vmem:[#allocation2 + $0x19a] sm:$0xff] %vm223_vm0, %v351_v44  ;;  %v10743_v3 = vld [vmem:[#allocation2 + $0x170] sm:$0xff] }
 0x116   : > { %8890 = vmatpush3.msk.msra.mxu0 %vm549_vm2, %v10474_v9  ;;  %8844 = vmatprep.mubr.msk.f32.mxu0 %vm223_vm0, %v388_v4  ;;  %v10643_v9 = vld [vmem:[#allocation2 + $0x50] sm:$0xff] }
 0x117   : > { %8939 = vmatprep.subr.msk.mxu0 %vm549_vm2, %v10622_v5  ;;  %v1103_v4 = vld [vmem:[#allocation2 + $0xc] sm:$0xff]  ;;  %v10760_v44 = vld [vmem:[#allocation2 + $0x34] sm:$0xff] }
 0x118   : > { %v352_v50 = vpop.trf.xlu0 }
 0x119   : > { %8845 = vmatmul.mubr.msk.f32.gmra.mrb[2].mxu0 %vm223_vm0, %v389_v6  ;;  %385 = vst.msk [vmem:[#allocation2 + $0x1a2] sm:$0xff] %vm223_vm0, %v352_v50  ;;  %v1104_v6 = vld [vmem:[#allocation2 + $0x1c] sm:$0xff] }
 0x11a   : > { %8847 = vmatprep.mubr.msk.f32.mxu0 %vm223_vm0, %v10631_v7  ;;  %v10764_v50 = vld [vmem:[#allocation2 + $0x3c] sm:$0xff] }
 0x11d   : > { %8848 = vmatmul.mubr.msk.f32.gmra.mrb[4].mxu0 %vm223_vm0, %v10635_v8 }
 0x11e   : > { %8850 = vmatprep.mubr.msk.f32.mxu0 %vm223_vm0, %v10639_v10 }
 0x121   : > { %8851 = vmatmul.mubr.msk.f32.gmra.mrb[6].mxu0 %vm223_vm0, %v10643_v9 }
 0x122   : > { %8853 = vmatprep.mubr.msk.f32.mxu0 %vm223_vm0, %v10647_v11 }
 0x125   : > { %8854 = vmatmul.mubr.msk.f32.gmra.mrb[8].mxu0 %vm223_vm0, %v10651_v12 }
 0x126   : > { %8856 = vmatprep.mubr.msk.f32.mxu0 %vm223_vm0, %v10655_v14 }
 0x129   : > { %8857 = vmatmul.mubr.msk.f32.gmra.mrb[10].mxu0 %vm223_vm0, %v10659_v16 }
 0x12a   : > { %8859 = vmatprep.mubr.msk.f32.mxu0 %vm223_vm0, %v10663_v18 }
 0x12d   : > { %8860 = vmatmul.mubr.msk.f32.gmra.mrb[12].mxu0 %vm223_vm0, %v10667_v20 }
 0x12e   : > { %8862 = vmatprep.mubr.msk.f32.mxu0 %vm223_vm0, %v10671_v22 }
 0x131   : > { %8863 = vmatmul.mubr.msk.f32.gmra.mrb[14].mxu0 %vm223_vm0, %v10675_v24 }
 0x132   : > { %8865 = vmatprep.mubr.msk.f32.mxu0 %vm223_vm0, %v10679_v26 }
 0x135   : > { %8866 = vmatmul.mubr.msk.f32.gmra.mrb[16].mxu0 %vm223_vm0, %v10683_v28 }
 0x136   : > { %8868 = vmatprep.mubr.msk.f32.mxu0 %vm223_vm0, %v10687_v30 }
 0x139   : > { %8869 = vmatmul.mubr.msk.f32.gmra.mrb[18].mxu0 %vm223_vm0, %v10692_v34 }
 0x13a   : > { %8871 = vmatprep.mubr.msk.f32.mxu0 %vm223_vm0, %v10696_v36 }
 0x13d   : > { %8872 = vmatmul.mubr.msk.f32.gmra.mrb[20].mxu0 %vm223_vm0, %v10701_v40 }
 0x13e   : > { %8874 = vmatprep.mubr.msk.f32.mxu0 %vm223_vm0, %v10705_v42 }
 0x141   : > { %8875 = vmatmul.mubr.msk.f32.gmra.mrb[22].mxu0 %vm223_vm0, %v10710_v46 }
 0x142   : > { %8877 = vmatprep.mubr.msk.f32.mxu0 %vm223_vm0, %v10714_v48 }
 0x145   : > { %8878 = vmatmul.mubr.msk.f32.gmra.mrb[24].mxu0 %vm223_vm0, %v10719_v52 }
 0x146   : > { %8880 = vmatprep.mubr.msk.f32.mxu0 %vm223_vm0, %v10723_v54 }
 0x149   : > { %8881 = vmatmul.mubr.msk.f32.gmra.mrb[26].mxu0 %vm223_vm0, %v10727_v56 }
 0x14a   : > { %8883 = vmatprep.mubr.msk.f32.mxu0 %vm223_vm0, %v10731_v58 }
 0x14d   : > { %8884 = vmatmul.mubr.msk.f32.gmra.mrb[28].mxu0 %vm223_vm0, %v10735_v60 }
 0x14e   : > { %8886 = vmatprep.mubr.msk.f32.mxu0 %vm223_vm0, %v10739_v62 }
 0x151   : > { %8887 = vmatmul.mubr.msk.f32.gmra.mrb[30].mxu0 %vm223_vm0, %v10743_v3 }
 0x152   : > { %8891 = vmatprep.mubr.msk.f32.mxu0 %vm223_vm0, %v1102_v1  ;;  %v10768_v1 = vld [vmem:[#allocation2 + $0x4c] sm:$0xff] }
 0x153   : > { %12341 = vst [vmem:[#allocation7_spill] sm:$0xff] %v10768_v1 }
 0x155   : > { %8892 = vmatmul.mubr.msk.f32.vlgmr.msra.gmra.mrb[0].mxu0 %vm223_vm0, %v1103_v4  ;;  %v10776_v4 = vld [vmem:[#allocation2 + $0x64] sm:$0xff] }
 0x156   : > { %8940 = vmatpush3.msk.msra.mxu0 %vm549_vm2, %v10622_v5  ;;  %8894 = vmatprep.mubr.msk.f32.mxu0 %vm223_vm0, %v1104_v6  ;;  %v10772_v5 = vld [vmem:[#allocation2 + $0x54] sm:$0xff]  ;;  %12343 = vst [vmem:[#allocation9_spill] sm:$0xff] %v10776_v4  ;;  %v10780_v6 = vld [vmem:[#allocation2 + $0x6c] sm:$0xff] }
 0x157   : > { %8989 = vmatprep.subr.msk.mxu0 %vm549_vm2, %v10751_v32  ;;  %12342 = vst [vmem:[#allocation8_spill] sm:$0xff] %v10772_v5  ;;  %12344 = vst [vmem:[#allocation10_spill] sm:$0xff] %v10780_v6 }
 0x159   : > { %8895 = vmatmul.mubr.msk.f32.gmra.mrb[2].mxu0 %vm223_vm0, %v1105_v38  ;;  %v10784_v38 = vld [vmem:[#allocation2 + $0x7c] sm:$0xff] }
 0x15a   : > { %8897 = vmatprep.mubr.msk.f32.mxu0 %vm223_vm0, %v10760_v44  ;;  %12345 = vst [vmem:[#allocation11_spill] sm:$0xff] %v10784_v38 }
 0x15d   : > { %8898 = vmatmul.mubr.msk.f32.gmra.mrb[4].mxu0 %vm223_vm0, %v10764_v50 }
 0x15e   : > { %8900 = vmatprep.mubr.msk.f32.mxu0 %vm223_vm0, %v10768_v1  ;;  %v10788_v1 = vld [vmem:[#allocation2 + $0x84] sm:$0xff] }
 0x15f   : > { %12346 = vst [vmem:[#allocation12_spill] sm:$0xff] %v10788_v1 }
 0x161   : > { %8901 = vmatmul.mubr.msk.f32.gmra.mrb[6].mxu0 %vm223_vm0, %v10772_v5  ;;  %v10792_v5 = vld [vmem:[#allocation2 + $0x94] sm:$0xff] }
 0x162   : > { %8903 = vmatprep.mubr.msk.f32.mxu0 %vm223_vm0, %v10776_v4  ;;  %12347 = vst [vmem:[#allocation13_spill] sm:$0xff] %v10792_v5  ;;  %v10796_v4 = vld [vmem:[#allocation2 + $0x9c] sm:$0xff] }
 0x163   : > { %12348 = vst [vmem:[#allocation14_spill] sm:$0xff] %v10796_v4 }
 0x165   : > { %8904 = vmatmul.mubr.msk.f32.gmra.mrb[8].mxu0 %vm223_vm0, %v10780_v6  ;;  %v10800_v6 = vld [vmem:[#allocation2 + $0xac] sm:$0xff] }
 0x166   : > { %8906 = vmatprep.mubr.msk.f32.mxu0 %vm223_vm0, %v10784_v38  ;;  %12349 = vst [vmem:[#allocation15_spill] sm:$0xff] %v10800_v6  ;;  %v10804_v38 = vld [vmem:[#allocation2 + $0xb4] sm:$0xff] }
 0x167   : > { %12350 = vst [vmem:[#allocation16_spill] sm:$0xff] %v10804_v38 }
 0x169   : > { %8907 = vmatmul.mubr.msk.f32.gmra.mrb[10].mxu0 %vm223_vm0, %v10788_v1  ;;  %v10808_v1 = vld [vmem:[#allocation2 + $0xc4] sm:$0xff] }
 0x16a   : > { %8909 = vmatprep.mubr.msk.f32.mxu0 %vm223_vm0, %v10792_v5  ;;  %12351 = vst [vmem:[#allocation17_spill] sm:$0xff] %v10808_v1  ;;  %v10812_v5 = vld [vmem:[#allocation2 + $0xcc] sm:$0xff] }
 0x16b   : > { %12352 = vst [vmem:[#allocation18_spill] sm:$0xff] %v10812_v5 }
 0x16d   : > { %8910 = vmatmul.mubr.msk.f32.gmra.mrb[12].mxu0 %vm223_vm0, %v10796_v4  ;;  %v10816_v4 = vld [vmem:[#allocation2 + $0xdc] sm:$0xff] }
 0x16e   : > { %8912 = vmatprep.mubr.msk.f32.mxu0 %vm223_vm0, %v10800_v6  ;;  %12353 = vst [vmem:[#allocation19_spill] sm:$0xff] %v10816_v4  ;;  %v10820_v6 = vld [vmem:[#allocation2 + $0xe4] sm:$0xff] }
 0x16f   : > { %12354 = vst [vmem:[#allocation20_spill] sm:$0xff] %v10820_v6 }
 0x171   : > { %8913 = vmatmul.mubr.msk.f32.gmra.mrb[14].mxu0 %vm223_vm0, %v10804_v38  ;;  %v10824_v38 = vld [vmem:[#allocation2 + $0xf4] sm:$0xff] }
 0x172   : > { %8915 = vmatprep.mubr.msk.f32.mxu0 %vm223_vm0, %v10808_v1  ;;  %12355 = vst [vmem:[#allocation21_spill] sm:$0xff] %v10824_v38  ;;  %v10828_v1 = vld [vmem:[#allocation2 + $0xfc] sm:$0xff] }
 0x173   : > { %12356 = vst [vmem:[#allocation22_spill] sm:$0xff] %v10828_v1 }
 0x175   : > { %8916 = vmatmul.mubr.msk.f32.gmra.mrb[16].mxu0 %vm223_vm0, %v10812_v5  ;;  %v10832_v5 = vld [vmem:[#allocation2 + $0x10c] sm:$0xff] }
 0x176   : > { %8918 = vmatprep.mubr.msk.f32.mxu0 %vm223_vm0, %v10816_v4  ;;  %12357 = vst [vmem:[#allocation23_spill] sm:$0xff] %v10832_v5  ;;  %v10836_v4 = vld [vmem:[#allocation2 + $0x114] sm:$0xff] }
 0x177   : > { %12358 = vst [vmem:[#allocation24_spill] sm:$0xff] %v10836_v4 }
 0x179   : > { %8919 = vmatmul.mubr.msk.f32.gmra.mrb[18].mxu0 %vm223_vm0, %v10820_v6  ;;  %v10840_v6 = vld [vmem:[#allocation2 + $0x124] sm:$0xff] }
 0x17a   : > { %8921 = vmatprep.mubr.msk.f32.mxu0 %vm223_vm0, %v10824_v38  ;;  %12359 = vst [vmem:[#allocation25_spill] sm:$0xff] %v10840_v6  ;;  %v10844_v38 = vld [vmem:[#allocation2 + $0x12c] sm:$0xff] }
 0x17b   : > { %12360 = vst [vmem:[#allocation26_spill] sm:$0xff] %v10844_v38 }
 0x17d   : > { %8922 = vmatmul.mubr.msk.f32.gmra.mrb[20].mxu0 %vm223_vm0, %v10828_v1  ;;  %v10848_v1 = vld [vmem:[#allocation2 + $0x13c] sm:$0xff] }
 0x17e   : > { %8924 = vmatprep.mubr.msk.f32.mxu0 %vm223_vm0, %v10832_v5  ;;  %12361 = vst [vmem:[#allocation27_spill] sm:$0xff] %v10848_v1  ;;  %v10852_v5 = vld [vmem:[#allocation2 + $0x144] sm:$0xff] }
 0x181   : > { %8925 = vmatmul.mubr.msk.f32.gmra.mrb[22].mxu0 %vm223_vm0, %v10836_v4  ;;  %v10856_v4 = vld [vmem:[#allocation2 + $0x154] sm:$0xff] }
 0x182   : > { %8927 = vmatprep.mubr.msk.f32.mxu0 %vm223_vm0, %v10840_v6  ;;  %12362 = vst [vmem:[#allocation28_spill] sm:$0xff] %v10856_v4  ;;  %v10860_v6 = vld [vmem:[#allocation2 + $0x15c] sm:$0xff] }
 0x183   : > { %12363 = vst [vmem:[#allocation29_spill] sm:$0xff] %v10860_v6 }
 0x185   : > { %8928 = vmatmul.mubr.msk.f32.gmra.mrb[24].mxu0 %vm223_vm0, %v10844_v38  ;;  %v10864_v38 = vld [vmem:[#allocation2 + $0x16c] sm:$0xff] }
 0x186   : > { %8930 = vmatprep.mubr.msk.f32.mxu0 %vm223_vm0, %v10848_v1  ;;  %v10868_v1 = vld [vmem:[#allocation2 + $0x174] sm:$0xff] }
 0x189   : > { %8931 = vmatmul.mubr.msk.f32.gmra.mrb[26].mxu0 %vm223_vm0, %v10852_v5 }
 0x18a   : > { %8933 = vmatprep.mubr.msk.f32.mxu0 %vm223_vm0, %v10856_v4  ;;  %v7745_v4 = vld [vmem:[%s12240_s1 + $0x14] sm:$0xf] }
 0x18d   : > { %8934 = vmatmul.mubr.msk.f32.gmra.mrb[28].mxu0 %vm223_vm0, %v10860_v6 }
 0x18e   : > { %8936 = vmatprep.mubr.msk.f32.mxu0 %vm223_vm0, %v10864_v38 }
 0x191   : > { %8937 = vmatmul.mubr.msk.f32.gmra.mrb[30].mxu0 %vm223_vm0, %v10868_v1 }
 0x192   : > { %8941 = vmatprep.mubr.msk.f32.mxu0 %vm223_vm0, %v10631_v7  ;;  %v10934_v7 = vld [vmem:[#allocation2 + $0x180] sm:$0xff] }
 0x195   : > { %8942 = vmatmul.mubr.msk.f32.vlgmr.msra.gmra.mrb[0].mxu0 %vm223_vm0, %v10635_v8  ;;  %v10938_v8 = vld [vmem:[#allocation2 + $0x198] sm:$0xff] }
 0x196   : > { %8990 = vmatpush3.msk.msra.mxu0 %vm549_vm2, %v10751_v32  ;;  %8944 = vmatprep.mubr.msk.f32.mxu0 %vm223_vm0, %v10639_v10  ;;  %v10940_v10 = vld [vmem:[#allocation2 + $0x188] sm:$0xff]  ;;  %v7779_v32 = vld [vmem:[%s12240_s1 + $0x18] sm:$0xf] }
 0x197   : > { %9039 = vmatprep.subr.msk.mxu0 %vm549_vm2, %v7745_v4 }
 0x199   : > { %8945 = vmatmul.mubr.msk.f32.gmra.mrb[2].mxu0 %vm223_vm0, %v10643_v9  ;;  %v10946_v9 = vld [vmem:[#allocation2 + $0x1a0] sm:$0xff] }
 0x19a   : > { %8947 = vmatprep.mubr.msk.f32.mxu0 %vm223_vm0, %v10647_v11 }
 0x19d   : > { %8948 = vmatmul.mubr.msk.f32.gmra.mrb[4].mxu0 %vm223_vm0, %v10651_v12 }
 0x19e   : > { %8950 = vmatprep.mubr.msk.f32.mxu0 %vm223_vm0, %v10655_v14 }
 0x1a1   : > { %8951 = vmatmul.mubr.msk.f32.gmra.mrb[6].mxu0 %vm223_vm0, %v10659_v16 }
 0x1a2   : > { %8953 = vmatprep.mubr.msk.f32.mxu0 %vm223_vm0, %v10663_v18 }
 0x1a5   : > { %8954 = vmatmul.mubr.msk.f32.gmra.mrb[8].mxu0 %vm223_vm0, %v10667_v20 }
 0x1a6   : > { %8956 = vmatprep.mubr.msk.f32.mxu0 %vm223_vm0, %v10671_v22 }
 0x1a9   : > { %8957 = vmatmul.mubr.msk.f32.gmra.mrb[10].mxu0 %vm223_vm0, %v10675_v24 }
 0x1aa   : > { %8959 = vmatprep.mubr.msk.f32.mxu0 %vm223_vm0, %v10679_v26 }
 0x1ad   : > { %8960 = vmatmul.mubr.msk.f32.gmra.mrb[12].mxu0 %vm223_vm0, %v10683_v28 }
 0x1ae   : > { %8962 = vmatprep.mubr.msk.f32.mxu0 %vm223_vm0, %v10687_v30 }
 0x1b1   : > { %8963 = vmatmul.mubr.msk.f32.gmra.mrb[14].mxu0 %vm223_vm0, %v10692_v34 }
 0x1b2   : > { %8965 = vmatprep.mubr.msk.f32.mxu0 %vm223_vm0, %v10696_v36 }
 0x1b5   : > { %8966 = vmatmul.mubr.msk.f32.gmra.mrb[16].mxu0 %vm223_vm0, %v10701_v40 }
 0x1b6   : > { %8968 = vmatprep.mubr.msk.f32.mxu0 %vm223_vm0, %v10705_v42 }
 0x1b9   : > { %8969 = vmatmul.mubr.msk.f32.gmra.mrb[18].mxu0 %vm223_vm0, %v10710_v46 }
 0x1ba   : > { %8971 = vmatprep.mubr.msk.f32.mxu0 %vm223_vm0, %v10714_v48 }
 0x1bd   : > { %8972 = vmatmul.mubr.msk.f32.gmra.mrb[20].mxu0 %vm223_vm0, %v10719_v52 }
 0x1be   : > { %8974 = vmatprep.mubr.msk.f32.mxu0 %vm223_vm0, %v10723_v54 }
 0x1c1   : > { %8975 = vmatmul.mubr.msk.f32.gmra.mrb[22].mxu0 %vm223_vm0, %v10727_v56 }
 0x1c2   : > { %8977 = vmatprep.mubr.msk.f32.mxu0 %vm223_vm0, %v10731_v58 }
 0x1c5   : > { %8978 = vmatmul.mubr.msk.f32.gmra.mrb[24].mxu0 %vm223_vm0, %v10735_v60 }
 0x1c6   : > { %8980 = vmatprep.mubr.msk.f32.mxu0 %vm223_vm0, %v10739_v62 }
 0x1c9   : > { %8981 = vmatmul.mubr.msk.f32.gmra.mrb[26].mxu0 %vm223_vm0, %v10743_v3 }
 0x1ca   : > { %8983 = vmatprep.mubr.msk.f32.mxu0 %vm223_vm0, %v10934_v7 }
 0x1cd   : > { %8984 = vmatmul.mubr.msk.f32.gmra.mrb[28].mxu0 %vm223_vm0, %v10940_v10 }
 0x1ce   : > { %8986 = vmatprep.mubr.msk.f32.mxu0 %vm223_vm0, %v10938_v8 }
 0x1d1   : > { %8987 = vmatmul.mubr.msk.f32.gmra.mrb[30].mxu0 %vm223_vm0, %v10946_v9 }
 0x1d2   : > { %8991 = vmatprep.mubr.msk.f32.mxu0 %vm223_vm0, %v10480_v13  ;;  %v11011_v13 = vld [vmem:[#allocation2 + $0x182] sm:$0xff] }
 0x1d3   : > { %12364 = vst [vmem:[#allocation30_spill] sm:$0xff] %v11011_v13 }
 0x1d5   : > { %8992 = vmatmul.mubr.msk.f32.vlgmr.msra.gmra.mrb[0].mxu0 %vm223_vm0, %v10485_v15  ;;  %v11015_v15 = vld [vmem:[#allocation2 + $0x18a] sm:$0xff] }
 0x1d6   : > { %9040 = vmatpush3.msk.msra.mxu0 %vm549_vm2, %v7745_v4  ;;  %8994 = vmatprep.mubr.msk.f32.mxu0 %vm223_vm0, %v10490_v17  ;;  %12365 = vst [vmem:[#allocation31_spill] sm:$0xff] %v11015_v15  ;;  %v11019_v17 = vld [vmem:[#allocation2 + $0x19a] sm:$0xff] }
 0x1d7   : > { %9089 = vmatprep.subr.msk.mxu0 %vm549_vm2, %v7779_v32  ;;  %12366 = vst [vmem:[#allocation32_spill] sm:$0xff] %v11019_v17  ;;  %v7813_v4 = vld [vmem:[%s12240_s1 + $0x1c] sm:$0xf] }
 0x1d9   : > { %8995 = vmatmul.mubr.msk.f32.gmra.mrb[2].mxu0 %vm223_vm0, %v10495_v19  ;;  %v11023_v19 = vld [vmem:[#allocation2 + $0x1a2] sm:$0xff] }
 0x1da   : > { %8997 = vmatprep.mubr.msk.f32.mxu0 %vm223_vm0, %v10500_v21  ;;  %12367 = vst [vmem:[#allocation33_spill] sm:$0xff] %v11023_v19 }
 0x1dd   : > { %8998 = vmatmul.mubr.msk.f32.gmra.mrb[4].mxu0 %vm223_vm0, %v10505_v23 }
 0x1de   : > { %9000 = vmatprep.mubr.msk.f32.mxu0 %vm223_vm0, %v10510_v25 }
 0x1e1   : > { %9001 = vmatmul.mubr.msk.f32.gmra.mrb[6].mxu0 %vm223_vm0, %v10515_v27 }
 0x1e2   : > { %9003 = vmatprep.mubr.msk.f32.mxu0 %vm223_vm0, %v10520_v29 }
 0x1e5   : > { %9004 = vmatmul.mubr.msk.f32.gmra.mrb[8].mxu0 %vm223_vm0, %v10525_v31 }
 0x1e6   : > { %9006 = vmatprep.mubr.msk.f32.mxu0 %vm223_vm0, %v10530_v33 }
 0x1e9   : > { %9007 = vmatmul.mubr.msk.f32.gmra.mrb[10].mxu0 %vm223_vm0, %v10535_v35 }
 0x1ea   : > { %9009 = vmatprep.mubr.msk.f32.mxu0 %vm223_vm0, %v10540_v37 }
 0x1ed   : > { %9010 = vmatmul.mubr.msk.f32.gmra.mrb[12].mxu0 %vm223_vm0, %v10545_v39 }
 0x1ee   : > { %9012 = vmatprep.mubr.msk.f32.mxu0 %vm223_vm0, %v10550_v41 }
 0x1f1   : > { %9013 = vmatmul.mubr.msk.f32.gmra.mrb[14].mxu0 %vm223_vm0, %v10555_v43 }
 0x1f2   : > { %9015 = vmatprep.mubr.msk.f32.mxu0 %vm223_vm0, %v10560_v45 }
 0x1f5   : > { %9016 = vmatmul.mubr.msk.f32.gmra.mrb[16].mxu0 %vm223_vm0, %v10565_v47 }
 0x1f6   : > { %9018 = vmatprep.mubr.msk.f32.mxu0 %vm223_vm0, %v10570_v49 }
 0x1f9   : > { %9019 = vmatmul.mubr.msk.f32.gmra.mrb[18].mxu0 %vm223_vm0, %v10575_v51 }
 0x1fa   : > { %9021 = vmatprep.mubr.msk.f32.mxu0 %vm223_vm0, %v10580_v53 }
 0x1fd   : > { %9022 = vmatmul.mubr.msk.f32.gmra.mrb[20].mxu0 %vm223_vm0, %v10585_v55 }
 0x1fe   : > { %9024 = vmatprep.mubr.msk.f32.mxu0 %vm223_vm0, %v10590_v57 }
 0x201   : > { %9025 = vmatmul.mubr.msk.f32.gmra.mrb[22].mxu0 %vm223_vm0, %v10595_v59 }
 0x202   : > { %9027 = vmatprep.mubr.msk.f32.mxu0 %vm223_vm0, %v10600_v61 }
 0x205   : > { %9028 = vmatmul.mubr.msk.f32.gmra.mrb[24].mxu0 %vm223_vm0, %v10605_v63 }
 0x206   : > { %9030 = vmatprep.mubr.msk.f32.mxu0 %vm223_vm0, %v10610_v0 }
 0x209   : > { %9031 = vmatmul.mubr.msk.f32.gmra.mrb[26].mxu0 %vm223_vm0, %v10614_v2  ;;  %v12376_v2 = vld [vmem:[#allocation15_spill] sm:$0xff] }
 0x20a   : > { %9033 = vmatprep.mubr.msk.f32.mxu0 %vm223_vm0, %v11011_v13  ;;  %v12372_v13 = vld [vmem:[#allocation11_spill] sm:$0xff] }
 0x20d   : > { %9034 = vmatmul.mubr.msk.f32.gmra.mrb[28].mxu0 %vm223_vm0, %v11015_v15  ;;  %v12368_v15 = vld [vmem:[#allocation7_spill] sm:$0xff] }
 0x20e   : > { %9036 = vmatprep.mubr.msk.f32.mxu0 %vm223_vm0, %v11019_v17  ;;  %v12369_v17 = vld [vmem:[#allocation8_spill] sm:$0xff] }
 0x211   : > { %9037 = vmatmul.mubr.msk.f32.gmra.mrb[30].mxu0 %vm223_vm0, %v11023_v19  ;;  %v12370_v19 = vld [vmem:[#allocation9_spill] sm:$0xff] }
 0x212   : > { %9041 = vmatprep.mubr.msk.f32.mxu0 %vm223_vm0, %v10760_v44  ;;  %v12371_v44 = vld [vmem:[#allocation10_spill] sm:$0xff] }
 0x215   : > { %9042 = vmatmul.mubr.msk.f32.vlgmr.msra.gmra.mrb[0].mxu0 %vm223_vm0, %v10764_v50  ;;  %v12373_v50 = vld [vmem:[#allocation12_spill] sm:$0xff] }
 0x216   : > { %9090 = vmatpush3.msk.msra.mxu0 %vm549_vm2, %v7779_v32  ;;  %9044 = vmatprep.mubr.msk.f32.mxu0 %vm223_vm0, %v12368_v15  ;;  %v12374_v32 = vld [vmem:[#allocation13_spill] sm:$0xff]  ;;  %v12375_v15 = vld [vmem:[#allocation14_spill] sm:$0xff] }
 0x217   : > { %9139 = vmatprep.subr.msk.mxu0 %vm549_vm2, %v7813_v4 }
 0x219   : > { %9045 = vmatmul.mubr.msk.f32.gmra.mrb[2].mxu0 %vm223_vm0, %v12369_v17  ;;  %v12377_v17 = vld [vmem:[#allocation16_spill] sm:$0xff] }
 0x21a   : > { %9047 = vmatprep.mubr.msk.f32.mxu0 %vm223_vm0, %v12370_v19  ;;  %v12378_v19 = vld [vmem:[#allocation17_spill] sm:$0xff] }
 0x21d   : > { %9048 = vmatmul.mubr.msk.f32.gmra.mrb[4].mxu0 %vm223_vm0, %v12371_v44  ;;  %v12379_v44 = vld [vmem:[#allocation18_spill] sm:$0xff] }
 0x21e   : > { %9050 = vmatprep.mubr.msk.f32.mxu0 %vm223_vm0, %v12372_v13  ;;  %v12380_v13 = vld [vmem:[#allocation19_spill] sm:$0xff] }
 0x221   : > { %9051 = vmatmul.mubr.msk.f32.gmra.mrb[6].mxu0 %vm223_vm0, %v12373_v50  ;;  %v12381_v50 = vld [vmem:[#allocation20_spill] sm:$0xff] }
 0x222   : > { %9053 = vmatprep.mubr.msk.f32.mxu0 %vm223_vm0, %v12374_v32  ;;  %v12382_v32 = vld [vmem:[#allocation21_spill] sm:$0xff] }
 0x225   : > { %9054 = vmatmul.mubr.msk.f32.gmra.mrb[8].mxu0 %vm223_vm0, %v12375_v15  ;;  %v12383_v15 = vld [vmem:[#allocation22_spill] sm:$0xff] }
 0x226   : > { %9056 = vmatprep.mubr.msk.f32.mxu0 %vm223_vm0, %v12376_v2  ;;  %v12384_v2 = vld [vmem:[#allocation23_spill] sm:$0xff] }
 0x229   : > { %9057 = vmatmul.mubr.msk.f32.gmra.mrb[10].mxu0 %vm223_vm0, %v12377_v17  ;;  %v12385_v17 = vld [vmem:[#allocation24_spill] sm:$0xff] }
 0x22a   : > { %9059 = vmatprep.mubr.msk.f32.mxu0 %vm223_vm0, %v12378_v19  ;;  %v12386_v19 = vld [vmem:[#allocation25_spill] sm:$0xff] }
 0x22d   : > { %9060 = vmatmul.mubr.msk.f32.gmra.mrb[12].mxu0 %vm223_vm0, %v12379_v44  ;;  %v12387_v44 = vld [vmem:[#allocation26_spill] sm:$0xff] }
 0x22e   : > { %9062 = vmatprep.mubr.msk.f32.mxu0 %vm223_vm0, %v12380_v13  ;;  %v12388_v13 = vld [vmem:[#allocation27_spill] sm:$0xff] }
 0x231   : > { %9063 = vmatmul.mubr.msk.f32.gmra.mrb[14].mxu0 %vm223_vm0, %v12381_v50 }
 0x232   : > { %9065 = vmatprep.mubr.msk.f32.mxu0 %vm223_vm0, %v12382_v32  ;;  %v12389_v32 = vld [vmem:[#allocation28_spill] sm:$0xff] }
 0x235   : > { %9066 = vmatmul.mubr.msk.f32.gmra.mrb[16].mxu0 %vm223_vm0, %v12383_v15 }
 0x236   : > { %9068 = vmatprep.mubr.msk.f32.mxu0 %vm223_vm0, %v12384_v2 }
 0x239   : > { %9069 = vmatmul.mubr.msk.f32.gmra.mrb[18].mxu0 %vm223_vm0, %v12385_v17 }
 0x23a   : > { %9071 = vmatprep.mubr.msk.f32.mxu0 %vm223_vm0, %v12386_v19  ;;  %v11088_v19 = vld [vmem:[#allocation2 + $0x184] sm:$0xff] }
 0x23b   : > { %12390 = vst [vmem:[#allocation7_spill] sm:$0xff] %v11088_v19 }
 0x23d   : > { %9072 = vmatmul.mubr.msk.f32.gmra.mrb[20].mxu0 %vm223_vm0, %v12387_v44 }
 0x23e   : > { %9074 = vmatprep.mubr.msk.f32.mxu0 %vm223_vm0, %v12388_v13  ;;  %v11092_v13 = vld [vmem:[#allocation2 + $0x18c] sm:$0xff] }
 0x241   : > { %9075 = vmatmul.mubr.msk.f32.gmra.mrb[22].mxu0 %vm223_vm0, %v10852_v5 }
 0x242   : > { %9077 = vmatprep.mubr.msk.f32.mxu0 %vm223_vm0, %v12389_v32  ;;  %v11096_v32 = vld [vmem:[#allocation2 + $0x19c] sm:$0xff] }
 0x245   : > { %9078 = vmatmul.mubr.msk.f32.gmra.mrb[24].mxu0 %vm223_vm0, %v10860_v6  ;;  %v11100_v6 = vld [vmem:[#allocation2 + $0x1a4] sm:$0xff] }
 0x246   : > { %9080 = vmatprep.mubr.msk.f32.mxu0 %vm223_vm0, %v10864_v38 }
 0x249   : > { %9081 = vmatmul.mubr.msk.f32.gmra.mrb[26].mxu0 %vm223_vm0, %v10868_v1 }
 0x24a   : > { %9083 = vmatprep.mubr.msk.f32.mxu0 %vm223_vm0, %v11088_v19  ;;  %v7847_v19 = vld [vmem:[%s12240_s1 + $0x20] sm:$0xf] }
 0x24d   : > { %9084 = vmatmul.mubr.msk.f32.gmra.mrb[28].mxu0 %vm223_vm0, %v11092_v13 }
 0x24e   : > { %9086 = vmatprep.mubr.msk.f32.mxu0 %vm223_vm0, %v11096_v32 }
 0x251   : > { %9087 = vmatmul.mubr.msk.f32.gmra.mrb[30].mxu0 %vm223_vm0, %v11100_v6 }
 0x252   : > { %9091 = vmatprep.mubr.msk.f32.mxu0 %vm223_vm0, %v10647_v11  ;;  %v2691_v11 = vld [vmem:[#allocation2 + $0x1b0] sm:$0xff] }
 0x255   : > { %9092 = vmatmul.mubr.msk.f32.vlgmr.msra.gmra.mrb[0].mxu0 %vm223_vm0, %v10651_v12  ;;  %v2692_v12 = vld [vmem:[#allocation2 + $0x1b8] sm:$0xff] }
 0x256   : > { %9140 = vmatpush3.msk.msra.mxu0 %vm549_vm2, %v7813_v4  ;;  %9094 = vmatprep.mubr.msk.f32.mxu0 %vm223_vm0, %v10655_v14  ;;  %v2693_v14 = vld [vmem:[#allocation2 + $0x1c8] sm:$0xff] }
 0x257   : > { %9189 = vmatprep.subr.msk.mxu0 %vm549_vm2, %v7847_v19 }
 0x259   : > { %9095 = vmatmul.mubr.msk.f32.gmra.mrb[2].mxu0 %vm223_vm0, %v10659_v16  ;;  %v2694_v16 = vld [vmem:[#allocation2 + $0x1d0] sm:$0xff] }
 0x25a   : > { %9097 = vmatprep.mubr.msk.f32.mxu0 %vm223_vm0, %v10663_v18  ;;  %v12410_v18 = vld [vmem:[#allocation28_spill] sm:$0xff] }
 0x25d   : > { %9098 = vmatmul.mubr.msk.f32.gmra.mrb[4].mxu0 %vm223_vm0, %v10667_v20  ;;  %v12411_v20 = vld [vmem:[#allocation29_spill] sm:$0xff] }
 0x25e   : > { %9100 = vmatprep.mubr.msk.f32.mxu0 %vm223_vm0, %v10671_v22  ;;  %v3471_v22 = vld [vmem:[#allocation2 + $0x1b4] sm:$0xff] }
 0x261   : > { %9101 = vmatmul.mubr.msk.f32.gmra.mrb[6].mxu0 %vm223_vm0, %v10675_v24  ;;  %v3472_v24 = vld [vmem:[#allocation2 + $0x1bc] sm:$0xff] }
 0x262   : > { %9103 = vmatprep.mubr.msk.f32.mxu0 %vm223_vm0, %v10679_v26  ;;  %v3473_v26 = vld [vmem:[#allocation2 + $0x1cc] sm:$0xff] }
 0x265   : > { %9104 = vmatmul.mubr.msk.f32.gmra.mrb[8].mxu0 %vm223_vm0, %v10683_v28  ;;  %v3474_v28 = vld [vmem:[#allocation2 + $0x1d4] sm:$0xff] }
 0x266   : > { %9106 = vmatprep.mubr.msk.f32.mxu0 %vm223_vm0, %v10687_v30  ;;  %v7882_v30 = vld [vmem:[%s12242_s3 + $0x4] sm:$0xf] }
 0x267   : > { %9239 = vmatprep.subr.msk.mxu1 %vm549_vm2, %v7882_v30 }
 0x268   : > { %9240 = vmatpush3.msk.msra.mxu1 %vm549_vm2, %v7882_v30 }
 0x269   : > { %9107 = vmatmul.mubr.msk.f32.gmra.mrb[10].mxu0 %vm223_vm0, %v10692_v34  ;;  %v3969_v34 = vld [vmem:[#allocation2 + $0x2] sm:$0xff] }
 0x26a   : > { %9109 = vmatprep.mubr.msk.f32.mxu0 %vm223_vm0, %v10696_v36  ;;  %9241 = vmatprep.mubr.msk.f32.mxu1 %vm223_vm0, %v3969_v34  ;;  %v3970_v36 = vld [vmem:[#allocation2 + $0xa] sm:$0xff] }
 0x26b   : > { %9242 = vmatmul.mubr.msk.f32.vlgmr.msra.gmra.mrb[0].mxu1 %vm223_vm0, %v3970_v36 }
 0x26d   : > { %9110 = vmatmul.mubr.msk.f32.gmra.mrb[12].mxu0 %vm223_vm0, %v10701_v40  ;;  %v3968_v40 = vld [vmem:[%s12242_s3] sm:$0xf] }
 0x26e   : > { %9112 = vmatprep.mubr.msk.f32.mxu0 %vm223_vm0, %v10705_v42  ;;  %v3971_v42 = vld [vmem:[#allocation2 + $0x1a] sm:$0xff]  ;;  %9289 = vmatprep.subr.msk.mxu1 %vm549_vm2, %v3968_v40 }
 0x26f   : > { %9244 = vmatprep.mubr.msk.f32.mxu1 %vm223_vm0, %v3971_v42  ;;  %9290 = vmatpush3.msk.msra.mxu1 %vm549_vm2, %v3968_v40 }
 0x271   : > { %9113 = vmatmul.mubr.msk.f32.gmra.mrb[14].mxu0 %vm223_vm0, %v10710_v46  ;;  %v3972_v46 = vld [vmem:[#allocation2 + $0x22] sm:$0xff] }
 0x272   : > { %9115 = vmatprep.mubr.msk.f32.mxu0 %vm223_vm0, %v10714_v48  ;;  %9245 = vmatmul.mubr.msk.f32.gmra.mrb[2].mxu1 %vm223_vm0, %v3972_v46  ;;  %v11307_v48 = vld [vmem:[%s12242_s3 + $0x8] sm:$0xf] }
 0x273   : > { %9339 = vmatprep.subr.msk.mxu1 %vm549_vm2, %v11307_v48 }
 0x275   : > { %9116 = vmatmul.mubr.msk.f32.gmra.mrb[16].mxu0 %vm223_vm0, %v10719_v52  ;;  %v11314_v52 = vld [vmem:[%s12241_s2] ss:$0 sm:$0xff] }
 0x276   : > { %9118 = vmatprep.mubr.msk.f32.mxu0 %vm223_vm0, %v10723_v54 }
 0x279   : > { %9119 = vmatmul.mubr.msk.f32.gmra.mrb[18].mxu0 %vm223_vm0, %v10727_v56 }
 0x27a   : > { %9121 = vmatprep.mubr.msk.f32.mxu0 %vm223_vm0, %v10731_v58 }
 0x27d   : > { %9122 = vmatmul.mubr.msk.f32.gmra.mrb[20].mxu0 %vm223_vm0, %v10735_v60 }
 0x27e   : > { %9124 = vmatprep.mubr.msk.f32.mxu0 %vm223_vm0, %v10739_v62 }
 0x281   : > { %9125 = vmatmul.mubr.msk.f32.gmra.mrb[22].mxu0 %vm223_vm0, %v10743_v3 }
 0x282   : > { %9127 = vmatprep.mubr.msk.f32.mxu0 %vm223_vm0, %v10934_v7 }
 0x285   : > { %9128 = vmatmul.mubr.msk.f32.gmra.mrb[24].mxu0 %vm223_vm0, %v10940_v10 }
 0x286   : > { %9130 = vmatprep.mubr.msk.f32.mxu0 %vm223_vm0, %v10938_v8 }
 0x289   : > { %9131 = vmatmul.mubr.msk.f32.gmra.mrb[26].mxu0 %vm223_vm0, %v10946_v9 }
 0x28a   : > { %9133 = vmatprep.mubr.msk.f32.mxu0 %vm223_vm0, %v2691_v11 }
 0x28d   : > { %9134 = vmatmul.mubr.msk.f32.gmra.mrb[28].mxu0 %vm223_vm0, %v2692_v12 }
 0x28e   : > { %9136 = vmatprep.mubr.msk.f32.mxu0 %vm223_vm0, %v2693_v14 }
 0x291   : > { %9137 = vmatmul.mubr.msk.f32.gmra.mrb[30].mxu0 %vm223_vm0, %v2694_v16 }
 0x292   : > { %9141 = vmatprep.mubr.msk.f32.mxu0 %vm223_vm0, %v10500_v21  ;;  %v12391_v21 = vld [vmem:[#allocation6_spill] sm:$0xff] }
 0x295   : > { %9142 = vmatmul.mubr.msk.f32.vlgmr.msra.gmra.mrb[0].mxu0 %vm223_vm0, %v10505_v23  ;;  %v12392_v23 = vld [vmem:[#allocation30_spill] sm:$0xff] }
 0x296   : > { %9190 = vmatpush3.msk.msra.mxu0 %vm549_vm2, %v7847_v19  ;;  %9144 = vmatprep.mubr.msk.f32.mxu0 %vm223_vm0, %v10510_v25  ;;  %v12393_v25 = vld [vmem:[#allocation31_spill] sm:$0xff] }
 0x299   : > { %9145 = vmatmul.mubr.msk.f32.gmra.mrb[2].mxu0 %vm223_vm0, %v10515_v27  ;;  %v12394_v27 = vld [vmem:[#allocation32_spill] sm:$0xff] }
 0x29a   : > { %9147 = vmatprep.mubr.msk.f32.mxu0 %vm223_vm0, %v10520_v29  ;;  %v3081_v29 = vld [vmem:[#allocation2 + $0x1b2] sm:$0xff] }
 0x29d   : > { %9148 = vmatmul.mubr.msk.f32.gmra.mrb[4].mxu0 %vm223_vm0, %v10525_v31  ;;  %v12395_v31 = vld [vmem:[#allocation33_spill] sm:$0xff] }
 0x29e   : > { %9150 = vmatprep.mubr.msk.f32.mxu0 %vm223_vm0, %v10530_v33  ;;  %v3082_v33 = vld [vmem:[#allocation2 + $0x1ba] sm:$0xff] }
 0x2a1   : > { %9151 = vmatmul.mubr.msk.f32.gmra.mrb[6].mxu0 %vm223_vm0, %v10535_v35  ;;  %v3083_v35 = vld [vmem:[#allocation2 + $0x1ca] sm:$0xff] }
 0x2a2   : > { %9153 = vmatprep.mubr.msk.f32.mxu0 %vm223_vm0, %v10540_v37  ;;  %v3084_v37 = vld [vmem:[#allocation2 + $0x1d2] sm:$0xff] }
 0x2a5   : > { %9154 = vmatmul.mubr.msk.f32.gmra.mrb[8].mxu0 %vm223_vm0, %v10545_v39  ;;  %v12396_v39 = vld [vmem:[#allocation9_spill] sm:$0xff] }
 0x2a6   : > { %9156 = vmatprep.mubr.msk.f32.mxu0 %vm223_vm0, %v10550_v41  ;;  %v12397_v41 = vld [vmem:[#allocation10_spill] sm:$0xff] }
 0x2a9   : > { %9157 = vmatmul.mubr.msk.f32.gmra.mrb[10].mxu0 %vm223_vm0, %v10555_v43  ;;  %v12398_v43 = vld [vmem:[#allocation11_spill] sm:$0xff] }
 0x2aa   : > { %9159 = vmatprep.mubr.msk.f32.mxu0 %vm223_vm0, %v10560_v45  ;;  %v12399_v45 = vld [vmem:[#allocation12_spill] sm:$0xff] }
 0x2ad   : > { %9160 = vmatmul.mubr.msk.f32.gmra.mrb[12].mxu0 %vm223_vm0, %v10565_v47  ;;  %v12400_v47 = vld [vmem:[#allocation13_spill] sm:$0xff] }
 0x2ae   : > { %9162 = vmatprep.mubr.msk.f32.mxu0 %vm223_vm0, %v10570_v49  ;;  %v12401_v49 = vld [vmem:[#allocation14_spill] sm:$0xff] }
 0x2b1   : > { %9163 = vmatmul.mubr.msk.f32.gmra.mrb[14].mxu0 %vm223_vm0, %v10575_v51  ;;  %v12402_v51 = vld [vmem:[#allocation15_spill] sm:$0xff] }
 0x2b2   : > { %9165 = vmatprep.mubr.msk.f32.mxu0 %vm223_vm0, %v10580_v53  ;;  %v12403_v53 = vld [vmem:[#allocation16_spill] sm:$0xff] }
 0x2b5   : > { %9166 = vmatmul.mubr.msk.f32.gmra.mrb[16].mxu0 %vm223_vm0, %v10585_v55  ;;  %v12404_v55 = vld [vmem:[#allocation17_spill] sm:$0xff] }
 0x2b6   : > { %9168 = vmatprep.mubr.msk.f32.mxu0 %vm223_vm0, %v10590_v57  ;;  %v12405_v57 = vld [vmem:[#allocation18_spill] sm:$0xff] }
 0x2b9   : > { %9169 = vmatmul.mubr.msk.f32.gmra.mrb[18].mxu0 %vm223_vm0, %v10595_v59  ;;  %v12406_v59 = vld [vmem:[#allocation19_spill] sm:$0xff] }
 0x2ba   : > { %9171 = vmatprep.mubr.msk.f32.mxu0 %vm223_vm0, %v10600_v61  ;;  %v12407_v61 = vld [vmem:[#allocation21_spill] sm:$0xff] }
 0x2bd   : > { %9172 = vmatmul.mubr.msk.f32.gmra.mrb[20].mxu0 %vm223_vm0, %v10605_v63  ;;  %v12408_v63 = vld [vmem:[#allocation25_spill] sm:$0xff] }
 0x2be   : > { %9174 = vmatprep.mubr.msk.f32.mxu0 %vm223_vm0, %v10610_v0  ;;  %v12409_v0 = vld [vmem:[#allocation27_spill] sm:$0xff] }
 0x2c1   : > { %9175 = vmatmul.mubr.msk.f32.gmra.mrb[22].mxu0 %vm223_vm0, %v12391_v21 }
 0x2c2   : > { %9177 = vmatprep.mubr.msk.f32.mxu0 %vm223_vm0, %v12392_v23 }
 0x2c5   : > { %9178 = vmatmul.mubr.msk.f32.gmra.mrb[24].mxu0 %vm223_vm0, %v12393_v25 }
 0x2c6   : > { %9180 = vmatprep.mubr.msk.f32.mxu0 %vm223_vm0, %v12394_v27 }
 0x2c9   : > { %9181 = vmatmul.mubr.msk.f32.gmra.mrb[26].mxu0 %vm223_vm0, %v12395_v31 }
 0x2ca   : > { %9183 = vmatprep.mubr.msk.f32.mxu0 %vm223_vm0, %v3081_v29 }
 0x2cd   : > { %9184 = vmatmul.mubr.msk.f32.gmra.mrb[28].mxu0 %vm223_vm0, %v3082_v33 }
 0x2ce   : > { %9186 = vmatprep.mubr.msk.f32.mxu0 %vm223_vm0, %v3083_v35 }
 0x2d1   : > { %9187 = vmatmul.mubr.msk.f32.gmra.mrb[30].mxu0 %vm223_vm0, %v3084_v37 }
 0x2d2   : > { %9191 = vmatprep.mubr.msk.f32.mxu0 %vm223_vm0, %v12396_v39 }
 0x2d5   : > { %9192 = vmatmul.mubr.msk.f32.vlgmr.msra.gmra.mrb[0].mxu0 %vm223_vm0, %v12397_v41 }
 0x2d6   : > { %9194 = vmatprep.mubr.msk.f32.mxu0 %vm223_vm0, %v12398_v43 }
 0x2d9   : > { %9195 = vmatmul.mubr.msk.f32.gmra.mrb[2].mxu0 %vm223_vm0, %v12399_v45 }
 0x2da   : > { %9197 = vmatprep.mubr.msk.f32.mxu0 %vm223_vm0, %v12400_v47 }
 0x2dd   : > { %9198 = vmatmul.mubr.msk.f32.gmra.mrb[4].mxu0 %vm223_vm0, %v12401_v49 }
 0x2de   : > { %9200 = vmatprep.mubr.msk.f32.mxu0 %vm223_vm0, %v12402_v51 }
 0x2e1   : > { %9201 = vmatmul.mubr.msk.f32.gmra.mrb[6].mxu0 %vm223_vm0, %v12403_v53 }
 0x2e2   : > { %9203 = vmatprep.mubr.msk.f32.mxu0 %vm223_vm0, %v12404_v55 }
 0x2e5   : > { %9204 = vmatmul.mubr.msk.f32.gmra.mrb[8].mxu0 %vm223_vm0, %v12405_v57 }
 0x2e6   : > { %9206 = vmatprep.mubr.msk.f32.mxu0 %vm223_vm0, %v12406_v59 }
 0x2e9   : > { %9207 = vmatmul.mubr.msk.f32.gmra.mrb[10].mxu0 %vm223_vm0, %v12381_v50 }
 0x2ea   : > { %9209 = vmatprep.mubr.msk.f32.mxu0 %vm223_vm0, %v12407_v61 }
 0x2ed   : > { %9210 = vmatmul.mubr.msk.f32.gmra.mrb[12].mxu0 %vm223_vm0, %v12383_v15 }
 0x2ee   : > { %9212 = vmatprep.mubr.msk.f32.mxu0 %vm223_vm0, %v12384_v2  ;;  %v12412_v2 = vld [vmem:[#allocation7_spill] sm:$0xff] }
 0x2f1   : > { %9213 = vmatmul.mubr.msk.f32.gmra.mrb[14].mxu0 %vm223_vm0, %v12385_v17 }
 0x2f2   : > { %9215 = vmatprep.mubr.msk.f32.mxu0 %vm223_vm0, %v12408_v63 }
 0x2f5   : > { %9216 = vmatmul.mubr.msk.f32.gmra.mrb[16].mxu0 %vm223_vm0, %v12387_v44 }
 0x2f6   : > { %9218 = vmatprep.mubr.msk.f32.mxu0 %vm223_vm0, %v12409_v0 }
 0x2f9   : > { %9219 = vmatmul.mubr.msk.f32.gmra.mrb[18].mxu0 %vm223_vm0, %v10852_v5 }
 0x2fa   : > { %9221 = vmatprep.mubr.msk.f32.mxu0 %vm223_vm0, %v12410_v18 }
 0x2fd   : > { %9222 = vmatmul.mubr.msk.f32.gmra.mrb[20].mxu0 %vm223_vm0, %v12411_v20 }
 0x2fe   : > { %9224 = vmatprep.mubr.msk.f32.mxu0 %vm223_vm0, %v10864_v38 }
 0x301   : > { %9225 = vmatmul.mubr.msk.f32.gmra.mrb[22].mxu0 %vm223_vm0, %v10868_v1 }
 0x302   : > { %9227 = vmatprep.mubr.msk.f32.mxu0 %vm223_vm0, %v12412_v2 }
 0x305   : > { %9228 = vmatmul.mubr.msk.f32.gmra.mrb[24].mxu0 %vm223_vm0, %v11092_v13 }
 0x306   : > { %9230 = vmatprep.mubr.msk.f32.mxu0 %vm223_vm0, %v11096_v32 }
 0x309   : > { %9231 = vmatmul.mubr.msk.f32.gmra.mrb[26].mxu0 %vm223_vm0, %v11100_v6 }
 0x30a   : > { %9233 = vmatprep.mubr.msk.f32.mxu0 %vm223_vm0, %v3471_v22 }
 0x30d   : > { %9234 = vmatmul.mubr.msk.f32.gmra.mrb[28].mxu0 %vm223_vm0, %v3472_v24 }
 0x30e   : > { %9236 = vmatprep.mubr.msk.f32.mxu0 %vm223_vm0, %v3473_v26 }
 0x311   : > { %9237 = vmatmul.mubr.msk.f32.gmra.mrb[30].mxu0 %vm223_vm0, %v3474_v28 }
 0x3a8   : > { %v9193_v54 = vpop.f32.mrb[0].mxu0 }
 0x3a9   : > { %v3841_v56 = vadd.f32 %v9193_v54, %v11314_v52  ;;  %v3642_v58 = vpop.f32.mrb[1].mxu0 }
 0x3aa   : > { %v3840_v60 = vadd.f32 %v11314_v52, %v3642_v58 }
 0x3ab   : > { %v3873_v62 = vmax.f32 %v3841_v56, 0.0 }
 0x3ac   : > { %v3872_v3 = vmax.f32 %v3840_v60, 0.0  ;;  %v9196_v1 = vpop.f32.mrb[2].mxu0 }
 0x3ad   : > { %3905 = vst.msk [vmem:[#allocation2 + $0x3a] sm:$0xff] %vm223_vm0, %v3873_v62  ;;  %v3843_v5 = vadd.f32 %v9196_v1, %v11314_v52  ;;  %v3652_v6 = vpop.f32.mrb[3].mxu0 }
 0x3ae   : > { %3904 = vst.msk [vmem:[#allocation2 + $0x32] sm:$0xff] %vm223_vm0, %v3872_v3  ;;  %v3842_v38 = vadd.f32 %v11314_v52, %v3652_v6 }
 0x3af   : > { %v3875_v7 = vmax.f32 %v3843_v5, 0.0 }
 0x3b0   : > { %v3874_v8 = vmax.f32 %v3842_v38, 0.0  ;;  %v9199_v10 = vpop.f32.mrb[4].mxu0 }
 0x3b1   : > { %3907 = vst.msk [vmem:[#allocation2 + $0x52] sm:$0xff] %vm223_vm0, %v3875_v7  ;;  %v3845_v9 = vadd.f32 %v9199_v10, %v11314_v52  ;;  %v3662_v13 = vpop.f32.mrb[5].mxu0 }
 0x3b2   : > { %3906 = vst.msk [vmem:[#allocation2 + $0x4a] sm:$0xff] %vm223_vm0, %v3874_v8  ;;  %v3844_v19 = vadd.f32 %v11314_v52, %v3662_v13 }
 0x3b3   : > { %v3877_v4 = vmax.f32 %v3845_v9, 0.0 }
 0x3b4   : > { %v3876_v44 = vmax.f32 %v3844_v19, 0.0  ;;  %v9202_v50 = vpop.f32.mrb[6].mxu0  ;;  %v11334_v12 = vld [vmem:[#allocation2 + $0x3a] sm:$0xff] }
 0x3b5   : > { %3909 = vst.msk [vmem:[#allocation2 + $0x6a] sm:$0xff] %vm223_vm0, %v3877_v4  ;;  %v3847_v32 = vadd.f32 %v9202_v50, %v11314_v52  ;;  %v3672_v15 = vpop.f32.mrb[7].mxu0  ;;  %v11328_v17 = vld [vmem:[#allocation2 + $0x32] sm:$0xff] }
 0x3b6   : > { %3908 = vst.msk [vmem:[#allocation2 + $0x62] sm:$0xff] %vm223_vm0, %v3876_v44  ;;  %v3846_v11 = vadd.f32 %v11314_v52, %v3672_v15  ;;  %9247 = vmatprep.mubr.msk.f32.mxu1 %vm223_vm0, %v11328_v17 }
 0x3b7   : > { %v3879_v14 = vmax.f32 %v3847_v32, 0.0  ;;  %9248 = vmatmul.mubr.msk.f32.gmra.mrb[4].mxu1 %vm223_vm0, %v11334_v12 }
 0x3b8   : > { %v3878_v16 = vmax.f32 %v3846_v11, 0.0  ;;  %v9205_v21 = vpop.f32.mrb[8].mxu0  ;;  %v11346_v31 = vld [vmem:[#allocation2 + $0x52] sm:$0xff] }
 0x3b9   : > { %3911 = vst.msk [vmem:[#allocation2 + $0x82] sm:$0xff] %vm223_vm0, %v3879_v14  ;;  %v3849_v23 = vadd.f32 %v9205_v21, %v11314_v52  ;;  %v3682_v25 = vpop.f32.mrb[9].mxu0  ;;  %v11340_v27 = vld [vmem:[#allocation2 + $0x4a] sm:$0xff] }
 0x3ba   : > { %3910 = vst.msk [vmem:[#allocation2 + $0x7a] sm:$0xff] %vm223_vm0, %v3878_v16  ;;  %v3848_v29 = vadd.f32 %v11314_v52, %v3682_v25  ;;  %9250 = vmatprep.mubr.msk.f32.mxu1 %vm223_vm0, %v11340_v27 }
 0x3bb   : > { %v3881_v33 = vmax.f32 %v3849_v23, 0.0  ;;  %9251 = vmatmul.mubr.msk.f32.gmra.mrb[6].mxu1 %vm223_vm0, %v11346_v31 }
 0x3bc   : > { %v3880_v35 = vmax.f32 %v3848_v29, 0.0  ;;  %v9208_v37 = vpop.f32.mrb[10].mxu0  ;;  %v11358_v47 = vld [vmem:[#allocation2 + $0x6a] sm:$0xff] }
 0x3bd   : > { %3913 = vst.msk [vmem:[#allocation2 + $0x9a] sm:$0xff] %vm223_vm0, %v3881_v33  ;;  %v3851_v39 = vadd.f32 %v9208_v37, %v11314_v52  ;;  %v3692_v41 = vpop.f32.mrb[11].mxu0  ;;  %v11352_v43 = vld [vmem:[#allocation2 + $0x62] sm:$0xff] }
 0x3be   : > { %3912 = vst.msk [vmem:[#allocation2 + $0x92] sm:$0xff] %vm223_vm0, %v3880_v35  ;;  %v3850_v45 = vadd.f32 %v11314_v52, %v3692_v41  ;;  %9253 = vmatprep.mubr.msk.f32.mxu1 %vm223_vm0, %v11352_v43 }
 0x3bf   : > { %v3883_v49 = vmax.f32 %v3851_v39, 0.0  ;;  %9254 = vmatmul.mubr.msk.f32.gmra.mrb[8].mxu1 %vm223_vm0, %v11358_v47 }
 0x3c0   : > { %v3882_v51 = vmax.f32 %v3850_v45, 0.0  ;;  %v9211_v53 = vpop.f32.mrb[12].mxu0  ;;  %v11370_v63 = vld [vmem:[#allocation2 + $0x82] sm:$0xff] }
 0x3c1   : > { %3915 = vst.msk [vmem:[#allocation2 + $0xb2] sm:$0xff] %vm223_vm0, %v3883_v49  ;;  %v3853_v55 = vadd.f32 %v9211_v53, %v11314_v52  ;;  %v3702_v57 = vpop.f32.mrb[13].mxu0  ;;  %v11364_v59 = vld [vmem:[#allocation2 + $0x7a] sm:$0xff] }
 0x3c2   : > { %3914 = vst.msk [vmem:[#allocation2 + $0xaa] sm:$0xff] %vm223_vm0, %v3882_v51  ;;  %v3852_v61 = vadd.f32 %v11314_v52, %v3702_v57  ;;  %9256 = vmatprep.mubr.msk.f32.mxu1 %vm223_vm0, %v11364_v59 }
 0x3c3   : > { %v3885_v0 = vmax.f32 %v3853_v55, 0.0  ;;  %9257 = vmatmul.mubr.msk.f32.gmra.mrb[10].mxu1 %vm223_vm0, %v11370_v63 }
 0x3c4   : > { %v3884_v18 = vmax.f32 %v3852_v61, 0.0  ;;  %v9214_v20 = vpop.f32.mrb[14].mxu0  ;;  %v11382_v28 = vld [vmem:[#allocation2 + $0x9a] sm:$0xff] }
 0x3c5   : > { %3917 = vst.msk [vmem:[#allocation2 + $0xca] sm:$0xff] %vm223_vm0, %v3885_v0  ;;  %v3855_v2 = vadd.f32 %v9214_v20, %v11314_v52  ;;  %v3712_v22 = vpop.f32.mrb[15].mxu0  ;;  %v11376_v24 = vld [vmem:[#allocation2 + $0x92] sm:$0xff] }
 0x3c6   : > { %3916 = vst.msk [vmem:[#allocation2 + $0xc2] sm:$0xff] %vm223_vm0, %v3884_v18  ;;  %v3854_v26 = vadd.f32 %v11314_v52, %v3712_v22  ;;  %9259 = vmatprep.mubr.msk.f32.mxu1 %vm223_vm0, %v11376_v24 }
 0x3c7   : > { %v3887_v30 = vmax.f32 %v3855_v2, 0.0  ;;  %9260 = vmatmul.mubr.msk.f32.gmra.mrb[12].mxu1 %vm223_vm0, %v11382_v28 }
 0x3c8   : > { %v3886_v34 = vmax.f32 %v3854_v26, 0.0  ;;  %v9217_v36 = vpop.f32.mrb[16].mxu0  ;;  %v11394_v56 = vld [vmem:[#allocation2 + $0xb2] sm:$0xff] }
 0x3c9   : > { %3919 = vst.msk [vmem:[#allocation2 + $0xe2] sm:$0xff] %vm223_vm0, %v3887_v30  ;;  %v3857_v40 = vadd.f32 %v9217_v36, %v11314_v52  ;;  %v3722_v42 = vpop.f32.mrb[17].mxu0  ;;  %v11388_v46 = vld [vmem:[#allocation2 + $0xaa] sm:$0xff] }
 0x3ca   : > { %3918 = vst.msk [vmem:[#allocation2 + $0xda] sm:$0xff] %vm223_vm0, %v3886_v34  ;;  %v3856_v54 = vadd.f32 %v11314_v52, %v3722_v42  ;;  %9262 = vmatprep.mubr.msk.f32.mxu1 %vm223_vm0, %v11388_v46 }
 0x3cb   : > { %v3889_v58 = vmax.f32 %v3857_v40, 0.0  ;;  %9263 = vmatmul.mubr.msk.f32.gmra.mrb[14].mxu1 %vm223_vm0, %v11394_v56 }
 0x3cc   : > { %v3888_v60 = vmax.f32 %v3856_v54, 0.0  ;;  %v9220_v62 = vpop.f32.mrb[18].mxu0  ;;  %v11406_v38 = vld [vmem:[#allocation2 + $0xca] sm:$0xff] }
 0x3cd   : > { %3921 = vst.msk [vmem:[#allocation2 + $0xfa] sm:$0xff] %vm223_vm0, %v3889_v58  ;;  %v3859_v3 = vadd.f32 %v9220_v62, %v11314_v52  ;;  %v3732_v1 = vpop.f32.mrb[19].mxu0  ;;  %v11400_v5 = vld [vmem:[#allocation2 + $0xc2] sm:$0xff] }
 0x3ce   : > { %3920 = vst.msk [vmem:[#allocation2 + $0xf2] sm:$0xff] %vm223_vm0, %v3888_v60  ;;  %v3858_v6 = vadd.f32 %v11314_v52, %v3732_v1  ;;  %9265 = vmatprep.mubr.msk.f32.mxu1 %vm223_vm0, %v11400_v5 }
 0x3cf   : > { %v3891_v7 = vmax.f32 %v3859_v3, 0.0  ;;  %9266 = vmatmul.mubr.msk.f32.gmra.mrb[16].mxu1 %vm223_vm0, %v11406_v38 }
 0x3d0   : > { %v3890_v8 = vmax.f32 %v3858_v6, 0.0  ;;  %v9223_v10 = vpop.f32.mrb[20].mxu0  ;;  %v11418_v44 = vld [vmem:[#allocation2 + $0xe2] sm:$0xff] }
 0x3d1   : > { %3923 = vst.msk [vmem:[#allocation2 + $0x112] sm:$0xff] %vm223_vm0, %v3891_v7  ;;  %v3861_v9 = vadd.f32 %v9223_v10, %v11314_v52  ;;  %v3742_v13 = vpop.f32.mrb[21].mxu0  ;;  %v11412_v19 = vld [vmem:[#allocation2 + $0xda] sm:$0xff] }
 0x3d2   : > { %3922 = vst.msk [vmem:[#allocation2 + $0x10a] sm:$0xff] %vm223_vm0, %v3890_v8  ;;  %v3860_v4 = vadd.f32 %v11314_v52, %v3742_v13  ;;  %9268 = vmatprep.mubr.msk.f32.mxu1 %vm223_vm0, %v11412_v19  ;;  %v3937_v13 = vld [vmem:[#allocation2 + $0x8] sm:$0xff] }
 0x3d3   : > { %v3893_v50 = vmax.f32 %v3861_v9, 0.0  ;;  %9269 = vmatmul.mubr.msk.f32.gmra.mrb[18].mxu1 %vm223_vm0, %v11418_v44  ;;  %v3936_v9 = vld [vmem:[#allocation2] sm:$0xff] }
 0x3d4   : > { %v3892_v32 = vmax.f32 %v3860_v4, 0.0  ;;  %v9226_v15 = vpop.f32.mrb[22].mxu0  ;;  %v11430_v23 = vld [vmem:[#allocation2 + $0xfa] sm:$0xff] }
 0x3d5   : > { %3925 = vst.msk [vmem:[#allocation2 + $0x12a] sm:$0xff] %vm223_vm0, %v3893_v50  ;;  %v3863_v11 = vadd.f32 %v9226_v15, %v11314_v52  ;;  %v3752_v14 = vpop.f32.mrb[23].mxu0  ;;  %v11424_v16 = vld [vmem:[#allocation2 + $0xf2] sm:$0xff]  ;;  %v11496_v50 = vld [vmem:[%s12242_s3 + $0xc] sm:$0xf] }
 0x3d6   : > { %3924 = vst.msk [vmem:[#allocation2 + $0x122] sm:$0xff] %vm223_vm0, %v3892_v32  ;;  %v3862_v21 = vadd.f32 %v11314_v52, %v3752_v14  ;;  %9271 = vmatprep.mubr.msk.f32.mxu1 %vm223_vm0, %v11424_v16  ;;  %v3938_v4 = vld [vmem:[#allocation2 + $0x18] sm:$0xff]  ;;  %v3939_v32 = vld [vmem:[#allocation2 + $0x20] sm:$0xff]  ;;  %v11505_v15 = vld [vmem:[#allocation2 + $0x30] sm:$0xff] }
 0x3d7   : > { %v3895_v25 = vmax.f32 %v3863_v11, 0.0  ;;  %9272 = vmatmul.mubr.msk.f32.gmra.mrb[20].mxu1 %vm223_vm0, %v11430_v23  ;;  %v11509_v11 = vld [vmem:[#allocation2 + $0x38] sm:$0xff]  ;;  %v11513_v14 = vld [vmem:[#allocation2 + $0x48] sm:$0xff] }
 0x3d8   : > { %v3894_v29 = vmax.f32 %v3862_v21, 0.0  ;;  %v9229_v33 = vpop.f32.mrb[24].mxu0  ;;  %v11442_v45 = vld [vmem:[#allocation2 + $0x112] sm:$0xff]  ;;  %v11521_v21 = vld [vmem:[#allocation2 + $0x60] sm:$0xff] }
 0x3d9   : > { %3927 = vst.msk [vmem:[#allocation2 + $0x142] sm:$0xff] %vm223_vm0, %v3895_v25  ;;  %v3865_v35 = vadd.f32 %v9229_v33, %v11314_v52  ;;  %v3762_v37 = vpop.f32.mrb[25].mxu0  ;;  %v11436_v39 = vld [vmem:[#allocation2 + $0x10a] sm:$0xff]  ;;  %v11533_v33 = vld [vmem:[#allocation2 + $0x80] sm:$0xff] }
 0x3da   : > { %3926 = vst.msk [vmem:[#allocation2 + $0x13a] sm:$0xff] %vm223_vm0, %v3894_v29  ;;  %v3864_v41 = vadd.f32 %v11314_v52, %v3762_v37  ;;  %9274 = vmatprep.mubr.msk.f32.mxu1 %vm223_vm0, %v11436_v39  ;;  %v11525_v25 = vld [vmem:[#allocation2 + $0x68] sm:$0xff]  ;;  %v11529_v29 = vld [vmem:[#allocation2 + $0x78] sm:$0xff] }
 0x3db   : > { %v3897_v49 = vmax.f32 %v3865_v35, 0.0  ;;  %9275 = vmatmul.mubr.msk.f32.gmra.mrb[22].mxu1 %vm223_vm0, %v11442_v45  ;;  %v11537_v35 = vld [vmem:[#allocation2 + $0x90] sm:$0xff]  ;;  %v11541_v37 = vld [vmem:[#allocation2 + $0x98] sm:$0xff] }
 0x3dc   : > { %v3896_v51 = vmax.f32 %v3864_v41, 0.0  ;;  %v9232_v53 = vpop.f32.mrb[26].mxu0  ;;  %v11454_v18 = vld [vmem:[#allocation2 + $0x12a] sm:$0xff] }
 0x3dd   : > { %3929 = vst.msk [vmem:[#allocation2 + $0x15a] sm:$0xff] %vm223_vm0, %v3897_v49  ;;  %v3867_v55 = vadd.f32 %v9232_v53, %v11314_v52  ;;  %v3772_v57 = vpop.f32.mrb[27].mxu0  ;;  %v11448_v61 = vld [vmem:[#allocation2 + $0x122] sm:$0xff]  ;;  %v11549_v49 = vld [vmem:[#allocation2 + $0xb0] sm:$0xff] }
 0x3de   : > { %3928 = vst.msk [vmem:[#allocation2 + $0x152] sm:$0xff] %vm223_vm0, %v3896_v51  ;;  %v3866_v0 = vadd.f32 %v11314_v52, %v3772_v57  ;;  %9277 = vmatprep.mubr.msk.f32.mxu1 %vm223_vm0, %v11448_v61  ;;  %v11545_v41 = vld [vmem:[#allocation2 + $0xa8] sm:$0xff]  ;;  %v11553_v51 = vld [vmem:[#allocation2 + $0xc0] sm:$0xff] }
 0x3df   : > { %v3899_v20 = vmax.f32 %v3867_v55, 0.0  ;;  %9278 = vmatmul.mubr.msk.f32.gmra.mrb[24].mxu1 %vm223_vm0, %v11454_v18  ;;  %v11557_v53 = vld [vmem:[#allocation2 + $0xc8] sm:$0xff]  ;;  %v11561_v55 = vld [vmem:[#allocation2 + $0xd8] sm:$0xff]  ;;  %v11565_v57 = vld [vmem:[#allocation2 + $0xe0] sm:$0xff] }
 0x3e0   : > { %v3898_v2 = vmax.f32 %v3866_v0, 0.0  ;;  %v9235_v22 = vpop.f32.mrb[28].mxu0  ;;  %v11466_v40 = vld [vmem:[#allocation2 + $0x142] sm:$0xff]  ;;  %v11569_v0 = vld [vmem:[#allocation2 + $0xf0] sm:$0xff] }
 0x3e1   : > { %3931 = vst.msk [vmem:[#allocation2 + $0x172] sm:$0xff] %vm223_vm0, %v3899_v20  ;;  %v3869_v26 = vadd.f32 %v9235_v22, %v11314_v52  ;;  %v3782_v30 = vpop.f32.mrb[29].mxu0  ;;  %v11460_v34 = vld [vmem:[#allocation2 + $0x13a] sm:$0xff]  ;;  %v11581_v22 = vld [vmem:[#allocation2 + $0x110] sm:$0xff] }
 0x3e2   : > { %3930 = vst.msk [vmem:[#allocation2 + $0x16a] sm:$0xff] %vm223_vm0, %v3898_v2  ;;  %v3868_v36 = vadd.f32 %v11314_v52, %v3782_v30  ;;  %9280 = vmatprep.mubr.msk.f32.mxu1 %vm223_vm0, %v11460_v34  ;;  %v11573_v20 = vld [vmem:[#allocation2 + $0xf8] sm:$0xff]  ;;  %v11577_v2 = vld [vmem:[#allocation2 + $0x108] sm:$0xff] }
 0x3e3   : > { %v3901_v42 = vmax.f32 %v3869_v26, 0.0  ;;  %9281 = vmatmul.mubr.msk.f32.gmra.mrb[26].mxu1 %vm223_vm0, %v11466_v40  ;;  %v11585_v26 = vld [vmem:[#allocation2 + $0x120] sm:$0xff]  ;;  %v11589_v30 = vld [vmem:[#allocation2 + $0x128] sm:$0xff] }
 0x3e4   : > { %v3900_v54 = vmax.f32 %v3868_v36, 0.0  ;;  %v9238_v58 = vpop.f32.mrb[30].mxu0  ;;  %v11478_v6 = vld [vmem:[#allocation2 + $0x15a] sm:$0xff] }
 0x3e5   : > { %3933 = vst.msk [vmem:[#allocation2 + $0x18a] sm:$0xff] %vm223_vm0, %v3901_v42  ;;  %v3871_v60 = vadd.f32 %v9238_v58, %v11314_v52  ;;  %v3792_v62 = vpop.f32.mrb[31].mxu0  ;;  %v11472_v3 = vld [vmem:[#allocation2 + $0x152] sm:$0xff]  ;;  %v11597_v42 = vld [vmem:[#allocation2 + $0x140] sm:$0xff] }
 0x3e6   : > { %3932 = vst.msk [vmem:[#allocation2 + $0x182] sm:$0xff] %vm223_vm0, %v3900_v54  ;;  %v3870_v1 = vadd.f32 %v11314_v52, %v3792_v62  ;;  %9283 = vmatprep.mubr.msk.f32.mxu1 %vm223_vm0, %v11472_v3  ;;  %v11593_v36 = vld [vmem:[#allocation2 + $0x138] sm:$0xff]  ;;  %v11601_v54 = vld [vmem:[#allocation2 + $0x150] sm:$0xff]  ;;  %v4651_v62 = vld [vmem:[#allocation2 + $0x4] sm:$0xff] }
 0x3e7   : > { %v3903_v7 = vmax.f32 %v3871_v60, 0.0  ;;  %9284 = vmatmul.mubr.msk.f32.gmra.mrb[28].mxu1 %vm223_vm0, %v11478_v6  ;;  %v11605_v58 = vld [vmem:[#allocation2 + $0x158] sm:$0xff] }
 0x3e8   : > { %v3902_v8 = vmax.f32 %v3870_v1, 0.0  ;;  %v11488_v52 = vld [vmem:[#allocation2 + $0x172] sm:$0xff] }
 0x3e9   : > { %3935 = vst.msk [vmem:[#allocation2 + $0x1a2] sm:$0xff] %vm223_vm0, %v3903_v7  ;;  %v11483_v10 = vld [vmem:[#allocation2 + $0x16a] sm:$0xff] }
 0x3ea   : > { %3934 = vst.msk [vmem:[#allocation2 + $0x19a] sm:$0xff] %vm223_vm0, %v3902_v8  ;;  %9286 = vmatprep.mubr.msk.f32.mxu1 %vm223_vm0, %v11483_v10  ;;  %v11609_v60 = vld [vmem:[#allocation2 + $0x168] sm:$0xff]  ;;  %v11613_v1 = vld [vmem:[#allocation2 + $0x170] sm:$0xff]  ;;  %v4653_v8 = vld [vmem:[#allocation2 + $0x1c] sm:$0xff] }
 0x3eb   : > { %9287 = vmatmul.mubr.msk.f32.gmra.mrb[30].mxu1 %vm223_vm0, %v11488_v52  ;;  %v4652_v7 = vld [vmem:[#allocation2 + $0xc] sm:$0xff] }
 0x3ec   : > { %9291 = vmatprep.mubr.msk.f32.mxu1 %vm223_vm0, %v3936_v9  ;;  %v11621_v9 = vld [vmem:[%s12242_s3 + $0x10] sm:$0xf] }
 0x3ef   : > { %9292 = vmatmul.mubr.msk.f32.vlgmr.msra.gmra.mrb[0].mxu1 %vm223_vm0, %v3937_v13  ;;  %v4654_v13 = vld [vmem:[#allocation2 + $0x24] sm:$0xff] }
 0x3f0   : > { %9340 = vmatpush3.msk.msra.mxu1 %vm549_vm2, %v11307_v48  ;;  %9294 = vmatprep.mubr.msk.f32.mxu1 %vm223_vm0, %v3938_v4  ;;  %v11517_v48 = vld [vmem:[#allocation2 + $0x50] sm:$0xff] }
 0x3f1   : > { %9389 = vmatprep.subr.msk.mxu1 %vm549_vm2, %v11496_v50  ;;  %v11630_v4 = vld [vmem:[#allocation2 + $0x34] sm:$0xff] }
 0x3f3   : > { %9295 = vmatmul.mubr.msk.f32.gmra.mrb[2].mxu1 %vm223_vm0, %v3939_v32  ;;  %v11634_v32 = vld [vmem:[#allocation2 + $0x3c] sm:$0xff] }
 0x3f4   : > { %9297 = vmatprep.mubr.msk.f32.mxu1 %vm223_vm0, %v11505_v15 }
 0x3f7   : > { %9298 = vmatmul.mubr.msk.f32.gmra.mrb[4].mxu1 %vm223_vm0, %v11509_v11 }
 0x3f8   : > { %9300 = vmatprep.mubr.msk.f32.mxu1 %vm223_vm0, %v11513_v14 }
 0x3fb   : > { %9301 = vmatmul.mubr.msk.f32.gmra.mrb[6].mxu1 %vm223_vm0, %v11517_v48 }
 0x3fc   : > { %9303 = vmatprep.mubr.msk.f32.mxu1 %vm223_vm0, %v11521_v21 }
 0x3ff   : > { %9304 = vmatmul.mubr.msk.f32.gmra.mrb[8].mxu1 %vm223_vm0, %v11525_v25 }
 0x400   : > { %9306 = vmatprep.mubr.msk.f32.mxu1 %vm223_vm0, %v11529_v29 }
 0x403   : > { %9307 = vmatmul.mubr.msk.f32.gmra.mrb[10].mxu1 %vm223_vm0, %v11533_v33 }
 0x404   : > { %9309 = vmatprep.mubr.msk.f32.mxu1 %vm223_vm0, %v11537_v35 }
 0x407   : > { %9310 = vmatmul.mubr.msk.f32.gmra.mrb[12].mxu1 %vm223_vm0, %v11541_v37 }
 0x408   : > { %9312 = vmatprep.mubr.msk.f32.mxu1 %vm223_vm0, %v11545_v41 }
 0x40b   : > { %9313 = vmatmul.mubr.msk.f32.gmra.mrb[14].mxu1 %vm223_vm0, %v11549_v49 }
 0x40c   : > { %9315 = vmatprep.mubr.msk.f32.mxu1 %vm223_vm0, %v11553_v51 }
 0x40f   : > { %9316 = vmatmul.mubr.msk.f32.gmra.mrb[16].mxu1 %vm223_vm0, %v11557_v53 }
 0x410   : > { %9318 = vmatprep.mubr.msk.f32.mxu1 %vm223_vm0, %v11561_v55 }
 0x413   : > { %9319 = vmatmul.mubr.msk.f32.gmra.mrb[18].mxu1 %vm223_vm0, %v11565_v57 }
 0x414   : > { %9321 = vmatprep.mubr.msk.f32.mxu1 %vm223_vm0, %v11569_v0 }
 0x417   : > { %9322 = vmatmul.mubr.msk.f32.gmra.mrb[20].mxu1 %vm223_vm0, %v11573_v20 }
 0x418   : > { %9324 = vmatprep.mubr.msk.f32.mxu1 %vm223_vm0, %v11577_v2 }
 0x41b   : > { %9325 = vmatmul.mubr.msk.f32.gmra.mrb[22].mxu1 %vm223_vm0, %v11581_v22 }
 0x41c   : > { %9327 = vmatprep.mubr.msk.f32.mxu1 %vm223_vm0, %v11585_v26 }
 0x41f   : > { %9328 = vmatmul.mubr.msk.f32.gmra.mrb[24].mxu1 %vm223_vm0, %v11589_v30 }
 0x420   : > { %9330 = vmatprep.mubr.msk.f32.mxu1 %vm223_vm0, %v11593_v36 }
 0x423   : > { %9331 = vmatmul.mubr.msk.f32.gmra.mrb[26].mxu1 %vm223_vm0, %v11597_v42 }
 0x424   : > { %9333 = vmatprep.mubr.msk.f32.mxu1 %vm223_vm0, %v11601_v54 }
 0x427   : > { %9334 = vmatmul.mubr.msk.f32.gmra.mrb[28].mxu1 %vm223_vm0, %v11605_v58 }
 0x428   : > { %9336 = vmatprep.mubr.msk.f32.mxu1 %vm223_vm0, %v11609_v60 }
 0x42b   : > { %9337 = vmatmul.mubr.msk.f32.gmra.mrb[30].mxu1 %vm223_vm0, %v11613_v1 }
 0x42c   : > { %9341 = vmatprep.mubr.msk.f32.mxu1 %vm223_vm0, %v4651_v62  ;;  %v11638_v62 = vld [vmem:[#allocation2 + $0x4c] sm:$0xff] }
 0x42d   : > { %12413 = vst [vmem:[#allocation8_spill] sm:$0xff] %v11638_v62 }
 0x42f   : > { %9342 = vmatmul.mubr.msk.f32.vlgmr.msra.gmra.mrb[0].mxu1 %vm223_vm0, %v4652_v7  ;;  %v11646_v7 = vld [vmem:[#allocation2 + $0x64] sm:$0xff] }
 0x430   : > { %9390 = vmatpush3.msk.msra.mxu1 %vm549_vm2, %v11496_v50  ;;  %9344 = vmatprep.mubr.msk.f32.mxu1 %vm223_vm0, %v4653_v8  ;;  %v11642_v50 = vld [vmem:[#allocation2 + $0x54] sm:$0xff]  ;;  %12415 = vst [vmem:[#allocation22_spill] sm:$0xff] %v11646_v7  ;;  %v11650_v8 = vld [vmem:[#allocation2 + $0x6c] sm:$0xff] }
 0x431   : > { %9439 = vmatprep.subr.msk.mxu1 %vm549_vm2, %v11621_v9  ;;  %12414 = vst [vmem:[#allocation20_spill] sm:$0xff] %v11642_v50  ;;  %12416 = vst [vmem:[#allocation23_spill] sm:$0xff] %v11650_v8 }
 0x433   : > { %9345 = vmatmul.mubr.msk.f32.gmra.mrb[2].mxu1 %vm223_vm0, %v4654_v13  ;;  %v11654_v13 = vld [vmem:[#allocation2 + $0x7c] sm:$0xff] }
 0x434   : > { %9347 = vmatprep.mubr.msk.f32.mxu1 %vm223_vm0, %v11630_v4  ;;  %12417 = vst [vmem:[#allocation24_spill] sm:$0xff] %v11654_v13 }
 0x437   : > { %9348 = vmatmul.mubr.msk.f32.gmra.mrb[4].mxu1 %vm223_vm0, %v11634_v32 }
 0x438   : > { %9350 = vmatprep.mubr.msk.f32.mxu1 %vm223_vm0, %v11638_v62  ;;  %v11658_v62 = vld [vmem:[#allocation2 + $0x84] sm:$0xff] }
 0x439   : > { %12418 = vst [vmem:[#allocation26_spill] sm:$0xff] %v11658_v62 }
 0x43b   : > { %9351 = vmatmul.mubr.msk.f32.gmra.mrb[6].mxu1 %vm223_vm0, %v11642_v50  ;;  %v11662_v50 = vld [vmem:[#allocation2 + $0x94] sm:$0xff] }
 0x43c   : > { %9353 = vmatprep.mubr.msk.f32.mxu1 %vm223_vm0, %v11646_v7  ;;  %12419 = vst [vmem:[#allocation6_spill] sm:$0xff] %v11662_v50  ;;  %v11666_v7 = vld [vmem:[#allocation2 + $0x9c] sm:$0xff] }
 0x43d   : > { %12420 = vst [vmem:[#allocation30_spill] sm:$0xff] %v11666_v7 }
 0x43f   : > { %9354 = vmatmul.mubr.msk.f32.gmra.mrb[8].mxu1 %vm223_vm0, %v11650_v8  ;;  %v11670_v8 = vld [vmem:[#allocation2 + $0xac] sm:$0xff] }
 0x440   : > { %9356 = vmatprep.mubr.msk.f32.mxu1 %vm223_vm0, %v11654_v13  ;;  %12421 = vst [vmem:[#allocation31_spill] sm:$0xff] %v11670_v8  ;;  %v11674_v13 = vld [vmem:[#allocation2 + $0xb4] sm:$0xff] }
 0x441   : > { %12422 = vst [vmem:[#allocation32_spill] sm:$0xff] %v11674_v13 }
 0x443   : > { %9357 = vmatmul.mubr.msk.f32.gmra.mrb[10].mxu1 %vm223_vm0, %v11658_v62  ;;  %v11678_v62 = vld [vmem:[#allocation2 + $0xc4] sm:$0xff] }
 0x444   : > { %9359 = vmatprep.mubr.msk.f32.mxu1 %vm223_vm0, %v11662_v50  ;;  %12423 = vst [vmem:[#allocation33_spill] sm:$0xff] %v11678_v62  ;;  %v11682_v50 = vld [vmem:[#allocation2 + $0xcc] sm:$0xff] }
 0x445   : > { %12424 = vst [vmem:[#allocation9_spill] sm:$0xff] %v11682_v50 }
 0x447   : > { %9360 = vmatmul.mubr.msk.f32.gmra.mrb[12].mxu1 %vm223_vm0, %v11666_v7  ;;  %v11686_v7 = vld [vmem:[#allocation2 + $0xdc] sm:$0xff] }
 0x448   : > { %9362 = vmatprep.mubr.msk.f32.mxu1 %vm223_vm0, %v11670_v8  ;;  %12425 = vst [vmem:[#allocation10_spill] sm:$0xff] %v11686_v7  ;;  %v11690_v8 = vld [vmem:[#allocation2 + $0xe4] sm:$0xff] }
 0x449   : > { %12426 = vst [vmem:[#allocation11_spill] sm:$0xff] %v11690_v8 }
 0x44b   : > { %9363 = vmatmul.mubr.msk.f32.gmra.mrb[14].mxu1 %vm223_vm0, %v11674_v13  ;;  %v11694_v13 = vld [vmem:[#allocation2 + $0xf4] sm:$0xff] }
 0x44c   : > { %9365 = vmatprep.mubr.msk.f32.mxu1 %vm223_vm0, %v11678_v62  ;;  %12427 = vst [vmem:[#allocation12_spill] sm:$0xff] %v11694_v13  ;;  %v11698_v62 = vld [vmem:[#allocation2 + $0xfc] sm:$0xff] }
 0x44d   : > { %12428 = vst [vmem:[#allocation13_spill] sm:$0xff] %v11698_v62 }
 0x44f   : > { %9366 = vmatmul.mubr.msk.f32.gmra.mrb[16].mxu1 %vm223_vm0, %v11682_v50  ;;  %v11702_v50 = vld [vmem:[#allocation2 + $0x10c] sm:$0xff] }
 0x450   : > { %9368 = vmatprep.mubr.msk.f32.mxu1 %vm223_vm0, %v11686_v7  ;;  %12429 = vst [vmem:[#allocation14_spill] sm:$0xff] %v11702_v50  ;;  %v11706_v7 = vld [vmem:[#allocation2 + $0x114] sm:$0xff] }
 0x451   : > { %12430 = vst [vmem:[#allocation15_spill] sm:$0xff] %v11706_v7 }
 0x453   : > { %9369 = vmatmul.mubr.msk.f32.gmra.mrb[18].mxu1 %vm223_vm0, %v11690_v8  ;;  %v11710_v8 = vld [vmem:[#allocation2 + $0x124] sm:$0xff] }
 0x454   : > { %9371 = vmatprep.mubr.msk.f32.mxu1 %vm223_vm0, %v11694_v13  ;;  %12431 = vst [vmem:[#allocation16_spill] sm:$0xff] %v11710_v8  ;;  %v11714_v13 = vld [vmem:[#allocation2 + $0x12c] sm:$0xff] }
 0x455   : > { %12432 = vst [vmem:[#allocation17_spill] sm:$0xff] %v11714_v13 }
 0x457   : > { %9372 = vmatmul.mubr.msk.f32.gmra.mrb[20].mxu1 %vm223_vm0, %v11698_v62  ;;  %v11718_v62 = vld [vmem:[#allocation2 + $0x13c] sm:$0xff] }
 0x458   : > { %9374 = vmatprep.mubr.msk.f32.mxu1 %vm223_vm0, %v11702_v50  ;;  %12433 = vst [vmem:[#allocation18_spill] sm:$0xff] %v11718_v62  ;;  %v11722_v50 = vld [vmem:[#allocation2 + $0x144] sm:$0xff] }
 0x45b   : > { %9375 = vmatmul.mubr.msk.f32.gmra.mrb[22].mxu1 %vm223_vm0, %v11706_v7  ;;  %v11726_v7 = vld [vmem:[#allocation2 + $0x154] sm:$0xff] }
 0x45c   : > { %9377 = vmatprep.mubr.msk.f32.mxu1 %vm223_vm0, %v11710_v8  ;;  %12434 = vst [vmem:[#allocation19_spill] sm:$0xff] %v11726_v7  ;;  %v11730_v8 = vld [vmem:[#allocation2 + $0x15c] sm:$0xff] }
 0x45d   : > { %12435 = vst [vmem:[#allocation21_spill] sm:$0xff] %v11730_v8 }
 0x45f   : > { %9378 = vmatmul.mubr.msk.f32.gmra.mrb[24].mxu1 %vm223_vm0, %v11714_v13  ;;  %v11734_v13 = vld [vmem:[#allocation2 + $0x16c] sm:$0xff] }
 0x460   : > { %9380 = vmatprep.mubr.msk.f32.mxu1 %vm223_vm0, %v11718_v62  ;;  %v11738_v62 = vld [vmem:[#allocation2 + $0x174] sm:$0xff] }
 0x463   : > { %9381 = vmatmul.mubr.msk.f32.gmra.mrb[26].mxu1 %vm223_vm0, %v11722_v50 }
 0x464   : > { %9383 = vmatprep.mubr.msk.f32.mxu1 %vm223_vm0, %v11726_v7  ;;  %v8051_v7 = vld [vmem:[%s12242_s3 + $0x14] sm:$0xf] }
 0x467   : > { %9384 = vmatmul.mubr.msk.f32.gmra.mrb[28].mxu1 %vm223_vm0, %v11730_v8 }
 0x468   : > { %9386 = vmatprep.mubr.msk.f32.mxu1 %vm223_vm0, %v11734_v13 }
 0x46b   : > { %9387 = vmatmul.mubr.msk.f32.gmra.mrb[30].mxu1 %vm223_vm0, %v11738_v62 }
 0x46c   : > { %9391 = vmatprep.mubr.msk.f32.mxu1 %vm223_vm0, %v11505_v15  ;;  %v11804_v15 = vld [vmem:[#allocation2 + $0x180] sm:$0xff] }
 0x46f   : > { %9392 = vmatmul.mubr.msk.f32.vlgmr.msra.gmra.mrb[0].mxu1 %vm223_vm0, %v11509_v11  ;;  %v11808_v11 = vld [vmem:[#allocation2 + $0x188] sm:$0xff] }
 0x470   : > { %9440 = vmatpush3.msk.msra.mxu1 %vm549_vm2, %v11621_v9  ;;  %9394 = vmatprep.mubr.msk.f32.mxu1 %vm223_vm0, %v11513_v14  ;;  %v11812_v14 = vld [vmem:[#allocation2 + $0x198] sm:$0xff] }
 0x471   : > { %9489 = vmatprep.subr.msk.mxu1 %vm549_vm2, %v8051_v7  ;;  %v8085_v9 = vld [vmem:[%s12242_s3 + $0x18] sm:$0xf] }
 0x473   : > { %9395 = vmatmul.mubr.msk.f32.gmra.mrb[2].mxu1 %vm223_vm0, %v11517_v48  ;;  %v11816_v48 = vld [vmem:[#allocation2 + $0x1a0] sm:$0xff] }
 0x474   : > { %9397 = vmatprep.mubr.msk.f32.mxu1 %vm223_vm0, %v11521_v21 }
 0x477   : > { %9398 = vmatmul.mubr.msk.f32.gmra.mrb[4].mxu1 %vm223_vm0, %v11525_v25 }
 0x478   : > { %9400 = vmatprep.mubr.msk.f32.mxu1 %vm223_vm0, %v11529_v29 }
 0x47b   : > { %9401 = vmatmul.mubr.msk.f32.gmra.mrb[6].mxu1 %vm223_vm0, %v11533_v33 }
 0x47c   : > { %9403 = vmatprep.mubr.msk.f32.mxu1 %vm223_vm0, %v11537_v35 }
 0x47f   : > { %9404 = vmatmul.mubr.msk.f32.gmra.mrb[8].mxu1 %vm223_vm0, %v11541_v37 }
 0x480   : > { %9406 = vmatprep.mubr.msk.f32.mxu1 %vm223_vm0, %v11545_v41 }
 0x483   : > { %9407 = vmatmul.mubr.msk.f32.gmra.mrb[10].mxu1 %vm223_vm0, %v11549_v49 }
 0x484   : > { %9409 = vmatprep.mubr.msk.f32.mxu1 %vm223_vm0, %v11553_v51 }
 0x487   : > { %9410 = vmatmul.mubr.msk.f32.gmra.mrb[12].mxu1 %vm223_vm0, %v11557_v53 }
 0x488   : > { %9412 = vmatprep.mubr.msk.f32.mxu1 %vm223_vm0, %v11561_v55 }
 0x48b   : > { %9413 = vmatmul.mubr.msk.f32.gmra.mrb[14].mxu1 %vm223_vm0, %v11565_v57 }
 0x48c   : > { %9415 = vmatprep.mubr.msk.f32.mxu1 %vm223_vm0, %v11569_v0 }
 0x48f   : > { %9416 = vmatmul.mubr.msk.f32.gmra.mrb[16].mxu1 %vm223_vm0, %v11573_v20 }
 0x490   : > { %9418 = vmatprep.mubr.msk.f32.mxu1 %vm223_vm0, %v11577_v2 }
 0x493   : > { %9419 = vmatmul.mubr.msk.f32.gmra.mrb[18].mxu1 %vm223_vm0, %v11581_v22 }
 0x494   : > { %9421 = vmatprep.mubr.msk.f32.mxu1 %vm223_vm0, %v11585_v26 }
 0x497   : > { %9422 = vmatmul.mubr.msk.f32.gmra.mrb[20].mxu1 %vm223_vm0, %v11589_v30 }
 0x498   : > { %9424 = vmatprep.mubr.msk.f32.mxu1 %vm223_vm0, %v11593_v36 }
 0x49b   : > { %9425 = vmatmul.mubr.msk.f32.gmra.mrb[22].mxu1 %vm223_vm0, %v11597_v42 }
 0x49c   : > { %9427 = vmatprep.mubr.msk.f32.mxu1 %vm223_vm0, %v11601_v54 }
 0x49f   : > { %9428 = vmatmul.mubr.msk.f32.gmra.mrb[24].mxu1 %vm223_vm0, %v11605_v58 }
 0x4a0   : > { %9430 = vmatprep.mubr.msk.f32.mxu1 %vm223_vm0, %v11609_v60 }
 0x4a3   : > { %9431 = vmatmul.mubr.msk.f32.gmra.mrb[26].mxu1 %vm223_vm0, %v11613_v1 }
 0x4a4   : > { %9433 = vmatprep.mubr.msk.f32.mxu1 %vm223_vm0, %v11804_v15 }
 0x4a7   : > { %9434 = vmatmul.mubr.msk.f32.gmra.mrb[28].mxu1 %vm223_vm0, %v11808_v11 }
 0x4a8   : > { %9436 = vmatprep.mubr.msk.f32.mxu1 %vm223_vm0, %v11812_v14 }
 0x4ab   : > { %9437 = vmatmul.mubr.msk.f32.gmra.mrb[30].mxu1 %vm223_vm0, %v11816_v48 }
 0x4ac   : > { %9441 = vmatprep.mubr.msk.f32.mxu1 %vm223_vm0, %v11328_v17  ;;  %v11881_v17 = vld [vmem:[#allocation2 + $0x182] sm:$0xff] }
 0x4af   : > { %9442 = vmatmul.mubr.msk.f32.vlgmr.msra.gmra.mrb[0].mxu1 %vm223_vm0, %v11334_v12  ;;  %v11885_v12 = vld [vmem:[#allocation2 + $0x18a] sm:$0xff] }
 0x4b0   : > { %9490 = vmatpush3.msk.msra.mxu1 %vm549_vm2, %v8051_v7  ;;  %9444 = vmatprep.mubr.msk.f32.mxu1 %vm223_vm0, %v11340_v27  ;;  %v11889_v27 = vld [vmem:[#allocation2 + $0x19a] sm:$0xff]  ;;  %v12443_v7 = vld [vmem:[#allocation30_spill] sm:$0xff] }
 0x4b1   : > { %9539 = vmatprep.subr.msk.mxu1 %vm549_vm2, %v8085_v9 }
 0x4b3   : > { %9445 = vmatmul.mubr.msk.f32.gmra.mrb[2].mxu1 %vm223_vm0, %v11346_v31  ;;  %v11893_v31 = vld [vmem:[#allocation2 + $0x1a2] sm:$0xff] }
 0x4b4   : > { %9447 = vmatprep.mubr.msk.f32.mxu1 %vm223_vm0, %v11352_v43  ;;  %v8119_v43 = vld [vmem:[%s12242_s3 + $0x1c] sm:$0xf] }
 0x4b7   : > { %9448 = vmatmul.mubr.msk.f32.gmra.mrb[4].mxu1 %vm223_vm0, %v11358_v47  ;;  %v12436_v47 = vld [vmem:[#allocation8_spill] sm:$0xff] }
 0x4b8   : > { %9450 = vmatprep.mubr.msk.f32.mxu1 %vm223_vm0, %v11364_v59  ;;  %v12437_v59 = vld [vmem:[#allocation20_spill] sm:$0xff] }
 0x4bb   : > { %9451 = vmatmul.mubr.msk.f32.gmra.mrb[6].mxu1 %vm223_vm0, %v11370_v63  ;;  %v12438_v63 = vld [vmem:[#allocation22_spill] sm:$0xff] }
 0x4bc   : > { %9453 = vmatprep.mubr.msk.f32.mxu1 %vm223_vm0, %v11376_v24  ;;  %v12439_v24 = vld [vmem:[#allocation23_spill] sm:$0xff] }
 0x4bf   : > { %9454 = vmatmul.mubr.msk.f32.gmra.mrb[8].mxu1 %vm223_vm0, %v11382_v28  ;;  %v12440_v28 = vld [vmem:[#allocation24_spill] sm:$0xff] }
 0x4c0   : > { %9456 = vmatprep.mubr.msk.f32.mxu1 %vm223_vm0, %v11388_v46 }
 0x4c3   : > { %9457 = vmatmul.mubr.msk.f32.gmra.mrb[10].mxu1 %vm223_vm0, %v11394_v56 }
 0x4c4   : > { %9459 = vmatprep.mubr.msk.f32.mxu1 %vm223_vm0, %v11400_v5 }
 0x4c7   : > { %9460 = vmatmul.mubr.msk.f32.gmra.mrb[12].mxu1 %vm223_vm0, %v11406_v38 }
 0x4c8   : > { %9462 = vmatprep.mubr.msk.f32.mxu1 %vm223_vm0, %v11412_v19 }
 0x4cb   : > { %9463 = vmatmul.mubr.msk.f32.gmra.mrb[14].mxu1 %vm223_vm0, %v11418_v44 }
 0x4cc   : > { %9465 = vmatprep.mubr.msk.f32.mxu1 %vm223_vm0, %v11424_v16 }
 0x4cf   : > { %9466 = vmatmul.mubr.msk.f32.gmra.mrb[16].mxu1 %vm223_vm0, %v11430_v23 }
 0x4d0   : > { %9468 = vmatprep.mubr.msk.f32.mxu1 %vm223_vm0, %v11436_v39 }
 0x4d3   : > { %9469 = vmatmul.mubr.msk.f32.gmra.mrb[18].mxu1 %vm223_vm0, %v11442_v45 }
 0x4d4   : > { %9471 = vmatprep.mubr.msk.f32.mxu1 %vm223_vm0, %v11448_v61 }
 0x4d7   : > { %9472 = vmatmul.mubr.msk.f32.gmra.mrb[20].mxu1 %vm223_vm0, %v11454_v18 }
 0x4d8   : > { %9474 = vmatprep.mubr.msk.f32.mxu1 %vm223_vm0, %v11460_v34 }
 0x4db   : > { %9475 = vmatmul.mubr.msk.f32.gmra.mrb[22].mxu1 %vm223_vm0, %v11466_v40 }
 0x4dc   : > { %9477 = vmatprep.mubr.msk.f32.mxu1 %vm223_vm0, %v11472_v3 }
 0x4df   : > { %9478 = vmatmul.mubr.msk.f32.gmra.mrb[24].mxu1 %vm223_vm0, %v11478_v6 }
 0x4e0   : > { %9480 = vmatprep.mubr.msk.f32.mxu1 %vm223_vm0, %v11483_v10 }
 0x4e3   : > { %9481 = vmatmul.mubr.msk.f32.gmra.mrb[26].mxu1 %vm223_vm0, %v11488_v52 }
 0x4e4   : > { %9483 = vmatprep.mubr.msk.f32.mxu1 %vm223_vm0, %v11881_v17 }
 0x4e7   : > { %9484 = vmatmul.mubr.msk.f32.gmra.mrb[28].mxu1 %vm223_vm0, %v11885_v12 }
 0x4e8   : > { %9486 = vmatprep.mubr.msk.f32.mxu1 %vm223_vm0, %v11889_v27 }
 0x4eb   : > { %9487 = vmatmul.mubr.msk.f32.gmra.mrb[30].mxu1 %vm223_vm0, %v11893_v31 }
 0x4ec   : > { %9491 = vmatprep.mubr.msk.f32.mxu1 %vm223_vm0, %v11630_v4  ;;  %v12441_v4 = vld [vmem:[#allocation26_spill] sm:$0xff] }
 0x4ef   : > { %9492 = vmatmul.mubr.msk.f32.vlgmr.msra.gmra.mrb[0].mxu1 %vm223_vm0, %v11634_v32  ;;  %v12442_v32 = vld [vmem:[#allocation6_spill] sm:$0xff] }
 0x4f0   : > { %9540 = vmatpush3.msk.msra.mxu1 %vm549_vm2, %v8085_v9  ;;  %9494 = vmatprep.mubr.msk.f32.mxu1 %vm223_vm0, %v12436_v47  ;;  %v12444_v9 = vld [vmem:[#allocation31_spill] sm:$0xff]  ;;  %v12445_v47 = vld [vmem:[#allocation32_spill] sm:$0xff] }
 0x4f1   : > { %9589 = vmatprep.subr.msk.mxu1 %vm549_vm2, %v8119_v43 }
 0x4f3   : > { %9495 = vmatmul.mubr.msk.f32.gmra.mrb[2].mxu1 %vm223_vm0, %v12437_v59  ;;  %v12446_v59 = vld [vmem:[#allocation33_spill] sm:$0xff] }
 0x4f4   : > { %9497 = vmatprep.mubr.msk.f32.mxu1 %vm223_vm0, %v12438_v63 }
 0x4f7   : > { %9498 = vmatmul.mubr.msk.f32.gmra.mrb[4].mxu1 %vm223_vm0, %v12439_v24  ;;  %v12447_v24 = vld [vmem:[#allocation9_spill] sm:$0xff] }
 0x4f8   : > { %9500 = vmatprep.mubr.msk.f32.mxu1 %vm223_vm0, %v12440_v28  ;;  %v12448_v28 = vld [vmem:[#allocation10_spill] sm:$0xff] }
 0x4fb   : > { %9501 = vmatmul.mubr.msk.f32.gmra.mrb[6].mxu1 %vm223_vm0, %v12441_v4  ;;  %v12449_v4 = vld [vmem:[#allocation11_spill] sm:$0xff] }
 0x4fc   : > { %9503 = vmatprep.mubr.msk.f32.mxu1 %vm223_vm0, %v12442_v32  ;;  %v12450_v32 = vld [vmem:[#allocation12_spill] sm:$0xff] }
 0x4ff   : > { %9504 = vmatmul.mubr.msk.f32.gmra.mrb[8].mxu1 %vm223_vm0, %v12443_v7  ;;  %v12451_v7 = vld [vmem:[#allocation13_spill] sm:$0xff] }
 0x500   : > { %9506 = vmatprep.mubr.msk.f32.mxu1 %vm223_vm0, %v12444_v9  ;;  %v12452_v9 = vld [vmem:[#allocation14_spill] sm:$0xff] }
 0x503   : > { %9507 = vmatmul.mubr.msk.f32.gmra.mrb[10].mxu1 %vm223_vm0, %v12445_v47  ;;  %v12453_v47 = vld [vmem:[#allocation15_spill] sm:$0xff] }
 0x504   : > { %9509 = vmatprep.mubr.msk.f32.mxu1 %vm223_vm0, %v12446_v59  ;;  %v12454_v59 = vld [vmem:[#allocation16_spill] sm:$0xff] }
 0x507   : > { %9510 = vmatmul.mubr.msk.f32.gmra.mrb[12].mxu1 %vm223_vm0, %v12447_v24  ;;  %v12455_v24 = vld [vmem:[#allocation17_spill] sm:$0xff] }
 0x508   : > { %9512 = vmatprep.mubr.msk.f32.mxu1 %vm223_vm0, %v12448_v28  ;;  %v12456_v28 = vld [vmem:[#allocation18_spill] sm:$0xff] }
 0x50b   : > { %9513 = vmatmul.mubr.msk.f32.gmra.mrb[14].mxu1 %vm223_vm0, %v12449_v4 }
 0x50c   : > { %9515 = vmatprep.mubr.msk.f32.mxu1 %vm223_vm0, %v12450_v32  ;;  %v12457_v32 = vld [vmem:[#allocation19_spill] sm:$0xff] }
 0x50f   : > { %9516 = vmatmul.mubr.msk.f32.gmra.mrb[16].mxu1 %vm223_vm0, %v12451_v7 }
 0x510   : > { %9518 = vmatprep.mubr.msk.f32.mxu1 %vm223_vm0, %v12452_v9 }
 0x513   : > { %9519 = vmatmul.mubr.msk.f32.gmra.mrb[18].mxu1 %vm223_vm0, %v12453_v47 }
 0x514   : > { %9521 = vmatprep.mubr.msk.f32.mxu1 %vm223_vm0, %v12454_v59  ;;  %v11958_v59 = vld [vmem:[#allocation2 + $0x184] sm:$0xff] }
 0x515   : > { %12458 = vst [vmem:[#allocation25_spill] sm:$0xff] %v11958_v59 }
 0x517   : > { %9522 = vmatmul.mubr.msk.f32.gmra.mrb[20].mxu1 %vm223_vm0, %v12455_v24 }
 0x518   : > { %9524 = vmatprep.mubr.msk.f32.mxu1 %vm223_vm0, %v12456_v28  ;;  %v11962_v28 = vld [vmem:[#allocation2 + $0x18c] sm:$0xff] }
 0x51b   : > { %9525 = vmatmul.mubr.msk.f32.gmra.mrb[22].mxu1 %vm223_vm0, %v11722_v50 }
 0x51c   : > { %9527 = vmatprep.mubr.msk.f32.mxu1 %vm223_vm0, %v12457_v32  ;;  %v11966_v32 = vld [vmem:[#allocation2 + $0x19c] sm:$0xff] }
 0x51f   : > { %9528 = vmatmul.mubr.msk.f32.gmra.mrb[24].mxu1 %vm223_vm0, %v11730_v8  ;;  %v11970_v8 = vld [vmem:[#allocation2 + $0x1a4] sm:$0xff] }
 0x520   : > { %9530 = vmatprep.mubr.msk.f32.mxu1 %vm223_vm0, %v11734_v13 }
 0x523   : > { %9531 = vmatmul.mubr.msk.f32.gmra.mrb[26].mxu1 %vm223_vm0, %v11738_v62 }
 0x524   : > { %9533 = vmatprep.mubr.msk.f32.mxu1 %vm223_vm0, %v11958_v59  ;;  %v8153_v59 = vld [vmem:[%s12242_s3 + $0x20] sm:$0xf] }
 0x527   : > { %9534 = vmatmul.mubr.msk.f32.gmra.mrb[28].mxu1 %vm223_vm0, %v11962_v28 }
 0x528   : > { %9536 = vmatprep.mubr.msk.f32.mxu1 %vm223_vm0, %v11966_v32 }
 0x52b   : > { %9537 = vmatmul.mubr.msk.f32.gmra.mrb[30].mxu1 %vm223_vm0, %v11970_v8 }
 0x52c   : > { %9541 = vmatprep.mubr.msk.f32.mxu1 %vm223_vm0, %v11521_v21  ;;  %v6239_v21 = vld [vmem:[#allocation2 + $0x1b0] sm:$0xff] }
 0x52f   : > { %9542 = vmatmul.mubr.msk.f32.vlgmr.msra.gmra.mrb[0].mxu1 %vm223_vm0, %v11525_v25  ;;  %v6240_v25 = vld [vmem:[#allocation2 + $0x1b8] sm:$0xff] }
 0x530   : > { %9590 = vmatpush3.msk.msra.mxu1 %vm549_vm2, %v8119_v43  ;;  %9544 = vmatprep.mubr.msk.f32.mxu1 %vm223_vm0, %v11529_v29  ;;  %v6241_v29 = vld [vmem:[#allocation2 + $0x1c8] sm:$0xff] }
 0x531   : > { %9639 = vmatprep.subr.msk.mxu1 %vm549_vm2, %v8153_v59 }
 0x533   : > { %9545 = vmatmul.mubr.msk.f32.gmra.mrb[2].mxu1 %vm223_vm0, %v11533_v33  ;;  %v6242_v33 = vld [vmem:[#allocation2 + $0x1d0] sm:$0xff] }
 0x534   : > { %9547 = vmatprep.mubr.msk.f32.mxu1 %vm223_vm0, %v11537_v35  ;;  %v6601_v35 = vld [vmem:[#allocation2 + $0x62] sm:$0xff] }
 0x537   : > { %9548 = vmatmul.mubr.msk.f32.gmra.mrb[4].mxu1 %vm223_vm0, %v11541_v37  ;;  %v6602_v37 = vld [vmem:[#allocation2 + $0x6a] sm:$0xff] }
 0x538   : > { %9550 = vmatprep.mubr.msk.f32.mxu1 %vm223_vm0, %v11545_v41  ;;  %v6603_v41 = vld [vmem:[#allocation2 + $0x7a] sm:$0xff] }
 0x53b   : > { %9551 = vmatmul.mubr.msk.f32.gmra.mrb[6].mxu1 %vm223_vm0, %v11549_v49  ;;  %v6604_v49 = vld [vmem:[#allocation2 + $0x82] sm:$0xff] }
 0x53c   : > { %9553 = vmatprep.mubr.msk.f32.mxu1 %vm223_vm0, %v11553_v51  ;;  %v6605_v51 = vld [vmem:[#allocation2 + $0x92] sm:$0xff] }
 0x53f   : > { %9554 = vmatmul.mubr.msk.f32.gmra.mrb[8].mxu1 %vm223_vm0, %v11557_v53  ;;  %v6606_v53 = vld [vmem:[#allocation2 + $0x9a] sm:$0xff] }
 0x540   : > { %9556 = vmatprep.mubr.msk.f32.mxu1 %vm223_vm0, %v11561_v55  ;;  %v12473_v55 = vld [vmem:[#allocation21_spill] sm:$0xff] }
 0x543   : > { %9557 = vmatmul.mubr.msk.f32.gmra.mrb[10].mxu1 %vm223_vm0, %v11565_v57  ;;  %v12474_v57 = vld [vmem:[#allocation25_spill] sm:$0xff] }
 0x544   : > { %9559 = vmatprep.mubr.msk.f32.mxu1 %vm223_vm0, %v11569_v0  ;;  %v7019_v0 = vld [vmem:[#allocation2 + $0x1b4] sm:$0xff] }
 0x547   : > { %9560 = vmatmul.mubr.msk.f32.gmra.mrb[12].mxu1 %vm223_vm0, %v11573_v20  ;;  %v7020_v20 = vld [vmem:[#allocation2 + $0x1bc] sm:$0xff] }
 0x548   : > { %9562 = vmatprep.mubr.msk.f32.mxu1 %vm223_vm0, %v11577_v2  ;;  %v7021_v2 = vld [vmem:[#allocation2 + $0x1cc] sm:$0xff] }
 0x54b   : > { %9563 = vmatmul.mubr.msk.f32.gmra.mrb[14].mxu1 %vm223_vm0, %v11581_v22  ;;  %v7022_v22 = vld [vmem:[#allocation2 + $0x1d4] sm:$0xff] }
 0x54c   : > { %9565 = vmatprep.mubr.msk.f32.mxu1 %vm223_vm0, %v11585_v26  ;;  %v12157_v26 = vld [vmem:[%s12243_s4] ss:$0 sm:$0xff] }
 0x54f   : > { %9566 = vmatmul.mubr.msk.f32.gmra.mrb[16].mxu1 %vm223_vm0, %v11589_v30 }
 0x550   : > { %9568 = vmatprep.mubr.msk.f32.mxu1 %vm223_vm0, %v11593_v36 }
 0x553   : > { %9569 = vmatmul.mubr.msk.f32.gmra.mrb[18].mxu1 %vm223_vm0, %v11597_v42 }
 0x554   : > { %9571 = vmatprep.mubr.msk.f32.mxu1 %vm223_vm0, %v11601_v54 }
 0x557   : > { %9572 = vmatmul.mubr.msk.f32.gmra.mrb[20].mxu1 %vm223_vm0, %v11605_v58 }
 0x558   : > { %9574 = vmatprep.mubr.msk.f32.mxu1 %vm223_vm0, %v11609_v60 }
 0x55b   : > { %9575 = vmatmul.mubr.msk.f32.gmra.mrb[22].mxu1 %vm223_vm0, %v11613_v1 }
 0x55c   : > { %9577 = vmatprep.mubr.msk.f32.mxu1 %vm223_vm0, %v11804_v15 }
 0x55f   : > { %9578 = vmatmul.mubr.msk.f32.gmra.mrb[24].mxu1 %vm223_vm0, %v11808_v11 }
 0x560   : > { %9580 = vmatprep.mubr.msk.f32.mxu1 %vm223_vm0, %v11812_v14 }
 0x563   : > { %9581 = vmatmul.mubr.msk.f32.gmra.mrb[26].mxu1 %vm223_vm0, %v11816_v48 }
 0x564   : > { %9583 = vmatprep.mubr.msk.f32.mxu1 %vm223_vm0, %v6239_v21 }
 0x567   : > { %9584 = vmatmul.mubr.msk.f32.gmra.mrb[28].mxu1 %vm223_vm0, %v6240_v25 }
 0x568   : > { %9586 = vmatprep.mubr.msk.f32.mxu1 %vm223_vm0, %v6241_v29 }
 0x56b   : > { %9587 = vmatmul.mubr.msk.f32.gmra.mrb[30].mxu1 %vm223_vm0, %v6242_v33 }
 0x56c   : > { %9591 = vmatprep.mubr.msk.f32.mxu1 %vm223_vm0, %v6601_v35 }
 0x56f   : > { %9592 = vmatmul.mubr.msk.f32.vlgmr.msra.gmra.mrb[0].mxu1 %vm223_vm0, %v6602_v37 }
 0x570   : > { %9640 = vmatpush3.msk.msra.mxu1 %vm549_vm2, %v8153_v59  ;;  %9594 = vmatprep.mubr.msk.f32.mxu1 %vm223_vm0, %v6603_v41 }
 0x573   : > { %9595 = vmatmul.mubr.msk.f32.gmra.mrb[2].mxu1 %vm223_vm0, %v6604_v49 }
 0x574   : > { %9597 = vmatprep.mubr.msk.f32.mxu1 %vm223_vm0, %v6605_v51 }
 0x577   : > { %9598 = vmatmul.mubr.msk.f32.gmra.mrb[4].mxu1 %vm223_vm0, %v6606_v53 }
 0x578   : > { %9600 = vmatprep.mubr.msk.f32.mxu1 %vm223_vm0, %v11388_v46  ;;  %v6629_v46 = vld [vmem:[#allocation2 + $0x1b2] sm:$0xff] }
 0x57b   : > { %9601 = vmatmul.mubr.msk.f32.gmra.mrb[6].mxu1 %vm223_vm0, %v11394_v56  ;;  %v6630_v56 = vld [vmem:[#allocation2 + $0x1ba] sm:$0xff] }
 0x57c   : > { %9603 = vmatprep.mubr.msk.f32.mxu1 %vm223_vm0, %v11400_v5  ;;  %v6631_v5 = vld [vmem:[#allocation2 + $0x1ca] sm:$0xff] }
 0x57f   : > { %9604 = vmatmul.mubr.msk.f32.gmra.mrb[8].mxu1 %vm223_vm0, %v11406_v38  ;;  %v6632_v38 = vld [vmem:[#allocation2 + $0x1d2] sm:$0xff] }
 0x580   : > { %9606 = vmatprep.mubr.msk.f32.mxu1 %vm223_vm0, %v11412_v19  ;;  %v12459_v19 = vld [vmem:[#allocation23_spill] sm:$0xff] }
 0x583   : > { %9607 = vmatmul.mubr.msk.f32.gmra.mrb[10].mxu1 %vm223_vm0, %v11418_v44  ;;  %v12460_v44 = vld [vmem:[#allocation24_spill] sm:$0xff] }
 0x584   : > { %9609 = vmatprep.mubr.msk.f32.mxu1 %vm223_vm0, %v11424_v16  ;;  %v12461_v16 = vld [vmem:[#allocation26_spill] sm:$0xff] }
 0x587   : > { %9610 = vmatmul.mubr.msk.f32.gmra.mrb[12].mxu1 %vm223_vm0, %v11430_v23  ;;  %v12462_v23 = vld [vmem:[#allocation6_spill] sm:$0xff] }
 0x588   : > { %9612 = vmatprep.mubr.msk.f32.mxu1 %vm223_vm0, %v11436_v39  ;;  %v12463_v39 = vld [vmem:[#allocation30_spill] sm:$0xff] }
 0x58b   : > { %9613 = vmatmul.mubr.msk.f32.gmra.mrb[14].mxu1 %vm223_vm0, %v11442_v45  ;;  %v12464_v45 = vld [vmem:[#allocation31_spill] sm:$0xff] }
 0x58c   : > { %9615 = vmatprep.mubr.msk.f32.mxu1 %vm223_vm0, %v11448_v61  ;;  %v12465_v61 = vld [vmem:[#allocation32_spill] sm:$0xff] }
 0x58f   : > { %9616 = vmatmul.mubr.msk.f32.gmra.mrb[16].mxu1 %vm223_vm0, %v11454_v18  ;;  %v12466_v18 = vld [vmem:[#allocation33_spill] sm:$0xff] }
 0x590   : > { %9618 = vmatprep.mubr.msk.f32.mxu1 %vm223_vm0, %v11460_v34  ;;  %v12467_v34 = vld [vmem:[#allocation9_spill] sm:$0xff] }
 0x593   : > { %9619 = vmatmul.mubr.msk.f32.gmra.mrb[18].mxu1 %vm223_vm0, %v11466_v40  ;;  %v12468_v40 = vld [vmem:[#allocation10_spill] sm:$0xff] }
 0x594   : > { %9621 = vmatprep.mubr.msk.f32.mxu1 %vm223_vm0, %v11472_v3  ;;  %v12469_v3 = vld [vmem:[#allocation12_spill] sm:$0xff] }
 0x597   : > { %9622 = vmatmul.mubr.msk.f32.gmra.mrb[20].mxu1 %vm223_vm0, %v11478_v6  ;;  %v12470_v6 = vld [vmem:[#allocation16_spill] sm:$0xff] }
 0x598   : > { %9624 = vmatprep.mubr.msk.f32.mxu1 %vm223_vm0, %v11483_v10  ;;  %v12471_v10 = vld [vmem:[#allocation18_spill] sm:$0xff] }
 0x59b   : > { %9625 = vmatmul.mubr.msk.f32.gmra.mrb[22].mxu1 %vm223_vm0, %v11488_v52  ;;  %v12472_v52 = vld [vmem:[#allocation19_spill] sm:$0xff] }
 0x59c   : > { %9627 = vmatprep.mubr.msk.f32.mxu1 %vm223_vm0, %v11881_v17 }
 0x59f   : > { %9628 = vmatmul.mubr.msk.f32.gmra.mrb[24].mxu1 %vm223_vm0, %v11885_v12 }
 0x5a0   : > { %9630 = vmatprep.mubr.msk.f32.mxu1 %vm223_vm0, %v11889_v27 }
 0x5a3   : > { %9631 = vmatmul.mubr.msk.f32.gmra.mrb[26].mxu1 %vm223_vm0, %v11893_v31 }
 0x5a4   : > { %9633 = vmatprep.mubr.msk.f32.mxu1 %vm223_vm0, %v6629_v46 }
 0x5a7   : > { %9634 = vmatmul.mubr.msk.f32.gmra.mrb[28].mxu1 %vm223_vm0, %v6630_v56 }
 0x5a8   : > { %9636 = vmatprep.mubr.msk.f32.mxu1 %vm223_vm0, %v6631_v5 }
 0x5ab   : > { %9637 = vmatmul.mubr.msk.f32.gmra.mrb[30].mxu1 %vm223_vm0, %v6632_v38 }
 0x5ac   : > { %9641 = vmatprep.mubr.msk.f32.mxu1 %vm223_vm0, %v12438_v63 }
 0x5af   : > { %9642 = vmatmul.mubr.msk.f32.vlgmr.msra.gmra.mrb[0].mxu1 %vm223_vm0, %v12459_v19 }
 0x5b0   : > { %9644 = vmatprep.mubr.msk.f32.mxu1 %vm223_vm0, %v12460_v44 }
 0x5b3   : > { %9645 = vmatmul.mubr.msk.f32.gmra.mrb[2].mxu1 %vm223_vm0, %v12461_v16 }
 0x5b4   : > { %9647 = vmatprep.mubr.msk.f32.mxu1 %vm223_vm0, %v12462_v23 }
 0x5b7   : > { %9648 = vmatmul.mubr.msk.f32.gmra.mrb[4].mxu1 %vm223_vm0, %v12463_v39 }
 0x5b8   : > { %9650 = vmatprep.mubr.msk.f32.mxu1 %vm223_vm0, %v12464_v45 }
 0x5bb   : > { %9651 = vmatmul.mubr.msk.f32.gmra.mrb[6].mxu1 %vm223_vm0, %v12465_v61 }
 0x5bc   : > { %9653 = vmatprep.mubr.msk.f32.mxu1 %vm223_vm0, %v12466_v18 }
 0x5bf   : > { %9654 = vmatmul.mubr.msk.f32.gmra.mrb[8].mxu1 %vm223_vm0, %v12467_v34 }
 0x5c0   : > { %9656 = vmatprep.mubr.msk.f32.mxu1 %vm223_vm0, %v12468_v40 }
 0x5c3   : > { %9657 = vmatmul.mubr.msk.f32.gmra.mrb[10].mxu1 %vm223_vm0, %v12449_v4 }
 0x5c4   : > { %9659 = vmatprep.mubr.msk.f32.mxu1 %vm223_vm0, %v12469_v3 }
 0x5c7   : > { %9660 = vmatmul.mubr.msk.f32.gmra.mrb[12].mxu1 %vm223_vm0, %v12451_v7 }
 0x5c8   : > { %9662 = vmatprep.mubr.msk.f32.mxu1 %vm223_vm0, %v12452_v9 }
 0x5cb   : > { %9663 = vmatmul.mubr.msk.f32.gmra.mrb[14].mxu1 %vm223_vm0, %v12453_v47 }
 0x5cc   : > { %9665 = vmatprep.mubr.msk.f32.mxu1 %vm223_vm0, %v12470_v6 }
 0x5cf   : > { %9666 = vmatmul.mubr.msk.f32.gmra.mrb[16].mxu1 %vm223_vm0, %v12455_v24 }
 0x5d0   : > { %9668 = vmatprep.mubr.msk.f32.mxu1 %vm223_vm0, %v12471_v10 }
 0x5d3   : > { %9669 = vmatmul.mubr.msk.f32.gmra.mrb[18].mxu1 %vm223_vm0, %v11722_v50 }
 0x5d4   : > { %9671 = vmatprep.mubr.msk.f32.mxu1 %vm223_vm0, %v12472_v52 }
 0x5d7   : > { %9672 = vmatmul.mubr.msk.f32.gmra.mrb[20].mxu1 %vm223_vm0, %v12473_v55 }
 0x5d8   : > { %9674 = vmatprep.mubr.msk.f32.mxu1 %vm223_vm0, %v11734_v13 }
 0x5db   : > { %9675 = vmatmul.mubr.msk.f32.gmra.mrb[22].mxu1 %vm223_vm0, %v11738_v62 }
 0x5dc   : > { %9677 = vmatprep.mubr.msk.f32.mxu1 %vm223_vm0, %v12474_v57 }
 0x5df   : > { %9678 = vmatmul.mubr.msk.f32.gmra.mrb[24].mxu1 %vm223_vm0, %v11962_v28 }
 0x5e0   : > { %9680 = vmatprep.mubr.msk.f32.mxu1 %vm223_vm0, %v11966_v32 }
 0x5e3   : > { %9681 = vmatmul.mubr.msk.f32.gmra.mrb[26].mxu1 %vm223_vm0, %v11970_v8 }
 0x5e4   : > { %9683 = vmatprep.mubr.msk.f32.mxu1 %vm223_vm0, %v7019_v0 }
 0x5e7   : > { %9684 = vmatmul.mubr.msk.f32.gmra.mrb[28].mxu1 %vm223_vm0, %v7020_v20 }
 0x5e8   : > { %9686 = vmatprep.mubr.msk.f32.mxu1 %vm223_vm0, %v7021_v2 }
 0x5eb   : > { %9687 = vmatmul.mubr.msk.f32.gmra.mrb[30].mxu1 %vm223_vm0, %v7022_v22 }
 0x682   : > { %v9643_v30 = vpop.f32.mrb[0].mxu1 }
 0x683   : > { %v7190_v36 = vpop.f32.mrb[1].mxu1  ;;  %v7389_v60 = vadd.f32 %v9643_v30, %v12157_v26 }
 0x684   : > { %v7388_v42 = vadd.f32 %v12157_v26, %v7190_v36  ;;  %v7484_v36 = vld [vmem:[%s10454_s9] sm:$0xff]  ;;  %s7496_s9 = scalar_lea.sflag [#allocation4], %s215_s26 }
 0x686   : > { %7420 = vxpose.xlu1.b32.start [1/16] (narrow) %v7388_v42, 8  ;;  %v9646_v54 = vpop.f32.mrb[2].mxu1  ;;  %v7486_v42 = vcombine.high %v7484_v36, %v7484_v36 }
 0x687   : > { %v7200_v58 = vpop.f32.mrb[3].mxu1  ;;  %v7391_v15 = vadd.f32 %v9646_v54, %v12157_v26 }
 0x688   : > { %v7390_v50 = vadd.f32 %v12157_v26, %v7200_v58 }
 0x68a   : > { %7421 = vxpose.xlu1.b32.cont [2/16] (narrow) %v7389_v60, 8  ;;  %v9649_v1 = vpop.f32.mrb[4].mxu1 }
 0x68b   : > { %v7210_v62 = vpop.f32.mrb[5].mxu1  ;;  %v7393_v27 = vadd.f32 %v9649_v1, %v12157_v26 }
 0x68c   : > { %v7392_v48 = vadd.f32 %v12157_v26, %v7210_v62 }
 0x68e   : > { %7422 = vxpose.xlu1.b32.cont [3/16] (narrow) %v7390_v50, 8  ;;  %v9652_v8 = vpop.f32.mrb[6].mxu1 }
 0x68f   : > { %v7220_v13 = vpop.f32.mrb[7].mxu1  ;;  %v7395_v4 = vadd.f32 %v9652_v8, %v12157_v26 }
 0x690   : > { %v7394_v63 = vadd.f32 %v12157_v26, %v7220_v13 }
 0x692   : > { %7423 = vxpose.xlu1.b32.cont [4/16] (narrow) %v7391_v15, 8  ;;  %v9655_v11 = vpop.f32.mrb[8].mxu1 }
 0x693   : > { %v7230_v14 = vpop.f32.mrb[9].mxu1  ;;  %v7397_v33 = vadd.f32 %v9655_v11, %v12157_v26 }
 0x694   : > { %v7396_v47 = vadd.f32 %v12157_v26, %v7230_v14 }
 0x696   : > { %7424 = vxpose.xlu1.b32.cont [5/16] (narrow) %v7392_v48, 8  ;;  %v9658_v17 = vpop.f32.mrb[10].mxu1 }
 0x697   : > { %v7240_v12 = vpop.f32.mrb[11].mxu1  ;;  %v7399_v38 = vadd.f32 %v9658_v17, %v12157_v26 }
 0x698   : > { %v7398_v51 = vadd.f32 %v12157_v26, %v7240_v12 }
 0x69a   : > { %7425 = vxpose.xlu1.b32.cont [6/16] (narrow) %v7393_v27, 8  ;;  %v9661_v31 = vpop.f32.mrb[12].mxu1 }
 0x69b   : > { %v7250_v43 = vpop.f32.mrb[13].mxu1  ;;  %v7401_v40 = vadd.f32 %v9661_v31, %v12157_v26 }
 0x69c   : > { %v7400_v39 = vadd.f32 %v12157_v26, %v7250_v43 }
 0x69e   : > { %7426 = vxpose.xlu1.b32.cont [7/16] (narrow) %v7394_v63, 8  ;;  %v9664_v24 = vpop.f32.mrb[14].mxu1 }
 0x69f   : > { %v7260_v28 = vpop.f32.mrb[15].mxu1  ;;  %v7403_v22 = vadd.f32 %v9664_v24, %v12157_v26 }
 0x6a0   : > { %v7402_v55 = vadd.f32 %v12157_v26, %v7260_v28 }
 0x6a2   : > { %7427 = vxpose.xlu1.b32.cont [8/16] (narrow) %v7395_v4, 8  ;;  %v9667_v32 = vpop.f32.mrb[16].mxu1 }
 0x6a3   : > { %v7405_v7 = vadd.f32 %v9667_v32, %v12157_v26  ;;  %v7270_v9 = vpop.f32.mrb[17].mxu1 }
 0x6a4   : > { %v7404_v59 = vadd.f32 %v12157_v26, %v7270_v9 }
 0x6a6   : > { %7428 = vxpose.xlu1.b32.cont [9/16] (narrow) %v7396_v47, 8  ;;  %v9670_v21 = vpop.f32.mrb[18].mxu1 }
 0x6a7   : > { %v7407_v25 = vadd.f32 %v9670_v21, %v12157_v26  ;;  %v7280_v29 = vpop.f32.mrb[19].mxu1 }
 0x6a8   : > { %v7406_v35 = vadd.f32 %v12157_v26, %v7280_v29 }
 0x6aa   : > { %7429 = vxpose.xlu1.b32.cont [10/16] (narrow) %v7397_v33, 8  ;;  %v9673_v37 = vpop.f32.mrb[20].mxu1 }
 0x6ab   : > { %v7409_v41 = vadd.f32 %v9673_v37, %v12157_v26  ;;  %v7290_v49 = vpop.f32.mrb[21].mxu1 }
 0x6ac   : > { %v7408_v53 = vadd.f32 %v12157_v26, %v7290_v49 }
 0x6ae   : > { %7430 = vxpose.xlu1.b32.cont [11/16] (narrow) %v7398_v51, 8  ;;  %v9676_v46 = vpop.f32.mrb[22].mxu1 }
 0x6af   : > { %v7411_v56 = vadd.f32 %v9676_v46, %v12157_v26  ;;  %v7300_v5 = vpop.f32.mrb[23].mxu1 }
 0x6b0   : > { %v7410_v19 = vadd.f32 %v12157_v26, %v7300_v5 }
 0x6b2   : > { %7431 = vxpose.xlu1.b32.cont [12/16] (narrow) %v7399_v38, 8  ;;  %v9679_v44 = vpop.f32.mrb[24].mxu1 }
 0x6b3   : > { %v7413_v16 = vadd.f32 %v9679_v44, %v12157_v26  ;;  %v7310_v23 = vpop.f32.mrb[25].mxu1 }
 0x6b4   : > { %v7412_v45 = vadd.f32 %v12157_v26, %v7310_v23 }
 0x6b6   : > { %7432 = vxpose.xlu1.b32.cont [13/16] (narrow) %v7400_v39, 8  ;;  %v9682_v61 = vpop.f32.mrb[26].mxu1 }
 0x6b7   : > { %v7415_v18 = vadd.f32 %v9682_v61, %v12157_v26  ;;  %v7320_v34 = vpop.f32.mrb[27].mxu1 }
 0x6b8   : > { %v7414_v3 = vadd.f32 %v12157_v26, %v7320_v34 }
 0x6ba   : > { %7433 = vxpose.xlu1.b32.cont [14/16] (narrow) %v7401_v40, 8  ;;  %v9685_v6 = vpop.f32.mrb[28].mxu1 }
 0x6bb   : > { %v7417_v10 = vadd.f32 %v9685_v6, %v12157_v26  ;;  %v7330_v52 = vpop.f32.mrb[29].mxu1 }
 0x6bc   : > { %v7416_v57 = vadd.f32 %v12157_v26, %v7330_v52 }
 0x6be   : > { %7434 = vxpose.xlu1.b32.cont [15/16] (narrow) %v7402_v55, 8  ;;  %v9688_v0 = vpop.f32.mrb[30].mxu1 }
 0x6bf   : > { %v7419_v20 = vadd.f32 %v9688_v0, %v12157_v26  ;;  %v7340_v2 = vpop.f32.mrb[31].mxu1 }
 0x6c0   : > { %v7418_v30 = vadd.f32 %v12157_v26, %v7340_v2 }
 0x6c2   : > { %7435 = vxpose.xlu1.b32.end [16/16] (narrow) %v7403_v22, 8 }
 0x6c6   : > { %7452 = vxpose.xlu1.b32.start [1/16] (narrow) %v7404_v59, 8 }
 0x6ca   : > { %7453 = vxpose.xlu1.b32.cont [2/16] (narrow) %v7405_v7, 8 }
 0x6ce   : > { %7454 = vxpose.xlu1.b32.cont [3/16] (narrow) %v7406_v35, 8 }
 0x6d2   : > { %7455 = vxpose.xlu1.b32.cont [4/16] (narrow) %v7407_v25, 8 }
 0x6d6   : > { %7456 = vxpose.xlu1.b32.cont [5/16] (narrow) %v7408_v53, 8 }
 0x6da   : > { %7457 = vxpose.xlu1.b32.cont [6/16] (narrow) %v7409_v41, 8 }
 0x6de   : > { %7458 = vxpose.xlu1.b32.cont [7/16] (narrow) %v7410_v19, 8 }
 0x6e2   : > { %7459 = vxpose.xlu1.b32.cont [8/16] (narrow) %v7411_v56, 8 }
 0x6e6   : > { %7460 = vxpose.xlu1.b32.cont [9/16] (narrow) %v7412_v45, 8 }
 0x6ea   : > { %7461 = vxpose.xlu1.b32.cont [10/16] (narrow) %v7413_v16, 8 }
 0x6ee   : > { %7462 = vxpose.xlu1.b32.cont [11/16] (narrow) %v7414_v3, 8 }
 0x6f2   : > { %7463 = vxpose.xlu1.b32.cont [12/16] (narrow) %v7415_v18, 8 }
 0x6f6   : > { %7464 = vxpose.xlu1.b32.cont [13/16] (narrow) %v7416_v57, 8 }
 0x6fa   : > { %7465 = vxpose.xlu1.b32.cont [14/16] (narrow) %v7417_v10, 8 }
 0x6fe   : > { %7466 = vxpose.xlu1.b32.cont [15/16] (narrow) %v7418_v30, 8 }
 0x702   : > { %7467 = vxpose.xlu1.b32.end [16/16] (narrow) %v7419_v20, 8 }
 0x706   : > { %v7436_v26 = vpop.trf.xlu1 }
 0x707   : > { %v7488_v58 = vadd.f32 %v7484_v36, %v7436_v26 }
 0x746   : > { %v7468_v54 = vpop.trf.xlu1 }
 0x747   : > { %v7489_v60 = vadd.f32 %v7486_v42, %v7468_v54 }
 0x749   : > { %v7492_v1 = vcombine.low %v7488_v58, %v7489_v60 }
 0x74b   : > { %7494 = vst [vmem:[%s217_s7] sm:$0xff] %v7492_v1 }
 0x74c   : > { %10256 = shalt.err (!%p10253_p3)
}
 0x74d   : > { %s10257_s16 = scalar_lea.hbm %s12197_s12, 128  ;;  %s10261_s25 = scalar_lea.hbm %s12244_s5, 256 }
 0x74e   : > { %p10258_p4 = scmp.ne.s32.totalorder %s12197_s12, %s10257_s16  ;;  %p10262_p9 = scmp.lt.u32.totalorder %s12197_s12, %s12244_s5 }
 0x74f   : > { %p10263_p10 = scmp.lt.u32.totalorder %s10261_s25, %s10257_s16  ;;  %p10265_p12 = scmp.lt.u32.totalorder %s10257_s16, %s12197_s12 }
 0x750   : > { %p10259_p7 = pnand %p10258_p4, %p10377_p5 }
 0x751   : > { %p10264_p11 = por %p10263_p10, %p10262_p9 }
 0x752   : > { %p10260_p8 = pneg %p10259_p7 }
 0x753   : > { %p10266_p13 = por %p10265_p12, %p10264_p11 }
 0x755   : > { %p10267_p0 = pnand %p10266_p13, %p10260_p8 }
 0x757   : > { %10270 = shalt.err (!%p10267_p0)
}
 0x758   : > { %10201 = dma.vmem_to_hbm [thread:$0]  (%p10377_p5), %s12199_s8, 128, %s12197_s12, %s7496_s9  }
 0x759 PF: > { %p10207_p1 = scmp.ge.s32.totalorder %s10305_s21, 2  ;;  %s7522_s6 = sand.u32 1, %s10293_s18  }
 0x75a   : > { %s7523_s7 = scalar_lea.sflag [#allocation4], %s7522_s6 }
 0x75b   : > { %p10204_p2 = pnand %p10207_p1, %p10381_p6 }
 0x75d   : > { %10288 = dma.done.wait (!%p10204_p2), %s7523_s7, 128  }
 0x75e   : > { %10290 = vsyncadd (!%p10204_p2), %s7523_s7, 4294967168  ;;  %p15_p3 = scmp.ge.s32.totalorder %s10364_s24, 4   ;;  %s12475_s18 = smov %s10297_s19 }
 0x75f   : > { %s12476_s19 = smov %s10301_s20  ;;  %s12477_s20 = smov %s10375_s27 }
 0x760   : > { %s12478_s21 = smov %s10364_s24  ;;  %17 = sbr.rel (!%p15_p3) target bundleno = 3 (0x3), region = 93 }
 0x767   :  { %7528 = vsyncpa [#allocation4], 1 }
 0x768   :  { %7530 = vsyncpa [#allocation4 + $0x1], 1 }

</bundles_post_ra>
